<compile_context>
chip_gen: v7x
topology: tpu7x:2x2x1
jax: 0.10.0
libtpu: 0.0.40
codegen_flags: <defaults>
</compile_context>

<pallas_src>
import jax
import jax.numpy as jnp
from jax.experimental import pallas as pl
from jax.experimental.pallas import tpu as pltpu

IN_DIM = 28 * 28
HID = 64
NCLS = 10
NPAD = 128        # padded class lanes for the fc4 matmul / softmax (lane-dense)
T_CLS = 16        # padded class sublanes of the transposed (T_CLS, B) output
NEG_BIG = -1e30   # padded-class bias: exp(NEG_BIG - m) == 0 exactly in f32


def net_kernel(x_ref, w1_ref, b1_ref, w2_ref, b2_ref,
               w3_ref, b3_ref, w4_ref, b4_ref, o_ref):
    # x arrives as f32 straight from HBM; cast to bf16 on-chip (VPU) so the MXU
    # runs in fast bf16 mode without an extra HBM pass in the wrapper.
    x = x_ref[...].astype(jnp.bfloat16)                                 # (tb, 784)
    h = jnp.dot(x, w1_ref[...], preferred_element_type=jnp.float32) + b1_ref[...]
    h = jnp.maximum(h, 0.0).astype(jnp.bfloat16)
    h = jnp.dot(h, w2_ref[...], preferred_element_type=jnp.float32) + b2_ref[...]
    h = jnp.maximum(h, 0.0).astype(jnp.bfloat16)
    h = jnp.dot(h, w3_ref[...], preferred_element_type=jnp.float32) + b3_ref[...]
    h = jnp.maximum(h, 0.0).astype(jnp.bfloat16)
    logits = jnp.dot(h, w4_ref[...], preferred_element_type=jnp.float32) + b4_ref[...]
    # Numerically stable log_softmax over the 128-lane class dim.  The 118
    # padded lanes carry bias -1e30, so they never win the max and contribute
    # exactly 0 to the exp-sum -> lanes 0..9 equal log_softmax over 10 classes.
    m = jnp.max(logits, axis=-1, keepdims=True)
    s = logits - m
    lse = jnp.log(jnp.sum(jnp.exp(s), axis=-1, keepdims=True))
    lp = s - lse                                                        # (tb, 128) f32
    # Narrow, lane-dense store: transpose on the idle XLU and write only the
    # first 16 class sublanes -> 64 B/row of HBM writes instead of 512 B/row.
    o_ref[...] = jnp.transpose(lp)[:T_CLS, :]


def net_forward(x, params, *, tb=1024):
    """x: (B, 784) float32 -> (B, 10) float32 log-probabilities."""
    w1, b1, w2, b2, w3, b3, w4p, b4p = params
    B, D = x.shape
    assert D == IN_DIM

    # Batch tile: the batch maps onto the 128-lane axis of the transposed
    # output, so multi-step tiles are multiples of 128.  Cap the tile so any
    # batch > 128 rows yields >= 2 grid steps (v7x megacore).  Batches < 128
    # rows get a one-off tiny row pad (< 400 KiB) so every in-kernel shape
    # stays (8,128)-aligned.
    if B < 128:
        xk = jnp.pad(x, ((0, 128 - B), (0, 0)))
        Bk, tb_eff = 128, 128
    else:
        xk, Bk = x, B
        cap = max(128, ((B - 1) // 128) * 128)       # forces grid >= 2 when B > 128
        tb_eff = min(max(128, (tb // 128) * 128), cap)
    grid = (pl.cdiv(Bk, tb_eff),)

    x_item = xk.dtype.itemsize
    weight_bytes = ((IN_DIM * HID + 2 * HID * HID + HID * NPAD) * 2
                    + (3 * HID + NPAD) * 4)

    # VMEM budget from the tiles actually used: double-buffered x/out, resident
    # weights, in-kernel temporaries (bf16 x copy, h, logits, transpose), 2x headroom.
    x_tile = tb_eff * IN_DIM * x_item
    out_tile = T_CLS * tb_eff * 4
    tmp = tb_eff * (IN_DIM * 2 + 3 * HID * 4 + 3 * NPAD * 4)
    vmem_limit = int(min(max(2 * (2 * (x_tile + out_tile) + weight_bytes + tmp),
                             16 << 20), 96 << 20))

    cost = pl.CostEstimate(
        flops=2 * Bk * (IN_DIM * HID + 2 * HID * HID + HID * NPAD),
        transcendentals=Bk * (NPAD + 1),
        bytes_accessed=Bk * IN_DIM * x_item + weight_bytes + T_CLS * Bk * 4,
    )

    def run(weight_mode):
        def resident(shape):
            # Constant index_map: DMA'd once, stays resident across grid steps.
            return pl.BlockSpec(shape, lambda i: (0, 0), pipeline_mode=weight_mode)

        return pl.pallas_call(
            net_kernel,
            out_shape=jax.ShapeDtypeStruct((T_CLS, Bk), jnp.float32),
            grid_spec=pltpu.PrefetchScalarGridSpec(
                num_scalar_prefetch=0,
                grid=grid,
                in_specs=[
                    pl.BlockSpec((tb_eff, IN_DIM), lambda i: (i, 0)),   # x (f32)
                    resident(w1.shape), resident(b1.shape),
                    resident(w2.shape), resident(b2.shape),
                    resident(w3.shape), resident(b3.shape),
                    resident(w4p.shape), resident(b4p.shape),
                ],
                out_specs=pl.BlockSpec((T_CLS, tb_eff), lambda i: (0, i)),
            ),
            compiler_params=pltpu.CompilerParams(
                dimension_semantics=("parallel",),
                vmem_limit_bytes=vmem_limit),
            cost_estimate=cost,
        )(xk, w1, b1, w2, b2, w3, b3, w4p, b4p)

    try:
        # Single-buffered resident weights (no dead second buffer, ~130 KiB saved).
        out_t = run(pl.Buffered(1))
    except Exception:
        out_t = run(None)   # fall back to default double buffering if unsupported

    # Tiny wrapper-side fixup: drop padded classes / padded rows, back to (B, 10).
    return out_t[:NCLS, :B].T


def init_params(key):
    """Init mimicking nn.Linear defaults (uniform(+-1/sqrt(fan_in))).
    Weights are stored transposed [in, out] in bf16; biases [1, out] f32.
    The fc4 head is padded 10 -> 128 output lanes (zero weights, -1e30 bias)."""
    dims = [(IN_DIM, HID), (HID, HID), (HID, HID), (HID, NCLS)]
    params = []
    keys = jax.random.split(key, 2 * len(dims))
    for li, (fan_in, fan_out) in enumerate(dims):
        bound = 1.0 / (fan_in ** 0.5)
        w = jax.random.uniform(keys[2 * li], (fan_in, fan_out),
                               minval=-bound, maxval=bound, dtype=jnp.float32)
        b = jax.random.uniform(keys[2 * li + 1], (1, fan_out),
                               minval=-bound, maxval=bound, dtype=jnp.float32)
        if li == len(dims) - 1:   # lane-dense pad of the classifier head
            w = jnp.pad(w, ((0, 0), (0, NPAD - NCLS)))
            b = jnp.pad(b, ((0, 0), (0, NPAD - NCLS)), constant_values=NEG_BIG)
        params += [w.astype(jnp.bfloat16), b.astype(jnp.float32)]
    return tuple(params)


def net_reference(x, params):
    """Pure-JAX reference using the same bf16/f32 mixed precision as the kernel."""
    w1, b1, w2, b2, w3, b3, w4p, b4p = params
    w4, b4 = w4p[:, :NCLS], b4p[:, :NCLS]
    h = x.astype(jnp.bfloat16)
    h = jnp.maximum(jnp.dot(h, w1, preferred_element_type=jnp.float32) + b1, 0.0)
    h = jnp.maximum(jnp.dot(h.astype(jnp.bfloat16), w2,
                            preferred_element_type=jnp.float32) + b2, 0.0)
    h = jnp.maximum(jnp.dot(h.astype(jnp.bfloat16), w3,
                            preferred_element_type=jnp.float32) + b3, 0.0)
    logits = jnp.dot(h.astype(jnp.bfloat16), w4,
                     preferred_element_type=jnp.float32) + b4
    return jax.nn.log_softmax(logits, axis=1)


if __name__ == "__main__":
    key = jax.random.PRNGKey(0)
    pkey, xkey1, xkey2 = jax.random.split(key, 3)
    params = init_params(pkey)

    # Small batch (B=100 < 128): single grid step, tiny row-pad path.
    x1 = jax.random.normal(xkey1, (100, IN_DIM), dtype=jnp.float32)
    out1 = net_forward(x1, params)
    jax.block_until_ready(out1)

    # Larger batch (B=300): default tb -> tb_eff=256, grid=2 ("parallel" axis,
    # both v7x cores) with a ragged last block handled in-kernel (no wrapper pad).
    x2 = jax.random.normal(xkey2, (300, IN_DIM), dtype=jnp.float32)
    out2 = net_forward(x2, params)
    jax.block_until_ready(out2)

    ref1 = net_reference(x1, params)
    ref2 = net_reference(x2, params)
    assert out1.shape == (100, NCLS) and out2.shape == (300, NCLS)
    assert jnp.allclose(out1, ref1, atol=5e-3, rtol=5e-3), "mismatch (B=100) vs reference"
    assert jnp.allclose(out2, ref2, atol=5e-3, rtol=5e-3), "mismatch (B=300) vs reference"
    print("KERNEL_OK")
</pallas_src>

<mosaic_0001>
module attributes {stable_mosaic.version = 11 : i64} {
  func.func @net_kernel(%arg0: i32, %arg1: memref<128x784xf32, #tpu.memory_space<vmem>>, %arg2: memref<784x64xbf16, #tpu.memory_space<vmem>>, %arg3: memref<1x64xf32, #tpu.memory_space<vmem>>, %arg4: memref<64x64xbf16, #tpu.memory_space<vmem>>, %arg5: memref<1x64xf32, #tpu.memory_space<vmem>>, %arg6: memref<64x64xbf16, #tpu.memory_space<vmem>>, %arg7: memref<1x64xf32, #tpu.memory_space<vmem>>, %arg8: memref<64x128xbf16, #tpu.memory_space<vmem>>, %arg9: memref<1x128xf32, #tpu.memory_space<vmem>>, %arg10: memref<16x128xf32, #tpu.memory_space<vmem>>) attributes {dimension_semantics = [#tpu.dimension_semantics<parallel>], iteration_bounds = array<i64: 1>, scalar_prefetch = 0 : i64, scratch_operands = 0 : i64, tpu.core_type = #tpu.core_type<tc>, window_params = [{transform_indices = @transform_0, window_bounds = array<i64: 128, 784>}, {pipeline_mode = #tpu.pipeline_mode<synchronous>, transform_indices = @transform_1, window_bounds = array<i64: 784, 64>}, {pipeline_mode = #tpu.pipeline_mode<synchronous>, transform_indices = @transform_2, window_bounds = array<i64: 1, 64>}, {pipeline_mode = #tpu.pipeline_mode<synchronous>, transform_indices = @transform_3, window_bounds = array<i64: 64, 64>}, {pipeline_mode = #tpu.pipeline_mode<synchronous>, transform_indices = @transform_4, window_bounds = array<i64: 1, 64>}, {pipeline_mode = #tpu.pipeline_mode<synchronous>, transform_indices = @transform_5, window_bounds = array<i64: 64, 64>}, {pipeline_mode = #tpu.pipeline_mode<synchronous>, transform_indices = @transform_6, window_bounds = array<i64: 1, 64>}, {pipeline_mode = #tpu.pipeline_mode<synchronous>, transform_indices = @transform_7, window_bounds = array<i64: 64, 128>}, {pipeline_mode = #tpu.pipeline_mode<synchronous>, transform_indices = @transform_8, window_bounds = array<i64: 1, 128>}, {transform_indices = @transform_9, window_bounds = array<i64: 16, 128>}]} {
    %c0 = arith.constant 0 : index
    %c0_0 = arith.constant 0 : index
    %0 = vector.load %arg1[%c0, %c0_0] : memref<128x784xf32, #tpu.memory_space<vmem>>, vector<128x784xf32>
    %1 = arith.truncf %0 : vector<128x784xf32> to vector<128x784xbf16>
    %c0_1 = arith.constant 0 : index
    %c0_2 = arith.constant 0 : index
    %2 = vector.load %arg2[%c0_1, %c0_2] : memref<784x64xbf16, #tpu.memory_space<vmem>>, vector<784x64xbf16>
    %cst = arith.constant dense<0.000000e+00> : vector<128x64xf32>
    %3 = tpu.matmul %1, %2, %cst {dimension_numbers = #tpu.dot_dimension_numbers<[1], [0], [0], [1], [0, 0, 1, 1], [], []>} : vector<128x784xbf16>, vector<784x64xbf16>, vector<128x64xf32> -> vector<128x64xf32>
    %c0_3 = arith.constant 0 : index
    %c0_4 = arith.constant 0 : index
    %4 = vector.load %arg3[%c0_3, %c0_4] : memref<1x64xf32, #tpu.memory_space<vmem>>, vector<1x64xf32>
    %5 = vector.broadcast %4 : vector<1x64xf32> to vector<128x64xf32>
    %6 = arith.addf %3, %5 : vector<128x64xf32>
    %cst_5 = arith.constant 0.000000e+00 : f32
    %7 = vector.broadcast %cst_5 : f32 to vector<128x64xf32>
    %8 = arith.maximumf %6, %7 : vector<128x64xf32>
    %9 = arith.truncf %8 : vector<128x64xf32> to vector<128x64xbf16>
    %c0_6 = arith.constant 0 : index
    %c0_7 = arith.constant 0 : index
    %10 = vector.load %arg4[%c0_6, %c0_7] : memref<64x64xbf16, #tpu.memory_space<vmem>>, vector<64x64xbf16>
    %cst_8 = arith.constant dense<0.000000e+00> : vector<128x64xf32>
    %11 = tpu.matmul %9, %10, %cst_8 {dimension_numbers = #tpu.dot_dimension_numbers<[1], [0], [0], [1], [0, 0, 1, 1], [], []>} : vector<128x64xbf16>, vector<64x64xbf16>, vector<128x64xf32> -> vector<128x64xf32>
    %c0_9 = arith.constant 0 : index
    %c0_10 = arith.constant 0 : index
    %12 = vector.load %arg5[%c0_9, %c0_10] : memref<1x64xf32, #tpu.memory_space<vmem>>, vector<1x64xf32>
    %13 = vector.broadcast %12 : vector<1x64xf32> to vector<128x64xf32>
    %14 = arith.addf %11, %13 : vector<128x64xf32>
    %cst_11 = arith.constant 0.000000e+00 : f32
    %15 = vector.broadcast %cst_11 : f32 to vector<128x64xf32>
    %16 = arith.maximumf %14, %15 : vector<128x64xf32>
    %17 = arith.truncf %16 : vector<128x64xf32> to vector<128x64xbf16>
    %c0_12 = arith.constant 0 : index
    %c0_13 = arith.constant 0 : index
    %18 = vector.load %arg6[%c0_12, %c0_13] : memref<64x64xbf16, #tpu.memory_space<vmem>>, vector<64x64xbf16>
    %cst_14 = arith.constant dense<0.000000e+00> : vector<128x64xf32>
    %19 = tpu.matmul %17, %18, %cst_14 {dimension_numbers = #tpu.dot_dimension_numbers<[1], [0], [0], [1], [0, 0, 1, 1], [], []>} : vector<128x64xbf16>, vector<64x64xbf16>, vector<128x64xf32> -> vector<128x64xf32>
    %c0_15 = arith.constant 0 : index
    %c0_16 = arith.constant 0 : index
    %20 = vector.load %arg7[%c0_15, %c0_16] : memref<1x64xf32, #tpu.memory_space<vmem>>, vector<1x64xf32>
    %21 = vector.broadcast %20 : vector<1x64xf32> to vector<128x64xf32>
    %22 = arith.addf %19, %21 : vector<128x64xf32>
    %cst_17 = arith.constant 0.000000e+00 : f32
    %23 = vector.broadcast %cst_17 : f32 to vector<128x64xf32>
    %24 = arith.maximumf %22, %23 : vector<128x64xf32>
    %25 = arith.truncf %24 : vector<128x64xf32> to vector<128x64xbf16>
    %c0_18 = arith.constant 0 : index
    %c0_19 = arith.constant 0 : index
    %26 = vector.load %arg8[%c0_18, %c0_19] : memref<64x128xbf16, #tpu.memory_space<vmem>>, vector<64x128xbf16>
    %cst_20 = arith.constant dense<0.000000e+00> : vector<128x128xf32>
    %27 = tpu.matmul %25, %26, %cst_20 {dimension_numbers = #tpu.dot_dimension_numbers<[1], [0], [0], [1], [0, 0, 1, 1], [], []>} : vector<128x64xbf16>, vector<64x128xbf16>, vector<128x128xf32> -> vector<128x128xf32>
    %c0_21 = arith.constant 0 : index
    %c0_22 = arith.constant 0 : index
    %28 = vector.load %arg9[%c0_21, %c0_22] : memref<1x128xf32, #tpu.memory_space<vmem>>, vector<1x128xf32>
    %29 = vector.broadcast %28 : vector<1x128xf32> to vector<128x128xf32>
    %30 = arith.addf %27, %29 : vector<128x128xf32>
    %cst_23 = arith.constant dense<0xFF800000> : vector<128xf32>
    %31 = vector.multi_reduction <maximumf>, %30, %cst_23 [1] : vector<128x128xf32> to vector<128xf32>
    %32 = vector.shape_cast %31 : vector<128xf32> to vector<128x1xf32>
    %33 = vector.broadcast %32 : vector<128x1xf32> to vector<128x128xf32>
    %34 = arith.subf %30, %33 : vector<128x128xf32>
    %35 = math.exp %34 : vector<128x128xf32>
    %cst_24 = arith.constant dense<0.000000e+00> : vector<128xf32>
    %36 = vector.multi_reduction <add>, %35, %cst_24 [1] : vector<128x128xf32> to vector<128xf32>
    %37 = vector.shape_cast %36 : vector<128xf32> to vector<128x1xf32>
    %38 = math.log %37 : vector<128x1xf32>
    %39 = vector.broadcast %38 : vector<128x1xf32> to vector<128x128xf32>
    %40 = arith.subf %34, %39 : vector<128x128xf32>
    %41 = tpu.transpose %40, [1, 0] : vector<128x128xf32> -> vector<128x128xf32>
    %42 = vector.extract_strided_slice %41 {offsets = [0, 0], sizes = [16, 128], strides = [1, 1]} : vector<128x128xf32> to vector<16x128xf32>
    %c0_25 = arith.constant 0 : index
    %c0_26 = arith.constant 0 : index
    %43 = vector.load %arg10[%c0_25, %c0_26] : memref<16x128xf32, #tpu.memory_space<vmem>>, vector<16x128xf32>
    tpu.vector_store %arg10[%c0_25, %c0_26], %42 {strides = array<i32>} : memref<16x128xf32, #tpu.memory_space<vmem>>, vector<16x128xf32>,
    return
  }
  func.func @transform_0(%arg0: i32) -> (i32, i32) {
    %c0_i32 = arith.constant 0 : i32
    %c0_i32_0 = arith.constant 0 : i32
    return %arg0, %c0_i32 : i32, i32
  }
  func.func @transform_1(%arg0: i32) -> (i32, i32) {
    %c0_i32 = arith.constant 0 : i32
    %c0_i32_0 = arith.constant 0 : i32
    %c0_i32_1 = arith.constant 0 : i32
    return %c0_i32, %c0_i32_0 : i32, i32
  }
  func.func @transform_2(%arg0: i32) -> (i32, i32) {
    %c0_i32 = arith.constant 0 : i32
    %c0_i32_0 = arith.constant 0 : i32
    %c0_i32_1 = arith.constant 0 : i32
    return %c0_i32, %c0_i32_0 : i32, i32
  }
  func.func @transform_3(%arg0: i32) -> (i32, i32) {
    %c0_i32 = arith.constant 0 : i32
    %c0_i32_0 = arith.constant 0 : i32
    %c0_i32_1 = arith.constant 0 : i32
    return %c0_i32, %c0_i32_0 : i32, i32
  }
  func.func @transform_4(%arg0: i32) -> (i32, i32) {
    %c0_i32 = arith.constant 0 : i32
    %c0_i32_0 = arith.constant 0 : i32
    %c0_i32_1 = arith.constant 0 : i32
    return %c0_i32, %c0_i32_0 : i32, i32
  }
  func.func @transform_5(%arg0: i32) -> (i32, i32) {
    %c0_i32 = arith.constant 0 : i32
    %c0_i32_0 = arith.constant 0 : i32
    %c0_i32_1 = arith.constant 0 : i32
    return %c0_i32, %c0_i32_0 : i32, i32
  }
  func.func @transform_6(%arg0: i32) -> (i32, i32) {
    %c0_i32 = arith.constant 0 : i32
    %c0_i32_0 = arith.constant 0 : i32
    %c0_i32_1 = arith.constant 0 : i32
    return %c0_i32, %c0_i32_0 : i32, i32
  }
  func.func @transform_7(%arg0: i32) -> (i32, i32) {
    %c0_i32 = arith.constant 0 : i32
    %c0_i32_0 = arith.constant 0 : i32
    %c0_i32_1 = arith.constant 0 : i32
    return %c0_i32, %c0_i32_0 : i32, i32
  }
  func.func @transform_8(%arg0: i32) -> (i32, i32) {
    %c0_i32 = arith.constant 0 : i32
    %c0_i32_0 = arith.constant 0 : i32
    %c0_i32_1 = arith.constant 0 : i32
    return %c0_i32, %c0_i32_0 : i32, i32
  }
  func.func @transform_9(%arg0: i32) -> (i32, i32) {
    %c0_i32 = arith.constant 0 : i32
    %c0_i32_0 = arith.constant 0 : i32
    return %c0_i32, %arg0 : i32, i32
  }
}

module attributes {stable_mosaic.version = 11 : i64} {
  func.func @net_kernel(%arg0: i32, %arg1: memref<128x784xf32, #tpu.memory_space<vmem>>, %arg2: memref<784x64xbf16, #tpu.memory_space<vmem>>, %arg3: memref<1x64xf32, #tpu.memory_space<vmem>>, %arg4: memref<64x64xbf16, #tpu.memory_space<vmem>>, %arg5: memref<1x64xf32, #tpu.memory_space<vmem>>, %arg6: memref<64x64xbf16, #tpu.memory_space<vmem>>, %arg7: memref<1x64xf32, #tpu.memory_space<vmem>>, %arg8: memref<64x128xbf16, #tpu.memory_space<vmem>>, %arg9: memref<1x128xf32, #tpu.memory_space<vmem>>, %arg10: memref<16x128xf32, #tpu.memory_space<vmem>>) attributes {dimension_semantics = [#tpu.dimension_semantics<parallel>], iteration_bounds = array<i64: 1>, scalar_prefetch = 0 : i64, scratch_operands = 0 : i64, tpu.core_type = #tpu.core_type<tc>, window_params = [{transform_indices = @transform_0, window_bounds = array<i64: 128, 784>}, {pipeline_mode = #tpu.pipeline_mode<synchronous>, transform_indices = @transform_1, window_bounds = array<i64: 784, 64>}, {pipeline_mode = #tpu.pipeline_mode<synchronous>, transform_indices = @transform_2, window_bounds = array<i64: 1, 64>}, {pipeline_mode = #tpu.pipeline_mode<synchronous>, transform_indices = @transform_3, window_bounds = array<i64: 64, 64>}, {pipeline_mode = #tpu.pipeline_mode<synchronous>, transform_indices = @transform_4, window_bounds = array<i64: 1, 64>}, {pipeline_mode = #tpu.pipeline_mode<synchronous>, transform_indices = @transform_5, window_bounds = array<i64: 64, 64>}, {pipeline_mode = #tpu.pipeline_mode<synchronous>, transform_indices = @transform_6, window_bounds = array<i64: 1, 64>}, {pipeline_mode = #tpu.pipeline_mode<synchronous>, transform_indices = @transform_7, window_bounds = array<i64: 64, 128>}, {pipeline_mode = #tpu.pipeline_mode<synchronous>, transform_indices = @transform_8, window_bounds = array<i64: 1, 128>}, {transform_indices = @transform_9, window_bounds = array<i64: 16, 128>}]} {
    %c0 = arith.constant 0 : index
    %c0_0 = arith.constant 0 : index
    %0 = vector.load %arg1[%c0, %c0_0] : memref<128x784xf32, #tpu.memory_space<vmem>>, vector<128x784xf32>
    %1 = arith.truncf %0 : vector<128x784xf32> to vector<128x784xbf16>
    %c0_1 = arith.constant 0 : index
    %c0_2 = arith.constant 0 : index
    %2 = vector.load %arg2[%c0_1, %c0_2] : memref<784x64xbf16, #tpu.memory_space<vmem>>, vector<784x64xbf16>
    %cst = arith.constant dense<0.000000e+00> : vector<128x64xf32>
    %3 = tpu.matmul %1, %2, %cst {dimension_numbers = #tpu.dot_dimension_numbers<[1], [0], [0], [1], [0, 0, 1, 1], [], []>} : vector<128x784xbf16>, vector<784x64xbf16>, vector<128x64xf32> -> vector<128x64xf32>
    %c0_3 = arith.constant 0 : index
    %c0_4 = arith.constant 0 : index
    %4 = vector.load %arg3[%c0_3, %c0_4] : memref<1x64xf32, #tpu.memory_space<vmem>>, vector<1x64xf32>
    %5 = vector.broadcast %4 : vector<1x64xf32> to vector<128x64xf32>
    %6 = arith.addf %3, %5 : vector<128x64xf32>
    %cst_5 = arith.constant 0.000000e+00 : f32
    %7 = vector.broadcast %cst_5 : f32 to vector<128x64xf32>
    %8 = arith.maximumf %6, %7 : vector<128x64xf32>
    %9 = arith.truncf %8 : vector<128x64xf32> to vector<128x64xbf16>
    %c0_6 = arith.constant 0 : index
    %c0_7 = arith.constant 0 : index
    %10 = vector.load %arg4[%c0_6, %c0_7] : memref<64x64xbf16, #tpu.memory_space<vmem>>, vector<64x64xbf16>
    %cst_8 = arith.constant dense<0.000000e+00> : vector<128x64xf32>
    %11 = tpu.matmul %9, %10, %cst_8 {dimension_numbers = #tpu.dot_dimension_numbers<[1], [0], [0], [1], [0, 0, 1, 1], [], []>} : vector<128x64xbf16>, vector<64x64xbf16>, vector<128x64xf32> -> vector<128x64xf32>
    %c0_9 = arith.constant 0 : index
    %c0_10 = arith.constant 0 : index
    %12 = vector.load %arg5[%c0_9, %c0_10] : memref<1x64xf32, #tpu.memory_space<vmem>>, vector<1x64xf32>
    %13 = vector.broadcast %12 : vector<1x64xf32> to vector<128x64xf32>
    %14 = arith.addf %11, %13 : vector<128x64xf32>
    %cst_11 = arith.constant 0.000000e+00 : f32
    %15 = vector.broadcast %cst_11 : f32 to vector<128x64xf32>
    %16 = arith.maximumf %14, %15 : vector<128x64xf32>
    %17 = arith.truncf %16 : vector<128x64xf32> to vector<128x64xbf16>
    %c0_12 = arith.constant 0 : index
    %c0_13 = arith.constant 0 : index
    %18 = vector.load %arg6[%c0_12, %c0_13] : memref<64x64xbf16, #tpu.memory_space<vmem>>, vector<64x64xbf16>
    %cst_14 = arith.constant dense<0.000000e+00> : vector<128x64xf32>
    %19 = tpu.matmul %17, %18, %cst_14 {dimension_numbers = #tpu.dot_dimension_numbers<[1], [0], [0], [1], [0, 0, 1, 1], [], []>} : vector<128x64xbf16>, vector<64x64xbf16>, vector<128x64xf32> -> vector<128x64xf32>
    %c0_15 = arith.constant 0 : index
    %c0_16 = arith.constant 0 : index
    %20 = vector.load %arg7[%c0_15, %c0_16] : memref<1x64xf32, #tpu.memory_space<vmem>>, vector<1x64xf32>
    %21 = vector.broadcast %20 : vector<1x64xf32> to vector<128x64xf32>
    %22 = arith.addf %19, %21 : vector<128x64xf32>
    %cst_17 = arith.constant 0.000000e+00 : f32
    %23 = vector.broadcast %cst_17 : f32 to vector<128x64xf32>
    %24 = arith.maximumf %22, %23 : vector<128x64xf32>
    %25 = arith.truncf %24 : vector<128x64xf32> to vector<128x64xbf16>
    %c0_18 = arith.constant 0 : index
    %c0_19 = arith.constant 0 : index
    %26 = vector.load %arg8[%c0_18, %c0_19] : memref<64x128xbf16, #tpu.memory_space<vmem>>, vector<64x128xbf16>
    %cst_20 = arith.constant dense<0.000000e+00> : vector<128x128xf32>
    %27 = tpu.matmul %25, %26, %cst_20 {dimension_numbers = #tpu.dot_dimension_numbers<[1], [0], [0], [1], [0, 0, 1, 1], [], []>} : vector<128x64xbf16>, vector<64x128xbf16>, vector<128x128xf32> -> vector<128x128xf32>
    %c0_21 = arith.constant 0 : index
    %c0_22 = arith.constant 0 : index
    %28 = vector.load %arg9[%c0_21, %c0_22] : memref<1x128xf32, #tpu.memory_space<vmem>>, vector<1x128xf32>
    %29 = vector.broadcast %28 : vector<1x128xf32> to vector<128x128xf32>
    %30 = arith.addf %27, %29 : vector<128x128xf32>
    %cst_23 = arith.constant dense<0xFF800000> : vector<128xf32>
    %31 = vector.multi_reduction <maximumf>, %30, %cst_23 [1] : vector<128x128xf32> to vector<128xf32>
    %32 = vector.shape_cast %31 : vector<128xf32> to vector<128x1xf32>
    %33 = vector.broadcast %32 : vector<128x1xf32> to vector<128x128xf32>
    %34 = arith.subf %30, %33 : vector<128x128xf32>
    %35 = math.exp %34 : vector<128x128xf32>
    %cst_24 = arith.constant dense<0.000000e+00> : vector<128xf32>
    %36 = vector.multi_reduction <add>, %35, %cst_24 [1] : vector<128x128xf32> to vector<128xf32>
    %37 = vector.shape_cast %36 : vector<128xf32> to vector<128x1xf32>
    %38 = math.log %37 : vector<128x1xf32>
    %39 = vector.broadcast %38 : vector<128x1xf32> to vector<128x128xf32>
    %40 = arith.subf %34, %39 : vector<128x128xf32>
    %41 = tpu.transpose %40, [1, 0] : vector<128x128xf32> -> vector<128x128xf32>
    %42 = vector.extract_strided_slice %41 {offsets = [0, 0], sizes = [16, 128], strides = [1, 1]} : vector<128x128xf32> to vector<16x128xf32>
    %c0_25 = arith.constant 0 : index
    %c0_26 = arith.constant 0 : index
    %43 = vector.load %arg10[%c0_25, %c0_26] : memref<16x128xf32, #tpu.memory_space<vmem>>, vector<16x128xf32>
    tpu.vector_store %arg10[%c0_25, %c0_26], %42 {strides = array<i32>} : memref<16x128xf32, #tpu.memory_space<vmem>>, vector<16x128xf32>,
    return
  }
  func.func @transform_0(%arg0: i32) -> (i32, i32) {
    %c0_i32 = arith.constant 0 : i32
    %c0_i32_0 = arith.constant 0 : i32
    return %arg0, %c0_i32 : i32, i32
  }
  func.func @transform_1(%arg0: i32) -> (i32, i32) {
    %c0_i32 = arith.constant 0 : i32
    %c0_i32_0 = arith.constant 0 : i32
    %c0_i32_1 = arith.constant 0 : i32
    return %c0_i32, %c0_i32_0 : i32, i32
  }
  func.func @transform_2(%arg0: i32) -> (i32, i32) {
    %c0_i32 = arith.constant 0 : i32
    %c0_i32_0 = arith.constant 0 : i32
    %c0_i32_1 = arith.constant 0 : i32
    return %c0_i32, %c0_i32_0 : i32, i32
  }
  func.func @transform_3(%arg0: i32) -> (i32, i32) {
    %c0_i32 = arith.constant 0 : i32
    %c0_i32_0 = arith.constant 0 : i32
    %c0_i32_1 = arith.constant 0 : i32
    return %c0_i32, %c0_i32_0 : i32, i32
  }
  func.func @transform_4(%arg0: i32) -> (i32, i32) {
    %c0_i32 = arith.constant 0 : i32
    %c0_i32_0 = arith.constant 0 : i32
    %c0_i32_1 = arith.constant 0 : i32
    return %c0_i32, %c0_i32_0 : i32, i32
  }
  func.func @transform_5(%arg0: i32) -> (i32, i32) {
    %c0_i32 = arith.constant 0 : i32
    %c0_i32_0 = arith.constant 0 : i32
    %c0_i32_1 = arith.constant 0 : i32
    return %c0_i32, %c0_i32_0 : i32, i32
  }
  func.func @transform_6(%arg0: i32) -> (i32, i32) {
    %c0_i32 = arith.constant 0 : i32
    %c0_i32_0 = arith.constant 0 : i32
    %c0_i32_1 = arith.constant 0 : i32
    return %c0_i32, %c0_i32_0 : i32, i32
  }
  func.func @transform_7(%arg0: i32) -> (i32, i32) {
    %c0_i32 = arith.constant 0 : i32
    %c0_i32_0 = arith.constant 0 : i32
    %c0_i32_1 = arith.constant 0 : i32
    return %c0_i32, %c0_i32_0 : i32, i32
  }
  func.func @transform_8(%arg0: i32) -> (i32, i32) {
    %c0_i32 = arith.constant 0 : i32
    %c0_i32_0 = arith.constant 0 : i32
    %c0_i32_1 = arith.constant 0 : i32
    return %c0_i32, %c0_i32_0 : i32, i32
  }
  func.func @transform_9(%arg0: i32) -> (i32, i32) {
    %c0_i32 = arith.constant 0 : i32
    %c0_i32_0 = arith.constant 0 : i32
    return %c0_i32, %arg0 : i32, i32
  }
}

</mosaic_0001>

<bundles_post_ra>
// kernel: tpu_custom_call.1
= control target key start
LH: loop header
LB: loop body
LE: loop exit
PB: predicated region body
PF: predicated region fallthrough
CT: control target
= control target key end

     0   :  { %vm601_vm0 = vcmask 130048   ;;  %s3146_s0 = inlined_call_operand.vmem [shape: f32[128,784], index: 0, kind: input, shape index: {}]   ;;  %s3147_s1 = inlined_call_operand.vmem [shape: bf16[784,64], index: 1, kind: input, shape index: {}]   ;;  %s3148_s2 = inlined_call_operand.vmem [shape: f32[1,64], index: 2, kind: input, shape index: {}]   ;;  %s3149_s3 = inlined_call_operand.vmem [shape: bf16[64,64], index: 3, kind: input, shape index: {}]   ;;  %s3150_s4 = inlined_call_operand.vmem [shape: f32[1,64], index: 4, kind: input, shape index: {}]   ;;  %s3151_s5 = inlined_call_operand.vmem [shape: bf16[64,64], index: 5, kind: input, shape index: {}]   ;;  %s3152_s6 = inlined_call_operand.vmem [shape: f32[1,64], index: 6, kind: input, shape index: {}]   ;;  %s3153_s7 = inlined_call_operand.vmem [shape: bf16[64,128], index: 7, kind: input, shape index: {}]   ;;  %s3154_s8 = inlined_call_operand.vmem [shape: f32[1,128], index: 8, kind: input, shape index: {}]   ;;  %s3155_s9 = inlined_call_operand.hbm [shape: f32[16,128], index: 9, kind: output, shape index: {}]  }
   0x1   :  { %v2204_v0 = vld [vmem:[%s3147_s1 + $0x40] sm:$0xff]   ;;  %v2208_v4 = vld [vmem:[%s3147_s1 + $0x48] sm:$0xff]   ;;  %v2212_v8 = vld [vmem:[%s3147_s1 + $0x50] sm:$0xff]  }
   0x2   :  { %v2205_v1 = vld [vmem:[%s3147_s1] sm:$0xff]   ;;  %1874 = vmatprep.subr.bf16.mxu0 %v2204_v0  ;;  %v2209_v5 = vld [vmem:[%s3147_s1 + $0x8] sm:$0xff]   ;;  %v2213_v9 = vld [vmem:[%s3147_s1 + $0x10] sm:$0xff]  }
   0x3   :  { %v2206_v2 = vld [vmem:[%s3147_s1 + $0xc0] sm:$0xff]   ;;  %1875 = vmatpush3.bf16.msra.mxu0 %v2205_v1  ;;  %v2210_v6 = vld [vmem:[%s3147_s1 + $0xc8] sm:$0xff]   ;;  %v2214_v10 = vld [vmem:[%s3147_s1 + $0xd0] sm:$0xff]  }
   0x4   :  { %v2207_v3 = vld [vmem:[%s3147_s1 + $0x80] sm:$0xff]   ;;  %1938 = vmatprep.subr.bf16.mxu1 %v2206_v2  ;;  %1876 = vmatprep.subr.bf16.mxu0 %v2208_v4  ;;  %v2211_v7 = vld [vmem:[%s3147_s1 + $0x88] sm:$0xff]   ;;  %v2215_v11 = vld [vmem:[%s3147_s1 + $0x90] sm:$0xff]  }
   0x5   :  { %1939 = vmatpush3.bf16.msra.mxu1 %v2207_v3  ;;  %v2216_v12 = vld [vmem:[%s3147_s1 + $0x58] sm:$0xff]   ;;  %v2220_v16 = vld [vmem:[%s3147_s1 + $0x60] sm:$0xff]   ;;  %v2224_v20 = vld [vmem:[%s3147_s1 + $0x68] sm:$0xff]  }
   0x6   :  { %1940 = vmatprep.subr.bf16.mxu1 %v2210_v6  ;;  %v2217_v13 = vld [vmem:[%s3147_s1 + $0x18] sm:$0xff]   ;;  %v2221_v17 = vld [vmem:[%s3147_s1 + $0x20] sm:$0xff]   ;;  %v2225_v21 = vld [vmem:[%s3147_s1 + $0x28] sm:$0xff]  }
   0x7   :  { %1877 = vmatpush3.bf16.msra.mxu0 %v2209_v5  ;;  %v2218_v14 = vld [vmem:[%s3147_s1 + $0xd8] sm:$0xff]   ;;  %v2222_v18 = vld [vmem:[%s3147_s1 + $0xe0] sm:$0xff]   ;;  %v2226_v22 = vld [vmem:[%s3147_s1 + $0xe8] sm:$0xff]  }
   0x8   :  { %1878 = vmatprep.subr.bf16.mxu0 %v2212_v8  ;;  %v2219_v15 = vld [vmem:[%s3147_s1 + $0x98] sm:$0xff]   ;;  %v2223_v19 = vld [vmem:[%s3147_s1 + $0xa0] sm:$0xff]   ;;  %v2227_v23 = vld [vmem:[%s3147_s1 + $0xa8] sm:$0xff]  }
   0x9   :  { %1941 = vmatpush3.bf16.msra.mxu1 %v2211_v7  ;;  %v2228_v24 = vld [vmem:[%s3147_s1 + $0x70] sm:$0xff]   ;;  %v2232_v28 = vld [vmem:[%s3147_s1 + $0x78] sm:$0xff]   ;;  %v35_v31 = vld [vmem:[%s3146_s0 + $0x8] sm:$0xff] }
   0xa   :  { %1942 = vmatprep.subr.bf16.mxu1 %v2214_v10  ;;  %v2229_v25 = vld [vmem:[%s3147_s1 + $0x30] sm:$0xff]   ;;  %v2233_v29 = vld [vmem:[%s3147_s1 + $0x38] sm:$0xff]   ;;  %v42_v32 = vld [vmem:[%s3146_s0 + $0x40] sm:$0xff] }
   0xb   :  { %1879 = vmatpush3.bf16.msra.mxu0 %v2213_v9  ;;  %v2230_v26 = vld [vmem:[%s3147_s1 + $0xf0] sm:$0xff]   ;;  %v2234_v30 = vld [vmem:[%s3147_s1 + $0xf8] sm:$0xff]   ;;  %v147_v33 = vpack.c.bf16 %v42_v32, %v35_v31  ;;  %v34_v35 = vld [vmem:[%s3146_s0] sm:$0xff] }
   0xc   :  { %1880 = vmatprep.subr.bf16.mxu0 %v2216_v12  ;;  %v2231_v27 = vld [vmem:[%s3147_s1 + $0xb0] sm:$0xff]   ;;  %v2235_v34 = vld [vmem:[%s3147_s1 + $0xb8] sm:$0xff]   ;;  %v2236_v38 = vld [vmem:[%s3147_s1 + $0x140] sm:$0xff]  }
   0xd   :  { %1943 = vmatpush3.bf16.msra.mxu1 %v2215_v11  ;;  %v41_v36 = vld [vmem:[%s3146_s0 + $0x38] sm:$0xff]  ;;  %658 = vmatprep.mubr.bf16.mxu0 %v147_v33  ;;  %v44_v40 = vld [vmem:[%s3146_s0 + $0x50] sm:$0xff]  ;;  %v2237_v42 = vld [vmem:[%s3147_s1 + $0x100] sm:$0xff]  }
   0xe   :  { %1944 = vmatprep.subr.bf16.mxu1 %v2218_v14  ;;  %v146_v37 = vpack.c.bf16 %v41_v36, %v34_v35  ;;  %v37_v39 = vld [vmem:[%s3146_s0 + $0x18] sm:$0xff]  ;;  %v36_v43 = vld [vmem:[%s3146_s0 + $0x10] sm:$0xff]  ;;  %v43_v44 = vld [vmem:[%s3146_s0 + $0x48] sm:$0xff] }
   0xf   :  { %1881 = vmatpush3.bf16.msra.mxu0 %v2217_v13  ;;  %v149_v41 = vpack.c.bf16 %v44_v40, %v37_v39  ;;  %v49_v45 = vld [vmem:[%s3146_s0 + $0x78] sm:$0xff]  ;;  %v148_v46 = vpack.c.bf16 %v43_v44, %v36_v43  ;;  %v56_v47 = vld [vmem:[%s3146_s0 + $0xb0] sm:$0xff]  ;;  %v55_v49 = vld [vmem:[%s3146_s0 + $0xa8] sm:$0xff] }
  0x10   :  { %1882 = vmatprep.subr.bf16.mxu0 %v2220_v16  ;;  %v48_v48 = vld [vmem:[%s3146_s0 + $0x70] sm:$0xff]  ;;  %v154_v50 = vpack.c.bf16 %v56_v47, %v49_v45  ;;  %v2238_v51 = vld [vmem:[%s3147_s1 + $0x148] sm:$0xff]   ;;  %v58_v53 = vld [vmem:[%s3146_s0 + $0xc0] sm:$0xff] }
  0x11   :  { %1945 = vmatpush3.bf16.msra.mxu1 %v2219_v15  ;;  %755 = vmatprep.mubr.bf16.mxu1 %v149_v41  ;;  %v51_v52 = vld [vmem:[%s3146_s0 + $0x88] sm:$0xff]  ;;  %v153_v54 = vpack.c.bf16 %v55_v49, %v48_v48  ;;  %v50_v57 = vld [vmem:[%s3146_s0 + $0x80] sm:$0xff]  ;;  %v57_v58 = vld [vmem:[%s3146_s0 + $0xb8] sm:$0xff] }
  0x12   :  { %1946 = vmatprep.subr.bf16.mxu1 %v2222_v18  ;;  %v156_v55 = vpack.c.bf16 %v58_v53, %v51_v52  ;;  %v2239_v56 = vld [vmem:[%s3147_s1 + $0x108] sm:$0xff]   ;;  %v70_v60 = vld [vmem:[%s3146_s0 + $0x120] sm:$0xff]  ;;  %v155_v62 = vpack.c.bf16 %v57_v58, %v50_v57  ;;  %v69_v0 = vld [vmem:[%s3146_s0 + $0x118] sm:$0xff] }
  0x13   :  { %1883 = vmatpush3.bf16.msra.mxu0 %v2221_v17  ;;  %v63_v59 = vld [vmem:[%s3146_s0 + $0xe8] sm:$0xff]  ;;  %v62_v63 = vld [vmem:[%s3146_s0 + $0xe0] sm:$0xff]  ;;  %v2240_v1 = vld [vmem:[%s3147_s1 + $0x150] sm:$0xff]  }
  0x14   :  { %1884 = vmatprep.subr.bf16.mxu0 %v2224_v20  ;;  %v161_v61 = vpack.c.bf16 %v70_v60, %v63_v59  ;;  %v2241_v2 = vld [vmem:[%s3147_s1 + $0x180] sm:$0xff]   ;;  %v65_v3 = vld [vmem:[%s3146_s0 + $0xf8] sm:$0xff]  ;;  %v72_v4 = vld [vmem:[%s3146_s0 + $0x130] sm:$0xff]  ;;  %v160_v10 = vpack.c.bf16 %v69_v0, %v62_v63 }
  0x15   :  { %1947 = vmatpush3.bf16.msra.mxu1 %v2223_v19  ;;  %v163_v5 = vpack.c.bf16 %v72_v4, %v65_v3  ;;  %v2242_v6 = vld [vmem:[%s3147_s1 + $0x110] sm:$0xff]   ;;  %v77_v8 = vld [vmem:[%s3146_s0 + $0x158] sm:$0xff]  ;;  %v71_v11 = vld [vmem:[%s3146_s0 + $0x128] sm:$0xff] }
  0x16   :  { %1948 = vmatprep.subr.bf16.mxu1 %v2226_v22  ;;  %v64_v7 = vld [vmem:[%s3146_s0 + $0xf0] sm:$0xff]  ;;  %v2243_v13 = vld [vmem:[%s3147_s1 + $0x158] sm:$0xff]   ;;  %v79_v14 = vld [vmem:[%s3146_s0 + $0x168] sm:$0xff] }
  0x17   :  { %1885 = vmatpush3.bf16.msra.mxu0 %v2225_v21  ;;  %v84_v9 = vld [vmem:[%s3146_s0 + $0x190] sm:$0xff]  ;;  %v86_v15 = vld [vmem:[%s3146_s0 + $0x1a0] sm:$0xff]  ;;  %v2244_v16 = vld [vmem:[%s3147_s1 + $0x118] sm:$0xff]   ;;  %v162_v17 = vpack.c.bf16 %v71_v11, %v64_v7 }
  0x18   :  { %1886 = vmatprep.subr.bf16.mxu0 %v2228_v24  ;;  %v168_v12 = vpack.c.bf16 %v84_v9, %v77_v8  ;;  %v76_v18 = vld [vmem:[%s3146_s0 + $0x150] sm:$0xff]  ;;  %v83_v19 = vld [vmem:[%s3146_s0 + $0x188] sm:$0xff]  ;;  %v170_v20 = vpack.c.bf16 %v86_v15, %v79_v14  ;;  %v2245_v21 = vld [vmem:[%s3147_s1 + $0x160] sm:$0xff]  }
  0x19   :  { %1949 = vmatpush3.bf16.msra.mxu1 %v2227_v23  ;;  %v91_v22 = vld [vmem:[%s3146_s0 + $0x1c8] sm:$0xff]  ;;  %v98_v23 = vld [vmem:[%s3146_s0 + $0x200] sm:$0xff]  ;;  %v97_v36 = vld [vmem:[%s3146_s0 + $0x1f8] sm:$0xff] }
  0x1a   :  { %1950 = vmatprep.subr.bf16.mxu1 %v2230_v26  ;;  %v2246_v24 = vld [vmem:[%s3147_s1 + $0x120] sm:$0xff]   ;;  %v2247_v31 = vld [vmem:[%s3147_s1 + $0x168] sm:$0xff]   ;;  %v92_v39 = vld [vmem:[%s3146_s0 + $0x1d0] sm:$0xff] }
  0x1b   :  { %1887 = vmatpush3.bf16.msra.mxu0 %v2229_v25  ;;  %v167_v25 = vpack.c.bf16 %v83_v19, %v76_v18  ;;  %v78_v26 = vld [vmem:[%s3146_s0 + $0x160] sm:$0xff]  ;;  %v99_v40 = vld [vmem:[%s3146_s0 + $0x208] sm:$0xff]  ;;  %v2249_v41 = vld [vmem:[%s3147_s1 + $0x170] sm:$0xff]  }
  0x1c   :  { %1888 = vmatprep.subr.bf16.mxu0 %v2232_v28  ;;  %v175_v28 = vpack.c.bf16 %v98_v23, %v91_v22  ;;  %v90_v35 = vld [vmem:[%s3146_s0 + $0x1c0] sm:$0xff]  ;;  %v2250_v43 = vld [vmem:[%s3147_s1 + $0x130] sm:$0xff]   ;;  %v107_v45 = vld [vmem:[%s3146_s0 + $0x248] sm:$0xff]  ;;  %v176_v47 = vpack.c.bf16 %v99_v40, %v92_v39 }
  0x1d   :  { %1951 = vmatpush3.bf16.msra.mxu1 %v2231_v27  ;;  %v85_v27 = vld [vmem:[%s3146_s0 + $0x198] sm:$0xff]  ;;  %v104_v49 = vld [vmem:[%s3146_s0 + $0x230] sm:$0xff]  ;;  %v119_v53 = vld [vmem:[%s3146_s0 + $0x2a8] sm:$0xff] }
  0x1e   :  { %1952 = vmatprep.subr.bf16.mxu1 %v2234_v30  ;;  %v100_v30 = vld [vmem:[%s3146_s0 + $0x210] sm:$0xff]  ;;  %v169_v32 = vpack.c.bf16 %v85_v27, %v78_v26  ;;  %v2251_v48 = vld [vmem:[%s3147_s1 + $0x178] sm:$0xff]   ;;  %v118_v63 = vld [vmem:[%s3146_s0 + $0x2a0] sm:$0xff] }
  0x1f   :  { %1889 = vmatpush3.bf16.msra.mxu0 %v2233_v29  ;;  %v93_v29 = vld [vmem:[%s3146_s0 + $0x1d8] sm:$0xff]  ;;  %v128_v60 = vld [vmem:[%s3146_s0 + $0x2f0] sm:$0xff]  ;;  %v135_v7 = vld [vmem:[%s3146_s0 + $0x328] sm:$0xff] }
  0x20   :  { %2002 = vmatprep.subr.bf16.mxu0 %v2236_v38  ;;  %v177_v33 = vpack.c.bf16 %v100_v30, %v93_v29  ;;  %v112_v38 = vld [vmem:[%s3146_s0 + $0x270] sm:$0xff]  ;;  %v2252_v52 = vld [vmem:[%s3147_s1 + $0x138] sm:$0xff]   ;;  %v142_v8 = vld [vmem:[%s3146_s0 + $0x360] sm:$0xff] }
  0x21   :  { %1953 = vmatpush3.bf16.msra.mxu1 %v2235_v34  ;;  %v2248_v34 = vld [vmem:[%s3147_s1 + $0x128] sm:$0xff]   ;;  %v113_v57 = vld [vmem:[%s3146_s0 + $0x278] sm:$0xff]  ;;  %v120_v4 = vld [vmem:[%s3146_s0 + $0x2b0] sm:$0xff] }
  0x22   :  { %659 = vmatmul.mubr.bf16.vlgmr.msra.gmra.mrb[0].mxu0 %v146_v37  ;;  %2111 = vmatprep.subr.bf16.mxu1 %v2241_v2  ;;  %v105_v37 = vld [vmem:[%s3146_s0 + $0x238] sm:$0xff]  ;;  %v132_v11 = vld [vmem:[%s3146_s0 + $0x310] sm:$0xff]  ;;  %v134_v14 = vld [vmem:[%s3146_s0 + $0x320] sm:$0xff] }
  0x23   :  { %2003 = vmatpush3.bf16.msra.mxu0 %v2237_v42  ;;  %666 = vmatprep.mubr.bf16.mxu0 %v154_v50  ;;  %v174_v42 = vpack.c.bf16 %v97_v36, %v90_v35  ;;  %v182_v44 = vpack.c.bf16 %v112_v38, %v105_v37  ;;  %v121_v59 = vld [vmem:[%s3146_s0 + $0x2b8] sm:$0xff]  ;;  %v47_v18 = vld [vmem:[%s3146_s0 + $0x68] sm:$0xff]  ;;  %v38_v22 = vld [vmem:[%s3146_s0 + $0x20] sm:$0xff] }
  0x24   :  { %756 = vmatmul.mubr.bf16.vlgmr.msra.gmra.mrb[0].mxu1 %v148_v46  ;;  %2004 = vmatprep.subr.bf16.mxu0 %v2238_v51  ;;  %v114_v46 = vld [vmem:[%s3146_s0 + $0x280] sm:$0xff]  ;;  %v111_v51 = vld [vmem:[%s3146_s0 + $0x268] sm:$0xff]  ;;  %v125_v0 = vld [vmem:[%s3146_s0 + $0x2d8] sm:$0xff] }
  0x25   :  { %763 = vmatprep.mubr.bf16.mxu1 %v156_v55  ;;  %2112 = vmatpush3.bf16.msra.mxu1 %v2241_v2  ;;  %v184_v50 = vpack.c.bf16 %v114_v46, %v107_v45  ;;  %v181_v55 = vpack.c.bf16 %v111_v51, %v104_v49  ;;  %v140_v2 = vld [vmem:[%s3146_s0 + $0x350] sm:$0xff]  ;;  %v188_v3 = vpack.c.bf16 %v125_v0, %v118_v63  ;;  %v141_v15 = vld [vmem:[%s3146_s0 + $0x358] sm:$0xff] }
  0x26   :  { %v45_v23 = vld [vmem:[%s3146_s0 + $0x58] sm:$0xff]  ;;  %v60_v26 = vld [vmem:[%s3146_s0 + $0xd0] sm:$0xff] }
  0x27   :  { %2005 = vmatpush3.bf16.msra.mxu0 %v2239_v56  ;;  %v106_v56 = vld [vmem:[%s3146_s0 + $0x240] sm:$0xff] }
  0x28   :  { %2006 = vmatprep.subr.bf16.mxu0 %v2240_v1  ;;  %v133_v1 = vld [vmem:[%s3146_s0 + $0x318] sm:$0xff] }
  0x2a   :  { %667 = vmatmul.mubr.bf16.gmra.mrb[4].mxu0 %v153_v54  ;;  %v126_v54 = vld [vmem:[%s3146_s0 + $0x2e0] sm:$0xff] }
  0x2b   :  { %674 = vmatprep.mubr.bf16.mxu0 %v161_v61  ;;  %2007 = vmatpush3.bf16.msra.mxu0 %v2242_v6  ;;  %v189_v58 = vpack.c.bf16 %v126_v54, %v119_v53  ;;  %v183_v61 = vpack.c.bf16 %v113_v57, %v106_v56  ;;  %v196_v6 = vpack.c.bf16 %v140_v2, %v133_v1 }
  0x2c   :  { %764 = vmatmul.mubr.bf16.gmra.mrb[4].mxu1 %v155_v62  ;;  %2008 = vmatprep.subr.bf16.mxu0 %v2243_v13  ;;  %v191_v62 = vpack.c.bf16 %v128_v60, %v121_v59  ;;  %v39_v13 = vld [vmem:[%s3146_s0 + $0x28] sm:$0xff] }
  0x2d   :  { %771 = vmatprep.mubr.bf16.mxu1 %v163_v5  ;;  %v127_v5 = vld [vmem:[%s3146_s0 + $0x2e8] sm:$0xff] }
  0x2e   :  { %v190_v9 = vpack.c.bf16 %v127_v5, %v120_v4 }
  0x2f   :  { %2009 = vmatpush3.bf16.msra.mxu0 %v2244_v16  ;;  %v46_v16 = vld [vmem:[%s3146_s0 + $0x60] sm:$0xff] }
  0x30   :  { %2010 = vmatprep.subr.bf16.mxu0 %v2245_v21  ;;  %v197_v21 = vpack.c.bf16 %v141_v15, %v134_v14 }
  0x32   :  { %675 = vmatmul.mubr.bf16.gmra.mrb[8].mxu0 %v160_v10  ;;  %v198_v10 = vpack.c.bf16 %v142_v8, %v135_v7 }
  0x33   :  { %682 = vmatprep.mubr.bf16.mxu0 %v168_v12  ;;  %2011 = vmatpush3.bf16.msra.mxu0 %v2246_v24  ;;  %v139_v12 = vld [vmem:[%s3146_s0 + $0x348] sm:$0xff] }
  0x34   :  { %772 = vmatmul.mubr.bf16.gmra.mrb[8].mxu1 %v162_v17  ;;  %2012 = vmatprep.subr.bf16.mxu0 %v2247_v31  ;;  %v40_v17 = vld [vmem:[%s3146_s0 + $0x30] sm:$0xff]  ;;  %v195_v19 = vpack.c.bf16 %v139_v12, %v132_v11 }
  0x35   :  { %779 = vmatprep.mubr.bf16.mxu1 %v170_v20  ;;  %v151_v20 = vpack.c.bf16 %v46_v16, %v39_v13  ;;  %v152_v24 = vpack.c.bf16 %v47_v18, %v40_v17 }
  0x37   :  { %2013 = vmatpush3.bf16.msra.mxu0 %v2248_v34 }
  0x38   :  { %2014 = vmatprep.subr.bf16.mxu0 %v2249_v41 }
  0x3a   :  { %683 = vmatmul.mubr.bf16.gmra.mrb[12].mxu0 %v167_v25  ;;  %v53_v25 = vld [vmem:[%s3146_s0 + $0x98] sm:$0xff] }
  0x3b   :  { %690 = vmatprep.mubr.bf16.mxu0 %v175_v28  ;;  %2015 = vmatpush3.bf16.msra.mxu0 %v2250_v43 }
  0x3c   :  { %780 = vmatmul.mubr.bf16.gmra.mrb[12].mxu1 %v169_v32  ;;  %2016 = vmatprep.subr.bf16.mxu0 %v2251_v48 }
  0x3d   :  { %787 = vmatprep.mubr.bf16.mxu1 %v177_v33 }
  0x3f   :  { %2017 = vmatpush3.bf16.msra.mxu0 %v2252_v52 }
  0x42   :  { %691 = vmatmul.mubr.bf16.gmra.mrb[16].mxu0 %v174_v42 }
  0x43   :  { %698 = vmatprep.mubr.bf16.mxu0 %v182_v44 }
  0x44   :  { %788 = vmatmul.mubr.bf16.gmra.mrb[16].mxu1 %v176_v47 }
  0x45   :  { %795 = vmatprep.mubr.bf16.mxu1 %v184_v50 }
  0x4a   :  { %699 = vmatmul.mubr.bf16.gmra.mrb[20].mxu0 %v181_v55 }
  0x4b   :  { %706 = vmatprep.mubr.bf16.mxu0 %v189_v58 }
  0x4c   :  { %796 = vmatmul.mubr.bf16.gmra.mrb[20].mxu1 %v183_v61 }
  0x4d   :  { %803 = vmatprep.mubr.bf16.mxu1 %v191_v62 }
  0x52   :  { %707 = vmatmul.mubr.bf16.gmra.mrb[24].mxu0 %v188_v3 }
  0x53   :  { %714 = vmatprep.mubr.bf16.mxu0 %v196_v6 }
  0x54   :  { %804 = vmatmul.mubr.bf16.gmra.mrb[24].mxu1 %v190_v9 }
  0x55   :  { %811 = vmatprep.mubr.bf16.mxu1 %v198_v10 }
  0x5a   :  { %715 = vmatmul.mubr.bf16.gmra.mrb[28].mxu0 %v195_v19 }
  0x5b   :  { %852 = vmatprep.mubr.bf16.mxu0 %v151_v20 }
  0x5c   :  { %14 = vsyncpa [#allocation3], 0  ;;  %812 = vmatmul.mubr.bf16.gmra.mrb[28].mxu1 %v197_v21  ;;  %v150_v27 = vpack.c.bf16 %v45_v23, %v38_v22  ;;  %v54_v28 = vld [vmem:[%s3146_s0 + $0xa0] sm:$0xff]  ;;  %v61_v29 = vld [vmem:[%s3146_s0 + $0xd8] sm:$0xff]  ;;  %v158_v30 = vpack.c.bf16 %v60_v26, %v53_v25  ;;  %vm1077_vm1 = vcmask 523264  }
  0x5d   :  { %2113 = vmatprep.mubr.msk.bf16.mxu1 %vm601_vm0, %v152_v24  ;;  %v68_v31 = vld [vmem:[%s3146_s0 + $0x110] sm:$0xff]  ;;  %v75_v32 = vld [vmem:[%s3146_s0 + $0x148] sm:$0xff]  ;;  %v159_v33 = vpack.c.bf16 %v61_v29, %v54_v28  ;;  %v74_v38 = vld [vmem:[%s3146_s0 + $0x140] sm:$0xff] }
  0x5e   :  { %v166_v34 = vpack.c.bf16 %v75_v32, %v68_v31  ;;  %v52_v35 = vld [vmem:[%s3146_s0 + $0x90] sm:$0xff]  ;;  %v59_v36 = vld [vmem:[%s3146_s0 + $0xc8] sm:$0xff]  ;;  %v82_v40 = vld [vmem:[%s3146_s0 + $0x180] sm:$0xff] }
  0x5f   :  { %v67_v37 = vld [vmem:[%s3146_s0 + $0x108] sm:$0xff]  ;;  %v157_v39 = vpack.c.bf16 %v59_v36, %v52_v35  ;;  %v89_v41 = vld [vmem:[%s3146_s0 + $0x1b8] sm:$0xff]  ;;  %v96_v43 = vld [vmem:[%s3146_s0 + $0x1f0] sm:$0xff] }
  0x60   :  { %v165_v42 = vpack.c.bf16 %v74_v38, %v67_v37  ;;  %v103_v44 = vld [vmem:[%s3146_s0 + $0x228] sm:$0xff]  ;;  %v173_v45 = vpack.c.bf16 %v89_v41, %v82_v40  ;;  %v66_v47 = vld [vmem:[%s3146_s0 + $0x100] sm:$0xff]  ;;  %v73_v48 = vld [vmem:[%s3146_s0 + $0x138] sm:$0xff] }
  0x61   :  { %v180_v46 = vpack.c.bf16 %v103_v44, %v96_v43  ;;  %v81_v49 = vld [vmem:[%s3146_s0 + $0x178] sm:$0xff]  ;;  %v88_v50 = vld [vmem:[%s3146_s0 + $0x1b0] sm:$0xff]  ;;  %v164_v51 = vpack.c.bf16 %v73_v48, %v66_v47  ;;  %v110_v52 = vld [vmem:[%s3146_s0 + $0x260] sm:$0xff] }
  0x62   :  { %853 = vmatmul.mubr.bf16.vlgmr.msra.gmra.mrb[32].mxu0 %v150_v27  ;;  %v117_v53 = vld [vmem:[%s3146_s0 + $0x298] sm:$0xff]  ;;  %v172_v54 = vpack.c.bf16 %v88_v50, %v81_v49  ;;  %v124_v55 = vld [vmem:[%s3146_s0 + $0x2d0] sm:$0xff]  ;;  %v131_v56 = vld [vmem:[%s3146_s0 + $0x308] sm:$0xff] }
  0x63   :  { %860 = vmatprep.mubr.bf16.mxu0 %v158_v30  ;;  %v187_v57 = vpack.c.bf16 %v117_v53, %v110_v52  ;;  %v194_v58 = vpack.c.bf16 %v131_v56, %v124_v55  ;;  %v80_v59 = vld [vmem:[%s3146_s0 + $0x170] sm:$0xff]  ;;  %v87_v60 = vld [vmem:[%s3146_s0 + $0x1a8] sm:$0xff]  ;;  %v102_v62 = vld [vmem:[%s3146_s0 + $0x220] sm:$0xff] }
  0x64   :  { %2114 = vmatmul.mubr.msk.bf16.vlgmr.msra.gmra.mrb[32].mxu1 %vm601_vm0, %v159_v33  ;;  %v95_v61 = vld [vmem:[%s3146_s0 + $0x1e8] sm:$0xff]  ;;  %v171_v63 = vpack.c.bf16 %v87_v60, %v80_v59  ;;  %v138_v0 = vld [vmem:[%s3146_s0 + $0x340] sm:$0xff]  ;;  %v145_v1 = vld [vmem:[%s3146_s0 + $0x378] sm:$0xff] }
  0x65   :  { %2117 = vmatprep.mubr.msk.bf16.mxu1 %vm601_vm0, %v166_v34  ;;  %v179_v2 = vpack.c.bf16 %v102_v62, %v95_v61  ;;  %v201_v3 = vpack.c.bf16 %v145_v1, %v138_v0  ;;  %v94_v4 = vld [vmem:[%s3146_s0 + $0x1e0] sm:$0xff]  ;;  %v101_v5 = vld [vmem:[%s3146_s0 + $0x218] sm:$0xff]  ;;  %v116_v7 = vld [vmem:[%s3146_s0 + $0x290] sm:$0xff] }
  0x66   :  { %v109_v6 = vld [vmem:[%s3146_s0 + $0x258] sm:$0xff]  ;;  %v178_v8 = vpack.c.bf16 %v101_v5, %v94_v4  ;;  %v108_v10 = vld [vmem:[%s3146_s0 + $0x250] sm:$0xff]  ;;  %v115_v11 = vld [vmem:[%s3146_s0 + $0x288] sm:$0xff] }
  0x67   :  { %v186_v9 = vpack.c.bf16 %v116_v7, %v109_v6  ;;  %v123_v12 = vld [vmem:[%s3146_s0 + $0x2c8] sm:$0xff]  ;;  %v130_v13 = vld [vmem:[%s3146_s0 + $0x300] sm:$0xff]  ;;  %v185_v14 = vpack.c.bf16 %v115_v11, %v108_v10  ;;  %v129_v17 = vld [vmem:[%s3146_s0 + $0x2f8] sm:$0xff] }
  0x68   :  { %v193_v15 = vpack.c.bf16 %v130_v13, %v123_v12  ;;  %v122_v16 = vld [vmem:[%s3146_s0 + $0x2c0] sm:$0xff]  ;;  %v137_v18 = vld [vmem:[%s3146_s0 + $0x338] sm:$0xff]  ;;  %v144_v19 = vld [vmem:[%s3146_s0 + $0x370] sm:$0xff] }
  0x69   :  { %v192_v20 = vpack.c.bf16 %v129_v17, %v122_v16  ;;  %v200_v21 = vpack.c.bf16 %v144_v19, %v137_v18  ;;  %v136_v22 = vld [vmem:[%s3146_s0 + $0x330] sm:$0xff]  ;;  %v143_v23 = vld [vmem:[%s3146_s0 + $0x368] sm:$0xff]  ;;  %v2253_v25 = vld [vmem:[%s3149_s3] sm:$0xff]  }
  0x6a   :  { %861 = vmatmul.mubr.bf16.gmra.mrb[36].mxu0 %v157_v39  ;;  %v199_v24 = vpack.c.bf16 %v143_v23, %v136_v22  ;;  %2129 = vmatprep.subr.bf16.mxu1 %v2253_v25  ;;  %v2254_v26 = vld [vmem:[%s3149_s3 + $0x8] sm:$0xff]   ;;  %v2255_v27 = vld [vmem:[%s3149_s3 + $0x10] sm:$0xff]   ;;  %v2256_v28 = vld [vmem:[%s3149_s3 + $0x18] sm:$0xff]  }
  0x6b   :  { %868 = vmatprep.mubr.bf16.mxu0 %v165_v42  ;;  %2130 = vmatpush3.bf16.msra.mxu1 %v2253_v25  ;;  %v2912_v30 = vld [vmem:[%s3148_s2] ss:$0 sm:$0xff]  ;;  %v2258_v44 = vld [vmem:[%s3151_s5 + $0x8] sm:$0xff]   ;;  %v2259_v52 = vld [vmem:[%s3151_s5 + $0x10] sm:$0xff]  }
  0x6c   :  { %2118 = vmatmul.mubr.msk.bf16.gmra.mrb[36].mxu1 %vm601_vm0, %v173_v45  ;;  %2131 = vmatprep.subr.bf16.mxu1 %v2254_v26  ;;  %v2257_v43 = vld [vmem:[%s3151_s5] sm:$0xff]  }
  0x6d   :  { %2121 = vmatprep.mubr.msk.bf16.mxu1 %vm601_vm0, %v180_v46  ;;  %2153 = vmatprep.subr.bf16.mxu0 %v2257_v43 }
  0x6e   :  { %2154 = vmatpush3.bf16.msra.mxu0 %v2257_v43 }
  0x6f   :  { %2132 = vmatpush3.bf16.msra.mxu1 %v2254_v26  ;;  %2155 = vmatprep.subr.bf16.mxu0 %v2258_v44 }
  0x70   :  { %2133 = vmatprep.subr.bf16.mxu1 %v2255_v27 }
  0x72   :  { %869 = vmatmul.mubr.bf16.gmra.mrb[40].mxu0 %v164_v51 }
  0x73   :  { %876 = vmatprep.mubr.bf16.mxu0 %v172_v54  ;;  %2134 = vmatpush3.bf16.msra.mxu1 %v2255_v27 }
  0x74   :  { %2122 = vmatmul.mubr.msk.bf16.gmra.mrb[40].mxu1 %vm601_vm0, %v187_v57  ;;  %2135 = vmatprep.subr.bf16.mxu1 %v2256_v28 }
  0x75   :  { %2125 = vmatprep.mubr.msk.bf16.mxu1 %vm601_vm0, %v194_v58  ;;  %2156 = vmatpush3.bf16.msra.mxu0 %v2258_v44 }
  0x76   :  { %2157 = vmatprep.subr.bf16.mxu0 %v2259_v52 }
  0x77   :  { %2136 = vmatpush3.bf16.msra.mxu1 %v2256_v28 }
  0x79   :  { %2158 = vmatpush3.bf16.msra.mxu0 %v2259_v52 }
  0x7a   :  { %877 = vmatmul.mubr.bf16.gmra.mrb[44].mxu0 %v171_v63 }
  0x7b   :  { %884 = vmatprep.mubr.bf16.mxu0 %v179_v2 }
  0x7c   :  { %2126 = vmatmul.mubr.msk.bf16.gmra.mrb[44].mxu1 %vm601_vm0, %v201_v3 }
  0x82   :  { %885 = vmatmul.mubr.bf16.gmra.mrb[48].mxu0 %v178_v8 }
  0x83   :  { %892 = vmatprep.mubr.bf16.mxu0 %v186_v9 }
  0x8a   :  { %893 = vmatmul.mubr.bf16.gmra.mrb[52].mxu0 %v185_v14 }
  0x8b   :  { %900 = vmatprep.mubr.bf16.mxu0 %v193_v15 }
  0x92   :  { %901 = vmatmul.mubr.bf16.gmra.mrb[56].mxu0 %v192_v20 }
  0x93   :  { %908 = vmatprep.mubr.bf16.mxu0 %v200_v21 }
  0x9a   :  { %909 = vmatmul.mubr.bf16.gmra.mrb[60].mxu0 %v199_v24 }
  0xf5   :  { %v1890_v29 = vpop.f32.mrb[0].mxu0 }
  0xf6   :  { %v1891_v31 = vpop.f32.mrb[1].mxu0 }
  0xf7   :  { %v1892_v32 = vadd.f32 %v1891_v31, %v1890_v29  ;;  %v1893_v33 = vpop.f32.mrb[2].mxu0  ;;  %v1954_v34 = vpop.f32.mrb[0].mxu1 }
  0xf8   :  { %v1894_v35 = vpop.f32.mrb[3].mxu0  ;;  %v1955_v38 = vpop.f32.mrb[1].mxu1 }
  0xf9   :  { %v661_v36 = vadd.f32 %v1892_v32, %v2912_v30  ;;  %v1895_v37 = vadd.f32 %v1894_v35, %v1893_v33  ;;  %v1956_v39 = vadd.f32 %v1955_v38, %v1954_v34  ;;  %v1957_v40 = vpop.f32.mrb[2].mxu1 }
  0xfa   :  { %v1958_v42 = vpop.f32.mrb[3].mxu1 }
  0xfb   :  { %v664_v41 = vadd.f32 %v1895_v37, %v2912_v30  ;;  %v2922_v45 = vadd.f32 %v1956_v39, %v661_v36  ;;  %v1959_v46 = vadd.f32 %v1958_v42, %v1957_v40 }
  0xfd   :  { %v1896_v47 = vpop.f32.mrb[4].mxu0  ;;  %v2924_v48 = vadd.f32 %v1959_v46, %v664_v41 }
  0xfe   :  { %v1897_v49 = vpop.f32.mrb[5].mxu0 }
  0xff   :  { %v1898_v50 = vadd.f32 %v1897_v49, %v1896_v47  ;;  %v1899_v51 = vpop.f32.mrb[6].mxu0  ;;  %v1960_v53 = vpop.f32.mrb[4].mxu1 }
 0x100   :  { %v1900_v54 = vpop.f32.mrb[7].mxu0  ;;  %v1961_v57 = vpop.f32.mrb[5].mxu1 }
 0x101   :  { %v669_v55 = vadd.f32 %v1898_v50, %v2912_v30  ;;  %v1901_v56 = vadd.f32 %v1900_v54, %v1899_v51  ;;  %v1962_v58 = vadd.f32 %v1961_v57, %v1960_v53  ;;  %v1963_v59 = vpop.f32.mrb[6].mxu1 }
 0x102   :  { %v1964_v61 = vpop.f32.mrb[7].mxu1 }
 0x103   :  { %v672_v60 = vadd.f32 %v1901_v56, %v2912_v30  ;;  %v2931_v62 = vadd.f32 %v1962_v58, %v669_v55  ;;  %v1965_v63 = vadd.f32 %v1964_v61, %v1963_v59 }
 0x105   :  { %v1902_v0 = vpop.f32.mrb[8].mxu0  ;;  %v2933_v1 = vadd.f32 %v1965_v63, %v672_v60 }
 0x106   :  { %v1903_v2 = vpop.f32.mrb[9].mxu0 }
 0x107   :  { %v1904_v3 = vadd.f32 %v1903_v2, %v1902_v0  ;;  %v1905_v4 = vpop.f32.mrb[10].mxu0  ;;  %v1966_v5 = vpop.f32.mrb[8].mxu1 }
 0x108   :  { %v1906_v6 = vpop.f32.mrb[11].mxu0  ;;  %v1967_v9 = vpop.f32.mrb[9].mxu1 }
 0x109   :  { %v677_v7 = vadd.f32 %v1904_v3, %v2912_v30  ;;  %v1907_v8 = vadd.f32 %v1906_v6, %v1905_v4  ;;  %v1968_v10 = vadd.f32 %v1967_v9, %v1966_v5  ;;  %v1969_v11 = vpop.f32.mrb[10].mxu1 }
 0x10a   :  { %v1970_v13 = vpop.f32.mrb[11].mxu1 }
 0x10b   :  { %v680_v12 = vadd.f32 %v1907_v8, %v2912_v30  ;;  %v2937_v14 = vadd.f32 %v1968_v10, %v677_v7  ;;  %v1971_v15 = vadd.f32 %v1970_v13, %v1969_v11 }
 0x10d   :  { %v1908_v16 = vpop.f32.mrb[12].mxu0  ;;  %v2939_v17 = vadd.f32 %v1971_v15, %v680_v12 }
 0x10e   :  { %v1909_v18 = vpop.f32.mrb[13].mxu0 }
 0x10f   :  { %v1910_v19 = vadd.f32 %v1909_v18, %v1908_v16  ;;  %v1911_v20 = vpop.f32.mrb[14].mxu0  ;;  %v1972_v21 = vpop.f32.mrb[12].mxu1 }
 0x110   :  { %v1912_v22 = vpop.f32.mrb[15].mxu0  ;;  %v1973_v25 = vpop.f32.mrb[13].mxu1 }
 0x111   :  { %v685_v23 = vadd.f32 %v1910_v19, %v2912_v30  ;;  %v1913_v24 = vadd.f32 %v1912_v22, %v1911_v20  ;;  %v1974_v26 = vadd.f32 %v1973_v25, %v1972_v21  ;;  %v1975_v27 = vpop.f32.mrb[14].mxu1 }
 0x112   :  { %v1976_v29 = vpop.f32.mrb[15].mxu1 }
 0x113   :  { %v688_v28 = vadd.f32 %v1913_v24, %v2912_v30  ;;  %v2943_v31 = vadd.f32 %v1974_v26, %v685_v23  ;;  %v1977_v32 = vadd.f32 %v1976_v29, %v1975_v27 }
 0x115   :  { %v1914_v33 = vpop.f32.mrb[16].mxu0  ;;  %v2945_v34 = vadd.f32 %v1977_v32, %v688_v28 }
 0x116   :  { %v1915_v35 = vpop.f32.mrb[17].mxu0 }
 0x117   :  { %v1916_v36 = vadd.f32 %v1915_v35, %v1914_v33  ;;  %v1917_v37 = vpop.f32.mrb[18].mxu0  ;;  %v1978_v38 = vpop.f32.mrb[16].mxu1 }
 0x118   :  { %v1918_v39 = vpop.f32.mrb[19].mxu0  ;;  %v1979_v42 = vpop.f32.mrb[17].mxu1 }
 0x119   :  { %v693_v40 = vadd.f32 %v1916_v36, %v2912_v30  ;;  %v1919_v41 = vadd.f32 %v1918_v39, %v1917_v37  ;;  %v1980_v43 = vadd.f32 %v1979_v42, %v1978_v38  ;;  %v1981_v44 = vpop.f32.mrb[18].mxu1 }
 0x11a   :  { %v1982_v47 = vpop.f32.mrb[19].mxu1 }
 0x11b   :  { %v696_v46 = vadd.f32 %v1919_v41, %v2912_v30  ;;  %v2949_v49 = vadd.f32 %v1980_v43, %v693_v40  ;;  %v1983_v50 = vadd.f32 %v1982_v47, %v1981_v44 }
 0x11d   :  { %v1920_v51 = vpop.f32.mrb[20].mxu0  ;;  %v2951_v52 = vadd.f32 %v1983_v50, %v696_v46 }
 0x11e   :  { %v1921_v53 = vpop.f32.mrb[21].mxu0 }
 0x11f   :  { %v1922_v54 = vadd.f32 %v1921_v53, %v1920_v51  ;;  %v1923_v55 = vpop.f32.mrb[22].mxu0  ;;  %v1984_v56 = vpop.f32.mrb[20].mxu1 }
 0x120   :  { %v1924_v57 = vpop.f32.mrb[23].mxu0  ;;  %v1985_v60 = vpop.f32.mrb[21].mxu1 }
 0x121   :  { %v701_v58 = vadd.f32 %v1922_v54, %v2912_v30  ;;  %v1925_v59 = vadd.f32 %v1924_v57, %v1923_v55  ;;  %v1986_v61 = vadd.f32 %v1985_v60, %v1984_v56  ;;  %v1987_v63 = vpop.f32.mrb[22].mxu1 }
 0x122   :  { %v1988_v2 = vpop.f32.mrb[23].mxu1 }
 0x123   :  { %v704_v0 = vadd.f32 %v1925_v59, %v2912_v30  ;;  %v2955_v3 = vadd.f32 %v1986_v61, %v701_v58  ;;  %v1989_v4 = vadd.f32 %v1988_v2, %v1987_v63 }
 0x125   :  { %v1926_v5 = vpop.f32.mrb[24].mxu0  ;;  %v2957_v6 = vadd.f32 %v1989_v4, %v704_v0 }
 0x126   :  { %v1927_v7 = vpop.f32.mrb[25].mxu0 }
 0x127   :  { %v1928_v8 = vadd.f32 %v1927_v7, %v1926_v5  ;;  %v1929_v9 = vpop.f32.mrb[26].mxu0  ;;  %v1990_v10 = vpop.f32.mrb[24].mxu1 }
 0x128   :  { %v1930_v11 = vpop.f32.mrb[27].mxu0  ;;  %v1991_v15 = vpop.f32.mrb[25].mxu1 }
 0x129   :  { %v709_v12 = vadd.f32 %v1928_v8, %v2912_v30  ;;  %v1931_v13 = vadd.f32 %v1930_v11, %v1929_v9  ;;  %v1992_v16 = vadd.f32 %v1991_v15, %v1990_v10  ;;  %v1993_v18 = vpop.f32.mrb[26].mxu1 }
 0x12a   :  { %v1994_v20 = vpop.f32.mrb[27].mxu1 }
 0x12b   :  { %v712_v19 = vadd.f32 %v1931_v13, %v2912_v30  ;;  %v2961_v21 = vadd.f32 %v1992_v16, %v709_v12  ;;  %v1995_v22 = vadd.f32 %v1994_v20, %v1993_v18 }
 0x12d   :  { %v1932_v23 = vpop.f32.mrb[28].mxu0  ;;  %v2963_v24 = vadd.f32 %v1995_v22, %v712_v19 }
 0x12e   :  { %v1933_v25 = vpop.f32.mrb[29].mxu0 }
 0x12f   :  { %v1934_v26 = vadd.f32 %v1933_v25, %v1932_v23  ;;  %v1935_v27 = vpop.f32.mrb[30].mxu0  ;;  %v1996_v28 = vpop.f32.mrb[28].mxu1 }
 0x130   :  { %v1936_v29 = vpop.f32.mrb[31].mxu0  ;;  %v1997_v35 = vpop.f32.mrb[29].mxu1 }
 0x131   :  { %v717_v32 = vadd.f32 %v1934_v26, %v2912_v30  ;;  %v1937_v33 = vadd.f32 %v1936_v29, %v1935_v27  ;;  %v1998_v36 = vadd.f32 %v1997_v35, %v1996_v28  ;;  %v1999_v37 = vpop.f32.mrb[30].mxu1 }
 0x132   :  { %v2000_v39 = vpop.f32.mrb[31].mxu1 }
 0x133   :  { %v720_v38 = vadd.f32 %v1937_v33, %v2912_v30  ;;  %v2967_v40 = vadd.f32 %v1998_v36, %v717_v32  ;;  %v2001_v41 = vadd.f32 %v2000_v39, %v1999_v37 }
 0x135   :  { %v2018_v42 = vpop.f32.mrb[32].mxu0  ;;  %v2969_v43 = vadd.f32 %v2001_v41, %v720_v38 }
 0x136   :  { %v2019_v44 = vpop.f32.mrb[33].mxu0 }
 0x137   :  { %v2020_v46 = vadd.f32 %v2019_v44, %v2018_v42  ;;  %v2021_v47 = vpop.f32.mrb[34].mxu0  ;;  %v2115_v51 = vpop.f32.mrb[32].mxu1 }
 0x138   :  { %v2022_v50 = vpop.f32.mrb[35].mxu0  ;;  %v951_v55 = vpop.f32.mrb[33].mxu1 }
 0x139   :  { %v2023_v53 = vadd.f32 %v2022_v50, %v2021_v47  ;;  %v855_v54 = vadd.f32 %v2020_v46, %v2922_v45  ;;  %v2116_v56 = vpop.f32.mrb[34].mxu1 }
 0x13a   :  { %v954_v58 = vpop.f32.mrb[35].mxu1 }
 0x13b   :  { %v952_v57 = vadd.f32 %v951_v55, %v855_v54  ;;  %v858_v30 = vadd.f32 %v2023_v53, %v2924_v48 }
 0x13d   :  { %v955_v59 = vadd.f32 %v954_v58, %v858_v30  ;;  %v2024_v60 = vpop.f32.mrb[36].mxu0  ;;  %v1014_v63 = vmax.f32 %v952_v57, 0.0 }
 0x13e   :  { %v2025_v61 = vpop.f32.mrb[37].mxu0 }
 0x13f   :  { %v1015_v0 = vmax.f32 %v955_v59, 0.0  ;;  %v2026_v2 = vadd.f32 %v2025_v61, %v2024_v60  ;;  %v2027_v4 = vpop.f32.mrb[38].mxu0  ;;  %v2119_v7 = vpop.f32.mrb[36].mxu1 }
 0x140   :  { %v2028_v5 = vpop.f32.mrb[39].mxu0  ;;  %v967_v10 = vpop.f32.mrb[37].mxu1 }
 0x141   :  { %v1030_v8 = vpack.c.bf16 %v1015_v0, %v1014_v63  ;;  %v863_v9 = vadd.f32 %v2026_v2, %v2931_v62  ;;  %v2029_v45 = vadd.f32 %v2028_v5, %v2027_v4  ;;  %v2120_v11 = vpop.f32.mrb[38].mxu1 }
 0x142   :  { %v970_v13 = vpop.f32.mrb[39].mxu1 }
 0x143   :  { %v960_v12 = vadd.f32 %v2115_v51, %v863_v9  ;;  %v866_v48 = vadd.f32 %v2029_v45, %v2933_v1  ;;  %2137 = vmatprep.mubr.msk.bf16.mxu1 %vm1077_vm1, %v1030_v8 }
 0x145   :  { %v963_v15 = vadd.f32 %v2116_v56, %v866_v48  ;;  %v2030_v16 = vpop.f32.mrb[40].mxu0  ;;  %v1016_v19 = vmax.f32 %v960_v12, 0.0 }
 0x146   :  { %v2031_v18 = vpop.f32.mrb[41].mxu0 }
 0x147   :  { %v1017_v20 = vmax.f32 %v963_v15, 0.0  ;;  %v2032_v22 = vadd.f32 %v2031_v18, %v2030_v16  ;;  %v2033_v23 = vpop.f32.mrb[42].mxu0  ;;  %v2123_v26 = vpop.f32.mrb[40].mxu1 }
 0x148   :  { %v2034_v25 = vpop.f32.mrb[43].mxu0  ;;  %v983_v29 = vpop.f32.mrb[41].mxu1 }
 0x149   :  { %v1031_v27 = vpack.c.bf16 %v1017_v20, %v1016_v19  ;;  %v2035_v62 = vadd.f32 %v2034_v25, %v2033_v23  ;;  %v871_v28 = vadd.f32 %v2032_v22, %v2937_v14  ;;  %v2124_v32 = vpop.f32.mrb[42].mxu1 }
 0x14a   :  { %v986_v35 = vpop.f32.mrb[43].mxu1 }
 0x14b   :  { %v968_v33 = vadd.f32 %v967_v10, %v871_v28  ;;  %2138 = vmatmul.mubr.msk.bf16.vlgmr.msra.gmra.mrb[48].mxu1 %vm1077_vm1, %v1031_v27  ;;  %v874_v1 = vadd.f32 %v2035_v62, %v2939_v17 }
 0x14d   :  { %v971_v36 = vadd.f32 %v970_v13, %v874_v1  ;;  %v2036_v37 = vpop.f32.mrb[44].mxu0  ;;  %v1018_v39 = vmax.f32 %v968_v33, 0.0 }
 0x14e   :  { %v2037_v38 = vpop.f32.mrb[45].mxu0 }
 0x14f   :  { %v1019_v41 = vmax.f32 %v971_v36, 0.0  ;;  %v2038_v42 = vadd.f32 %v2037_v38, %v2036_v37  ;;  %v2039_v44 = vpop.f32.mrb[46].mxu0  ;;  %v2979_v47 = vpop.f32.mrb[44].mxu1 }
 0x150   :  { %v2040_v46 = vpop.f32.mrb[47].mxu0  ;;  %v999_v53 = vpop.f32.mrb[45].mxu1 }
 0x151   :  { %v1032_v50 = vpack.c.bf16 %v1019_v41, %v1018_v39  ;;  %v879_v14 = vadd.f32 %v2038_v42, %v2943_v31  ;;  %v2041_v51 = vadd.f32 %v2040_v46, %v2039_v44  ;;  %v2128_v54 = vpop.f32.mrb[46].mxu1 }
 0x152   :  { %v1002_v56 = vpop.f32.mrb[47].mxu1 }
 0x153   :  { %v976_v55 = vadd.f32 %v2119_v7, %v879_v14  ;;  %v882_v17 = vadd.f32 %v2041_v51, %v2945_v34  ;;  %2141 = vmatprep.mubr.msk.bf16.mxu1 %vm1077_vm1, %v1032_v50 }
 0x155   :  { %v979_v57 = vadd.f32 %v2120_v11, %v882_v17  ;;  %v2042_v30 = vpop.f32.mrb[48].mxu0  ;;  %v1020_v59 = vmax.f32 %v976_v55, 0.0 }
 0x156   :  { %v2043_v58 = vpop.f32.mrb[49].mxu0 }
 0x157   :  { %v1021_v60 = vmax.f32 %v979_v57, 0.0  ;;  %v2044_v61 = vadd.f32 %v2043_v58, %v2042_v30  ;;  %v2045_v63 = vpop.f32.mrb[50].mxu0 }
 0x158   :  { %v2046_v0 = vpop.f32.mrb[51].mxu0 }
 0x159   :  { %v1033_v2 = vpack.c.bf16 %v1021_v60, %v1020_v59  ;;  %v2047_v4 = vadd.f32 %v2046_v0, %v2045_v63  ;;  %v887_v31 = vadd.f32 %v2044_v61, %v2949_v49 }
 0x15b   :  { %v984_v5 = vadd.f32 %v983_v29, %v887_v31  ;;  %2142 = vmatmul.mubr.msk.bf16.gmra.mrb[52].mxu1 %vm1077_vm1, %v1033_v2  ;;  %v890_v34 = vadd.f32 %v2047_v4, %v2951_v52 }
 0x15d   :  { %v987_v7 = vadd.f32 %v986_v35, %v890_v34  ;;  %v2048_v8 = vpop.f32.mrb[52].mxu0  ;;  %v1022_v45 = vmax.f32 %v984_v5, 0.0 }
 0x15e   :  { %v2049_v9 = vpop.f32.mrb[53].mxu0 }
 0x15f   :  { %v1023_v10 = vmax.f32 %v987_v7, 0.0  ;;  %v2050_v11 = vadd.f32 %v2049_v9, %v2048_v8  ;;  %v2051_v12 = vpop.f32.mrb[54].mxu0 }
 0x160   :  { %v2052_v48 = vpop.f32.mrb[55].mxu0 }
 0x161   :  { %v1034_v13 = vpack.c.bf16 %v1023_v10, %v1022_v45  ;;  %v895_v15 = vadd.f32 %v2050_v11, %v2955_v3  ;;  %v2053_v16 = vadd.f32 %v2052_v48, %v2051_v12 }
 0x163   :  { %v992_v18 = vadd.f32 %v2123_v26, %v895_v15  ;;  %v898_v49 = vadd.f32 %v2053_v16, %v2957_v6  ;;  %2145 = vmatprep.mubr.msk.bf16.mxu1 %vm1077_vm1, %v1034_v13 }
 0x165   :  { %v995_v19 = vadd.f32 %v2124_v32, %v898_v49  ;;  %v2054_v20 = vpop.f32.mrb[56].mxu0  ;;  %v1024_v22 = vmax.f32 %v992_v18, 0.0 }
 0x166   :  { %v2055_v52 = vpop.f32.mrb[57].mxu0 }
 0x167   :  { %v1025_v23 = vmax.f32 %v995_v19, 0.0  ;;  %v2056_v25 = vadd.f32 %v2055_v52, %v2054_v20  ;;  %v2057_v27 = vpop.f32.mrb[58].mxu0 }
 0x168   :  { %v2058_v62 = vpop.f32.mrb[59].mxu0 }
 0x169   :  { %v1035_v28 = vpack.c.bf16 %v1025_v23, %v1024_v22  ;;  %v2059_v29 = vadd.f32 %v2058_v62, %v2057_v27  ;;  %v903_v33 = vadd.f32 %v2056_v25, %v2961_v21 }
 0x16b   :  { %v1000_v1 = vadd.f32 %v999_v53, %v903_v33  ;;  %2146 = vmatmul.mubr.msk.bf16.gmra.mrb[56].mxu1 %vm1077_vm1, %v1035_v28  ;;  %v906_v3 = vadd.f32 %v2059_v29, %v2963_v24  ;;  %v2260_v53 = vld [vmem:[%s3151_s5 + $0x18] sm:$0xff]  }
 0x16c   :  { %2159 = vmatprep.subr.bf16.mxu0 %v2260_v53 }
 0x16d   :  { %v1003_v6 = vadd.f32 %v1002_v56, %v906_v3  ;;  %v2060_v26 = vpop.f32.mrb[60].mxu0  ;;  %v1026_v32 = vmax.f32 %v1000_v1, 0.0  ;;  %2160 = vmatpush3.bf16.msra.mxu0 %v2260_v53 }
 0x16e   :  { %v2061_v35 = vpop.f32.mrb[61].mxu0 }
 0x16f   :  { %v1027_v36 = vmax.f32 %v1003_v6, 0.0  ;;  %v2062_v37 = vadd.f32 %v2061_v35, %v2060_v26  ;;  %v2063_v38 = vpop.f32.mrb[62].mxu0 }
 0x170   :  { %v2064_v39 = vpop.f32.mrb[63].mxu0 }
 0x171   :  { %v1036_v41 = vpack.c.bf16 %v1027_v36, %v1026_v32  ;;  %v911_v42 = vadd.f32 %v2062_v37, %v2967_v40  ;;  %v2065_v44 = vadd.f32 %v2064_v39, %v2063_v38  ;;  %v2261_v40 = vld [vmem:[%s3153_s7] sm:$0xff]  }
 0x172   :  { %2177 = vmatprep.subr.bf16.mxu1 %v2261_v40 }
 0x173   :  { %v1008_v46 = vadd.f32 %v2979_v47, %v911_v42  ;;  %v914_v21 = vadd.f32 %v2065_v44, %v2969_v43  ;;  %2149 = vmatprep.mubr.msk.bf16.mxu1 %vm1077_vm1, %v1036_v41  ;;  %v2262_v43 = vld [vmem:[%s3153_s7 + $0x8] sm:$0xff]   ;;  %2178 = vmatpush3.bf16.msra.mxu1 %v2261_v40  ;;  %v1835_v47 = vld [vmem:[%s3150_s4] ss:$0 sm:$0xff] }
 0x174   :  { %2179 = vmatprep.subr.bf16.mxu1 %v2262_v43 }
 0x175   :  { %v1011_v50 = vadd.f32 %v2128_v54, %v914_v21  ;;  %v1028_v24 = vmax.f32 %v1008_v46, 0.0 }
 0x177   :  { %v1029_v14 = vmax.f32 %v1011_v50, 0.0  ;;  %2180 = vmatpush3.bf16.msra.mxu1 %v2262_v43  ;;  %v2263_v50 = vld [vmem:[%s3153_s7 + $0x10] sm:$0xff]  }
 0x178   :  { %2181 = vmatprep.subr.bf16.mxu1 %v2263_v50 }
 0x179   :  { %v1037_v51 = vpack.c.bf16 %v1029_v14, %v1028_v24  ;;  %v2264_v24 = vld [vmem:[%s3153_s7 + $0x18] sm:$0xff]   ;;  %v1848_v14 = vld [vmem:[%s3152_s6] ss:$0 sm:$0xff] }
 0x17b   :  { %2150 = vmatmul.mubr.msk.bf16.gmra.mrb[60].mxu1 %vm1077_vm1, %v1037_v51 }
 0x17c   :  { %2182 = vmatpush3.bf16.msra.mxu1 %v2263_v50 }
 0x17d   :  { %2183 = vmatprep.subr.bf16.mxu1 %v2264_v24 }
 0x180   :  { %2184 = vmatpush3.bf16.msra.mxu1 %v2264_v24 }
 0x21e   :  { %v2139_v54 = vpop.f32.mrb[48].mxu1 }
 0x21f   :  { %v1145_v55 = vadd.f32 %v2139_v54, %v1835_v47  ;;  %v1136_v17 = vpop.f32.mrb[49].mxu1 }
 0x220   :  { %v1137_v56 = vadd.f32 %v1835_v47, %v1136_v17  ;;  %v2140_v57 = vpop.f32.mrb[50].mxu1 }
 0x221   :  { %v1148_v30 = vadd.f32 %v2140_v57, %v1835_v47  ;;  %v1139_v58 = vpop.f32.mrb[51].mxu1  ;;  %v1201_v60 = vmax.f32 %v1145_v55, 0.0 }
 0x222   :  { %v1140_v59 = vadd.f32 %v1835_v47, %v1139_v58  ;;  %v1199_v63 = vmax.f32 %v1137_v56, 0.0 }
 0x223   :  { %v1202_v61 = vmax.f32 %v1148_v30, 0.0 }
 0x224   :  { %v1200_v0 = vmax.f32 %v1140_v59, 0.0 }
 0x225   :  { %v1216_v2 = vpack.c.bf16 %v1202_v61, %v1201_v60 }
 0x226   :  { %v1215_v4 = vpack.c.bf16 %v1200_v0, %v1199_v63 }
 0x228   :  { %2161 = vmatprep.mubr.msk.bf16.mxu0 %vm1077_vm1, %v1215_v4 }
 0x229   :  { %2162 = vmatmul.mubr.msk.bf16.vlgmr.msra.gmra.mrb[64].mxu0 %vm1077_vm1, %v1216_v2 }
 0x22e   :  { %v2143_v31 = vpop.f32.mrb[52].mxu1 }
 0x22f   :  { %v1161_v5 = vadd.f32 %v2143_v31, %v1835_v47  ;;  %v1152_v34 = vpop.f32.mrb[53].mxu1 }
 0x230   :  { %v1153_v7 = vadd.f32 %v1835_v47, %v1152_v34  ;;  %v2144_v8 = vpop.f32.mrb[54].mxu1 }
 0x231   :  { %v1164_v9 = vadd.f32 %v2144_v8, %v1835_v47  ;;  %v1155_v45 = vpop.f32.mrb[55].mxu1  ;;  %v1205_v11 = vmax.f32 %v1161_v5, 0.0 }
 0x232   :  { %v1156_v10 = vadd.f32 %v1835_v47, %v1155_v45  ;;  %v1203_v48 = vmax.f32 %v1153_v7, 0.0 }
 0x233   :  { %v1206_v12 = vmax.f32 %v1164_v9, 0.0 }
 0x234   :  { %v1204_v13 = vmax.f32 %v1156_v10, 0.0 }
 0x235   :  { %v1218_v15 = vpack.c.bf16 %v1206_v12, %v1205_v11 }
 0x236   :  { %v1217_v16 = vpack.c.bf16 %v1204_v13, %v1203_v48 }
 0x238   :  { %2165 = vmatprep.mubr.msk.bf16.mxu0 %vm1077_vm1, %v1217_v16 }
 0x239   :  { %2166 = vmatmul.mubr.msk.bf16.gmra.mrb[68].mxu0 %vm1077_vm1, %v1218_v15 }
 0x23e   :  { %v2147_v18 = vpop.f32.mrb[56].mxu1 }
 0x23f   :  { %v1177_v49 = vadd.f32 %v2147_v18, %v1835_v47  ;;  %v1168_v19 = vpop.f32.mrb[57].mxu1 }
 0x240   :  { %v1169_v20 = vadd.f32 %v1835_v47, %v1168_v19  ;;  %v2148_v52 = vpop.f32.mrb[58].mxu1 }
 0x241   :  { %v1180_v22 = vadd.f32 %v2148_v52, %v1835_v47  ;;  %v1171_v23 = vpop.f32.mrb[59].mxu1  ;;  %v1209_v27 = vmax.f32 %v1177_v49, 0.0 }
 0x242   :  { %v1172_v25 = vadd.f32 %v1835_v47, %v1171_v23  ;;  %v1207_v28 = vmax.f32 %v1169_v20, 0.0 }
 0x243   :  { %v1210_v62 = vmax.f32 %v1180_v22, 0.0 }
 0x244   :  { %v1208_v29 = vmax.f32 %v1172_v25, 0.0 }
 0x245   :  { %v1220_v33 = vpack.c.bf16 %v1210_v62, %v1209_v27 }
 0x246   :  { %v1219_v1 = vpack.c.bf16 %v1208_v29, %v1207_v28 }
 0x248   :  { %2169 = vmatprep.mubr.msk.bf16.mxu0 %vm1077_vm1, %v1219_v1 }
 0x249   :  { %2170 = vmatmul.mubr.msk.bf16.gmra.mrb[72].mxu0 %vm1077_vm1, %v1220_v33 }
 0x24e   :  { %v2151_v3 = vpop.f32.mrb[60].mxu1 }
 0x24f   :  { %v1193_v6 = vadd.f32 %v2151_v3, %v1835_v47  ;;  %v1184_v26 = vpop.f32.mrb[61].mxu1 }
 0x250   :  { %v1185_v35 = vadd.f32 %v1835_v47, %v1184_v26  ;;  %v2152_v32 = vpop.f32.mrb[62].mxu1 }
 0x251   :  { %v1196_v36 = vadd.f32 %v2152_v32, %v1835_v47  ;;  %v1187_v37 = vpop.f32.mrb[63].mxu1  ;;  %v1213_v39 = vmax.f32 %v1193_v6, 0.0 }
 0x252   :  { %v1188_v38 = vadd.f32 %v1835_v47, %v1187_v37  ;;  %v1211_v42 = vmax.f32 %v1185_v35, 0.0 }
 0x253   :  { %v1214_v41 = vmax.f32 %v1196_v36, 0.0 }
 0x254   :  { %v1212_v44 = vmax.f32 %v1188_v38, 0.0 }
 0x255   :  { %v1222_v46 = vpack.c.bf16 %v1214_v41, %v1213_v39  ;;  %v1861_v41 = vld [vmem:[%s3154_s8] ss:$0 sm:$0xff]  ;;  %s2353_s8 = smov [#allocation2]  }
 0x256   :  { %v1221_v21 = vpack.c.bf16 %v1212_v44, %v1211_v42  ;;  %s1766_s13 = sshll.u32 %s2353_s8, 4  ;;  %s1767_s13 = int_to_ptr.vmem [resolvable:$true] %s1766_s13 }
 0x257   :  { %s2329_s14 = scalar_lea.vmem %s1767_s13, 256  ;;  %p2334_p1 = scmp.lt.s32.totalorder %s1767_s13, %s1767_s13 }
 0x258   :  { %2173 = vmatprep.mubr.msk.bf16.mxu0 %vm1077_vm1, %v1221_v21  ;;  %p2330_p0 = scmp.ne.s32.totalorder %s1767_s13, %s2329_s14  ;;  %p2335_p2 = scmp.lt.s32.totalorder %s2329_s14, %s2329_s14 }
 0x259   :  { %2174 = vmatmul.mubr.msk.bf16.gmra.mrb[76].mxu0 %vm1077_vm1, %v1222_v46 }
 0x25a   :  { %p2336_p3 = por %p2335_p2, %p2334_p1 }
 0x25c   :  { %p2337_p4 = pnand %p2336_p3, %p2330_p0 }
 0x2fc   :  { %v2163_v51 = vpop.f32.mrb[64].mxu0 }
 0x2fd   :  { %v1329_v53 = vadd.f32 %v2163_v51, %v1848_v14  ;;  %v1320_v40 = vpop.f32.mrb[65].mxu0 }
 0x2fe   :  { %v1321_v43 = vadd.f32 %v1848_v14, %v1320_v40  ;;  %v2164_v47 = vpop.f32.mrb[66].mxu0 }
 0x2ff   :  { %v1332_v54 = vadd.f32 %v2164_v47, %v1848_v14  ;;  %v1323_v55 = vpop.f32.mrb[67].mxu0  ;;  %v1385_v56 = vmax.f32 %v1329_v53, 0.0 }
 0x300   :  { %v1324_v17 = vadd.f32 %v1848_v14, %v1323_v55  ;;  %v1383_v30 = vmax.f32 %v1321_v43, 0.0 }
 0x301   :  { %v1386_v57 = vmax.f32 %v1332_v54, 0.0 }
 0x302   :  { %v1384_v58 = vmax.f32 %v1324_v17, 0.0 }
 0x303   :  { %v1400_v59 = vpack.c.bf16 %v1386_v57, %v1385_v56 }
 0x304   :  { %v1399_v60 = vpack.c.bf16 %v1384_v58, %v1383_v30 }
 0x306   :  { %2185 = vmatprep.mubr.msk.bf16.mxu1 %vm1077_vm1, %v1399_v60 }
 0x307   :  { %2186 = vmatmul.mubr.msk.bf16.vlgmr.msra.gmra.mrb[64].mxu1 %vm1077_vm1, %v1400_v59 }
 0x30c   :  { %v2167_v61 = vpop.f32.mrb[68].mxu0 }
 0x30d   :  { %v1345_v63 = vadd.f32 %v2167_v61, %v1848_v14  ;;  %v1336_v0 = vpop.f32.mrb[69].mxu0 }
 0x30e   :  { %v1337_v2 = vadd.f32 %v1848_v14, %v1336_v0  ;;  %v2168_v4 = vpop.f32.mrb[70].mxu0 }
 0x30f   :  { %v1348_v31 = vadd.f32 %v2168_v4, %v1848_v14  ;;  %v1339_v5 = vpop.f32.mrb[71].mxu0  ;;  %v1389_v7 = vmax.f32 %v1345_v63, 0.0 }
 0x310   :  { %v1340_v34 = vadd.f32 %v1848_v14, %v1339_v5  ;;  %v1387_v9 = vmax.f32 %v1337_v2, 0.0 }
 0x311   :  { %v1390_v8 = vmax.f32 %v1348_v31, 0.0 }
 0x312   :  { %v1388_v45 = vmax.f32 %v1340_v34, 0.0 }
 0x313   :  { %v1402_v10 = vpack.c.bf16 %v1390_v8, %v1389_v7 }
 0x314   :  { %v1401_v11 = vpack.c.bf16 %v1388_v45, %v1387_v9 }
 0x316   :  { %2189 = vmatprep.mubr.msk.bf16.mxu1 %vm1077_vm1, %v1401_v11 }
 0x317   :  { %2190 = vmatmul.mubr.msk.bf16.gmra.mrb[68].mxu1 %vm1077_vm1, %v1402_v10 }
 0x31c   :  { %v2171_v12 = vpop.f32.mrb[72].mxu0 }
 0x31d   :  { %v1361_v48 = vadd.f32 %v2171_v12, %v1848_v14  ;;  %v1352_v13 = vpop.f32.mrb[73].mxu0 }
 0x31e   :  { %v1353_v15 = vadd.f32 %v1848_v14, %v1352_v13  ;;  %v2172_v16 = vpop.f32.mrb[74].mxu0 }
 0x31f   :  { %v1364_v18 = vadd.f32 %v2172_v16, %v1848_v14  ;;  %v1355_v49 = vpop.f32.mrb[75].mxu0  ;;  %v1393_v20 = vmax.f32 %v1361_v48, 0.0 }
 0x320   :  { %v1356_v19 = vadd.f32 %v1848_v14, %v1355_v49  ;;  %v1391_v22 = vmax.f32 %v1353_v15, 0.0 }
 0x321   :  { %v1394_v52 = vmax.f32 %v1364_v18, 0.0 }
 0x322   :  { %v1392_v23 = vmax.f32 %v1356_v19, 0.0 }
 0x323   :  { %v1404_v25 = vpack.c.bf16 %v1394_v52, %v1393_v20 }
 0x324   :  { %v1403_v27 = vpack.c.bf16 %v1392_v23, %v1391_v22 }
 0x326   :  { %2193 = vmatprep.mubr.msk.bf16.mxu1 %vm1077_vm1, %v1403_v27 }
 0x327   :  { %2194 = vmatmul.mubr.msk.bf16.gmra.mrb[72].mxu1 %vm1077_vm1, %v1404_v25 }
 0x32c   :  { %v2175_v62 = vpop.f32.mrb[76].mxu0 }
 0x32d   :  { %v1377_v28 = vadd.f32 %v2175_v62, %v1848_v14  ;;  %v1368_v29 = vpop.f32.mrb[77].mxu0 }
 0x32e   :  { %v1369_v33 = vadd.f32 %v1848_v14, %v1368_v29  ;;  %v2176_v1 = vpop.f32.mrb[78].mxu0 }
 0x32f   :  { %v1380_v3 = vadd.f32 %v2176_v1, %v1848_v14  ;;  %v1371_v6 = vpop.f32.mrb[79].mxu0  ;;  %v1397_v35 = vmax.f32 %v1377_v28, 0.0 }
 0x330   :  { %v1372_v26 = vadd.f32 %v1848_v14, %v1371_v6  ;;  %v1395_v36 = vmax.f32 %v1369_v33, 0.0 }
 0x331   :  { %v1398_v32 = vmax.f32 %v1380_v3, 0.0 }
 0x332   :  { %v1396_v37 = vmax.f32 %v1372_v26, 0.0 }
 0x333   :  { %v1406_v38 = vpack.c.bf16 %v1398_v32, %v1397_v35 }
 0x334   :  { %v1405_v39 = vpack.c.bf16 %v1396_v37, %v1395_v36 }
 0x336   :  { %2197 = vmatprep.mubr.msk.bf16.mxu1 %vm1077_vm1, %v1405_v39 }
 0x337   :  { %2198 = vmatmul.mubr.msk.bf16.gmra.mrb[76].mxu1 %vm1077_vm1, %v1406_v38 }
 0x3da   :  { %v2187_v42 = vpop.f32.mrb[64].mxu1 }
 0x3db   :  { %v1513_v44 = vadd.f32 %v2187_v42, %v1861_v41  ;;  %v1504_v46 = vpop.f32.mrb[65].mxu1 }
 0x3dc   :  { %v1505_v21 = vadd.f32 %v1861_v41, %v1504_v46  ;;  %v2188_v50 = vpop.f32.mrb[66].mxu1 }
 0x3dd   :  { %1571 = vmax.xlane.f32.xlu1 %v1513_v44  ;;  %v1507_v24 = vpop.f32.mrb[67].mxu1  ;;  %v1516_v14 = vadd.f32 %v2188_v50, %v1861_v41 }
 0x3de   :  { %1567 = vmax.xlane.f32.xlu0 %v1505_v21  ;;  %v1508_v51 = vadd.f32 %v1861_v41, %v1507_v24 }
 0x3e1   :  { %1573 = vmax.xlane.f32.xlu1 %v1516_v14 }
 0x3e2   :  { %1569 = vmax.xlane.f32.xlu0 %v1508_v51 }
 0x3ea   :  { %v2191_v53 = vpop.f32.mrb[68].mxu1 }
 0x3eb   :  { %v1520_v40 = vpop.f32.mrb[69].mxu1  ;;  %v1529_v17 = vadd.f32 %v2191_v53, %v1861_v41 }
 0x3ec   :  { %v1521_v43 = vadd.f32 %v1861_v41, %v1520_v40  ;;  %v2192_v47 = vpop.f32.mrb[70].mxu1 }
 0x3ed   :  { %v1523_v54 = vpop.f32.mrb[71].mxu1  ;;  %v1532_v56 = vadd.f32 %v2192_v47, %v1861_v41 }
 0x3ee   :  { %v1524_v55 = vadd.f32 %v1861_v41, %v1523_v54  ;;  %1575 = vmax.xlane.f32.xlu0 %v1521_v43 }
 0x3f0   :  { %1577 = vmax.xlane.f32.xlu1 %v1524_v55 }
 0x3f2   :  { %1579 = vmax.xlane.f32.xlu0 %v1529_v17 }
 0x3f4   :  { %1581 = vmax.xlane.f32.xlu1 %v1532_v56 }
 0x3fa   :  { %v2195_v57 = vpop.f32.mrb[72].mxu1 }
 0x3fb   :  { %v1536_v30 = vpop.f32.mrb[73].mxu1  ;;  %v3043_v63 = vadd.f32 %v2195_v57, %v1861_v41 }
 0x3fc   :  { %v3038_v58 = vadd.f32 %v1861_v41, %v1536_v30  ;;  %v2196_v59 = vpop.f32.mrb[74].mxu1 }
 0x3fd   :  { %v1539_v60 = vpop.f32.mrb[75].mxu1  ;;  %v3046_v0 = vadd.f32 %v2196_v59, %v1861_v41 }
 0x3fe   :  { %v3040_v61 = vadd.f32 %v1861_v41, %v1539_v60  ;;  %1583 = vmax.xlane.f32.xlu0 %v3038_v58 }
 0x400   :  { %1585 = vmax.xlane.f32.xlu1 %v3040_v61 }
 0x402   :  { %1587 = vmax.xlane.f32.xlu0 %v3043_v63 }
 0x404   :  { %1589 = vmax.xlane.f32.xlu1 %v3046_v0 }
 0x40a   :  { %v2199_v2 = vpop.f32.mrb[76].mxu1 }
 0x40b   :  { %v1552_v4 = vpop.f32.mrb[77].mxu1  ;;  %v3055_v8 = vadd.f32 %v2199_v2, %v1861_v41 }
 0x40c   :  { %v3050_v31 = vadd.f32 %v1861_v41, %v1552_v4  ;;  %v2200_v5 = vpop.f32.mrb[78].mxu1 }
 0x40d   :  { %v1555_v34 = vpop.f32.mrb[79].mxu1  ;;  %v3058_v9 = vadd.f32 %v2200_v5, %v1861_v41 }
 0x40e   :  { %v3052_v7 = vadd.f32 %v1861_v41, %v1555_v34  ;;  %1591 = vmax.xlane.f32.xlu0 %v3050_v31 }
 0x410   :  { %1593 = vmax.xlane.f32.xlu1 %v3052_v7 }
 0x412   :  { %1595 = vmax.xlane.f32.xlu0 %v3055_v8 }
 0x414   :  { %1597 = vmax.xlane.f32.xlu1 %v3058_v9 }
 0x46a   :  { %v1572_v45 = vpop.xlane.xlu1 %1571 }
 0x46b   :  { %v3062_v10 = vsub.f32 %v1513_v44, %v1572_v45  ;;  %v1568_v11 = vpop.xlane.xlu0 %1567 }
 0x46c   :  { %v3064_v12 = vsub.f32 %v1505_v21, %v1568_v11 }
 0x46d   :  { %v1619_v48 = vmul.f32 1.442695, %v3062_v10 }
 0x46e   :  { %v1574_v13 = vpop.xlane.xlu1 %1573  ;;  %v1615_v15 = vmul.f32 1.442695, %v3064_v12 }
 0x46f   :  { %2265 = vpow2.f32 %v1619_v48  ;;  %v1570_v16 = vpop.xlane.xlu0 %1569  ;;  %v3068_v18 = vsub.f32 %v1516_v14, %v1574_v13 }
 0x470   :  { %v3070_v49 = vsub.f32 %v1508_v51, %v1570_v16  ;;  %2267 = vpow2.f32 %v1615_v15 }
 0x471   :  { %v1621_v20 = vmul.f32 1.442695, %v3068_v18 }
 0x472   :  { %v1617_v19 = vmul.f32 1.442695, %v3070_v49 }
 0x474   :  { %2269 = vpow2.f32 %v1617_v19 }
 0x475   :  { %2271 = vpow2.f32 %v1621_v20 }
 0x479   :  { %v2266_v52 = vpop.eup %2265 }
 0x47a   :  { %1651 = vadd.xlane.f32.xlu0 %v2266_v52  ;;  %v2268_v23 = vpop.eup %2267 }
 0x47b   :  { %v1576_v22 = vpop.xlane.xlu0 %1575 }
 0x47c   :  { %v3076_v29 = vsub.f32 %v1521_v43, %v1576_v22 }
 0x47d   :  { %v1578_v25 = vpop.xlane.xlu1 %1577 }
 0x47e   :  { %v2270_v27 = vpop.eup %2269  ;;  %v3074_v62 = vsub.f32 %v1524_v55, %v1578_v25  ;;  %1647 = vadd.xlane.f32.xlu0 %v2268_v23  ;;  %v1623_v32 = vmul.f32 1.442695, %v3076_v29 }
 0x47f   :  { %1649 = vadd.xlane.f32.xlu1 %v2270_v27  ;;  %v1580_v28 = vpop.xlane.xlu0 %1579  ;;  %v2272_v6 = vpop.eup %2271 }
 0x480   :  { %v1625_v33 = vmul.f32 1.442695, %v3074_v62  ;;  %v3079_v1 = vsub.f32 %v1529_v17, %v1580_v28 }
 0x481   :  { %v1582_v3 = vpop.xlane.xlu1 %1581 }
 0x482   :  { %2273 = vpow2.f32 %v1625_v33  ;;  %v1627_v26 = vmul.f32 1.442695, %v3079_v1  ;;  %v3082_v35 = vsub.f32 %v1532_v56, %v1582_v3 }
 0x483   :  { %1653 = vadd.xlane.f32.xlu1 %v2272_v6 }
 0x484   :  { %2275 = vpow2.f32 %v1627_v26  ;;  %v1629_v36 = vmul.f32 1.442695, %v3082_v35 }
 0x486   :  { %2277 = vpow2.f32 %v1629_v36 }
 0x487   :  { %2279 = vpow2.f32 %v1623_v32 }
 0x48b   :  { %v1584_v37 = vpop.xlane.xlu0 %1583 }
 0x48c   :  { %v2274_v38 = vpop.eup %2273  ;;  %v3090_v21 = vsub.f32 %v3038_v58, %v1584_v37 }
 0x48d   :  { %v1586_v39 = vpop.xlane.xlu1 %1585  ;;  %1657 = vadd.xlane.f32.xlu1 %v2274_v38 }
 0x48e   :  { %v2276_v41 = vpop.eup %2275  ;;  %v3087_v42 = vsub.f32 %v3040_v61, %v1586_v39  ;;  %v1631_v43 = vmul.f32 1.442695, %v3090_v21 }
 0x48f   :  { %1659 = vadd.xlane.f32.xlu0 %v2276_v41  ;;  %v1588_v44 = vpop.xlane.xlu0 %1587 }
 0x490   :  { %v2278_v46 = vpop.eup %2277  ;;  %v1633_v50 = vmul.f32 1.442695, %v3087_v42  ;;  %v3094_v24 = vsub.f32 %v3043_v63, %v1588_v44 }
 0x491   :  { %v1590_v14 = vpop.xlane.xlu1 %1589  ;;  %1661 = vadd.xlane.f32.xlu1 %v2278_v46  ;;  %v2280_v51 = vpop.eup %2279 }
 0x492   :  { %2281 = vpow2.f32 %v1633_v50  ;;  %v1635_v53 = vmul.f32 1.442695, %v3094_v24  ;;  %v3098_v40 = vsub.f32 %v3046_v0, %v1590_v14 }
 0x493   :  { %1655 = vadd.xlane.f32.xlu0 %v2280_v51 }
 0x494   :  { %2283 = vpow2.f32 %v1635_v53  ;;  %v1637_v47 = vmul.f32 1.442695, %v3098_v40 }
 0x496   :  { %2285 = vpow2.f32 %v1637_v47 }
 0x497   :  { %2287 = vpow2.f32 %v1631_v43 }
 0x49b   :  { %v1592_v54 = vpop.xlane.xlu0 %1591 }
 0x49c   :  { %v2282_v55 = vpop.eup %2281  ;;  %v3106_v59 = vsub.f32 %v3050_v31, %v1592_v54 }
 0x49d   :  { %v1594_v17 = vpop.xlane.xlu1 %1593  ;;  %1665 = vadd.xlane.f32.xlu1 %v2282_v55 }
 0x49e   :  { %v2284_v56 = vpop.eup %2283  ;;  %v3103_v57 = vsub.f32 %v3052_v7, %v1594_v17  ;;  %v1639_v5 = vmul.f32 1.442695, %v3106_v59 }
 0x49f   :  { %1667 = vadd.xlane.f32.xlu0 %v2284_v56  ;;  %v1596_v30 = vpop.xlane.xlu0 %1595 }
 0x4a0   :  { %v2286_v58 = vpop.eup %2285  ;;  %v1641_v60 = vmul.f32 1.442695, %v3103_v57  ;;  %v3110_v61 = vsub.f32 %v3055_v8, %v1596_v30 }
 0x4a1   :  { %v1598_v63 = vpop.xlane.xlu1 %1597  ;;  %1669 = vadd.xlane.f32.xlu1 %v2286_v58  ;;  %v2288_v0 = vpop.eup %2287 }
 0x4a2   :  { %2289 = vpow2.f32 %v1641_v60  ;;  %v1643_v2 = vmul.f32 1.442695, %v3110_v61  ;;  %v3114_v4 = vsub.f32 %v3058_v9, %v1598_v63 }
 0x4a3   :  { %1663 = vadd.xlane.f32.xlu0 %v2288_v0 }
 0x4a4   :  { %2291 = vpow2.f32 %v1643_v2  ;;  %v1645_v31 = vmul.f32 1.442695, %v3114_v4 }
 0x4a6   :  { %2293 = vpow2.f32 %v1645_v31 }
 0x4a7   :  { %2295 = vpow2.f32 %v1639_v5 }
 0x4ac   :  { %v2290_v34 = vpop.eup %2289 }
 0x4ad   :  { %1673 = vadd.xlane.f32.xlu1 %v2290_v34 }
 0x4ae   :  { %v2292_v7 = vpop.eup %2291 }
 0x4af   :  { %1675 = vadd.xlane.f32.xlu0 %v2292_v7 }
 0x4b0   :  { %v2294_v8 = vpop.eup %2293 }
 0x4b1   :  { %1677 = vadd.xlane.f32.xlu1 %v2294_v8  ;;  %v2296_v45 = vpop.eup %2295 }
 0x4b3   :  { %1671 = vadd.xlane.f32.xlu0 %v2296_v45 }
 0x507   :  { %v1652_v11 = vpop.xlane.xlu0 %1651 }
 0x50b   :  { %v1648_v48 = vpop.xlane.xlu0 %1647 }
 0x50c   :  { %2297 = vlog2.f32 %v1648_v48  ;;  %v1650_v9 = vpop.xlane.xlu1 %1649 }
 0x50d   :  { %2299 = vlog2.f32 %v1650_v9 }
 0x50e   :  { %2301 = vlog2.f32 %v1652_v11 }
 0x510   :  { %v1654_v13 = vpop.xlane.xlu1 %1653 }
 0x511   :  { %2303 = vlog2.f32 %v1654_v13 }
 0x516   :  { %v2298_v15 = vpop.eup %2297 }
 0x517   :  { %v2300_v16 = vpop.eup %2299  ;;  %v1680_v19 = vmul.f32 0.6931472, %v2298_v15 }
 0x518   :  { %v1682_v20 = vmul.f32 0.6931472, %v2300_v16  ;;  %v2302_v22 = vpop.eup %2301 }
 0x519   :  { %v1711_v52 = vsub.f32 %v3064_v12, %v1680_v19  ;;  %v1684_v25 = vmul.f32 0.6931472, %v2302_v22 }
 0x51a   :  { %v1658_v27 = vpop.xlane.xlu1 %1657  ;;  %v1712_v28 = vsub.f32 %v3070_v49, %v1682_v20 }
 0x51b   :  { %1727 = vxpose.xlu0.b32.start [1/16] (narrow) %v1711_v52, 16  ;;  %v2304_v33 = vpop.eup %2303  ;;  %2305 = vlog2.f32 %v1658_v27  ;;  %v1713_v26 = vsub.f32 %v3062_v10, %v1684_v25 }
 0x51c   :  { %v1660_v23 = vpop.xlane.xlu0 %1659  ;;  %v1686_v6 = vmul.f32 0.6931472, %v2304_v33 }
 0x51e   :  { %v1714_v32 = vsub.f32 %v3068_v18, %v1686_v6  ;;  %v1662_v12 = vpop.xlane.xlu1 %1661 }
 0x51f   :  { %1728 = vxpose.xlu0.b32.cont [2/16] (narrow) %v1712_v28, 16 }
 0x520   :  { %v1656_v3 = vpop.xlane.xlu0 %1655 }
 0x521   :  { %2307 = vlog2.f32 %v1656_v3 }
 0x522   :  { %2309 = vlog2.f32 %v1660_v23 }
 0x523   :  { %1729 = vxpose.xlu0.b32.cont [3/16] (narrow) %v1713_v26, 16  ;;  %2311 = vlog2.f32 %v1662_v12 }
 0x525   :  { %v2306_v36 = vpop.eup %2305 }
 0x526   :  { %v1690_v41 = vmul.f32 0.6931472, %v2306_v36 }
 0x527   :  { %1730 = vxpose.xlu0.b32.cont [4/16] (narrow) %v1714_v32, 16 }
 0x528   :  { %v1716_v14 = vsub.f32 %v3074_v62, %v1690_v41 }
 0x52a   :  { %v1666_v49 = vpop.xlane.xlu1 %1665 }
 0x52b   :  { %v2308_v37 = vpop.eup %2307  ;;  %2313 = vlog2.f32 %v1666_v49 }
 0x52c   :  { %v1688_v38 = vmul.f32 0.6931472, %v2308_v37  ;;  %v1668_v39 = vpop.xlane.xlu0 %1667  ;;  %v2310_v46 = vpop.eup %2309 }
 0x52d   :  { %v1692_v10 = vmul.f32 0.6931472, %v2310_v46  ;;  %v2312_v18 = vpop.eup %2311 }
 0x52e   :  { %v1715_v44 = vsub.f32 %v3076_v29, %v1688_v38  ;;  %v1694_v51 = vmul.f32 0.6931472, %v2312_v18  ;;  %v1670_v53 = vpop.xlane.xlu1 %1669 }
 0x52f   :  { %v1717_v43 = vsub.f32 %v3079_v1, %v1692_v10 }
 0x530   :  { %1731 = vxpose.xlu0.b32.cont [5/16] (narrow) %v1715_v44, 16  ;;  %v1664_v50 = vpop.xlane.xlu0 %1663  ;;  %v1718_v29 = vsub.f32 %v3082_v35, %v1694_v51 }
 0x531   :  { %2315 = vlog2.f32 %v1664_v50 }
 0x532   :  { %2317 = vlog2.f32 %v1668_v39 }
 0x533   :  { %2319 = vlog2.f32 %v1670_v53 }
 0x534   :  { %1732 = vxpose.xlu0.b32.cont [6/16] (narrow) %v1716_v14, 16 }
 0x535   :  { %v2314_v47 = vpop.eup %2313 }
 0x536   :  { %v1698_v30 = vmul.f32 0.6931472, %v2314_v47 }
 0x538   :  { %1733 = vxpose.xlu0.b32.cont [7/16] (narrow) %v1717_v43, 16  ;;  %v1720_v1 = vsub.f32 %v3087_v42, %v1698_v30 }
 0x53a   :  { %v1674_v56 = vpop.xlane.xlu1 %1673 }
 0x53b   :  { %v2316_v54 = vpop.eup %2315  ;;  %2321 = vlog2.f32 %v1674_v56 }
 0x53c   :  { %v1696_v55 = vmul.f32 0.6931472, %v2316_v54  ;;  %1734 = vxpose.xlu0.b32.cont [8/16] (narrow) %v1718_v29, 16  ;;  %v1676_v17 = vpop.xlane.xlu0 %1675  ;;  %v2318_v58 = vpop.eup %2317 }
 0x53d   :  { %v1700_v63 = vmul.f32 0.6931472, %v2318_v58  ;;  %v2320_v0 = vpop.eup %2319 }
 0x53e   :  { %v1719_v62 = vsub.f32 %v3090_v21, %v1696_v55  ;;  %v1702_v35 = vmul.f32 0.6931472, %v2320_v0  ;;  %v1678_v2 = vpop.xlane.xlu1 %1677 }
 0x53f   :  { %v1721_v5 = vsub.f32 %v3094_v24, %v1700_v63 }
 0x540   :  { %1735 = vxpose.xlu0.b32.cont [9/16] (narrow) %v1719_v62, 16  ;;  %v1672_v60 = vpop.xlane.xlu0 %1671  ;;  %v1722_v21 = vsub.f32 %v3098_v40, %v1702_v35 }
 0x541   :  { %2323 = vlog2.f32 %v1672_v60 }
 0x542   :  { %2325 = vlog2.f32 %v1676_v17 }
 0x543   :  { %2327 = vlog2.f32 %v1678_v2 }
 0x544   :  { %1736 = vxpose.xlu0.b32.cont [10/16] (narrow) %v1720_v1, 16 }
 0x545   :  { %v2322_v31 = vpop.eup %2321 }
 0x546   :  { %v1706_v8 = vmul.f32 0.6931472, %v2322_v31 }
 0x548   :  { %1737 = vxpose.xlu0.b32.cont [11/16] (narrow) %v1721_v5, 16  ;;  %v1724_v48 = vsub.f32 %v3103_v57, %v1706_v8 }
 0x54b   :  { %v2324_v34 = vpop.eup %2323 }
 0x54c   :  { %v1704_v7 = vmul.f32 0.6931472, %v2324_v34  ;;  %1738 = vxpose.xlu0.b32.cont [12/16] (narrow) %v1722_v21, 16  ;;  %v2326_v11 = vpop.eup %2325 }
 0x54d   :  { %v1708_v42 = vmul.f32 0.6931472, %v2326_v11  ;;  %v2328_v9 = vpop.eup %2327 }
 0x54e   :  { %v1723_v45 = vsub.f32 %v3106_v59, %v1704_v7  ;;  %v1710_v13 = vmul.f32 0.6931472, %v2328_v9 }
 0x54f   :  { %v1725_v24 = vsub.f32 %v3110_v61, %v1708_v42 }
 0x550   :  { %1739 = vxpose.xlu0.b32.cont [13/16] (narrow) %v1723_v45, 16  ;;  %v1726_v15 = vsub.f32 %v3114_v4, %v1710_v13 }
 0x554   :  { %1740 = vxpose.xlu0.b32.cont [14/16] (narrow) %v1724_v48, 16 }
 0x558   :  { %1741 = vxpose.xlu0.b32.cont [15/16] (narrow) %v1725_v24, 16 }
 0x55c   :  { %1742 = vxpose.xlu0.b32.end [16/16] (narrow) %v1726_v15, 16 }
 0x5a0   :  { %v1743_v40 = vpop.trf.xlu0 }
 0x5a1   :  { %1759 = vst [vmem:[#allocation2] sm:$0xff] %v1743_v40 }
 0x5a4   :  { %v1744_v59 = vpop.trf.xlu0 }
 0x5a5   :  { %1760 = vst [vmem:[#allocation2 + $0x8] sm:$0xff] %v1744_v59 }
 0x5a6   :  { %2340 = shalt.err (!%p2337_p4)
}
 0x5a7   :  { %s2341_s16 = scalar_lea.hbm %s3155_s9, 256 }
 0x5a8   :  { %p2342_p5 = scmp.ne.s32.totalorder %s3155_s9, %s2341_s16  ;;  %p2345_p6 = scmp.lt.u32.totalorder %s2341_s16, %s3155_s9 }
 0x5aa   :  { %p2347_p7 = pnand %p2345_p6, %p2342_p5 }
 0x5ac   :  { %2350 = shalt.err (!%p2347_p7)
}
 0x5ad   :  { %s2354_s2 = smov 128   ;;  %s2355_s19 = smov 8  }
 0x5ae   :  { %1772 = dma.vmem_to_hbm [thread:$0]  %s1767_s13, 256, %s3155_s9, [#allocation3], %s2354_s2, %s2354_s2, %s2355_s19  }
 0x5af   :  { %2351 = dma.done.wait [#allocation3], 256  }
 0x5b0   :  { %2352 = vsyncadd [#allocation3], 4294967040 }
 0x5b1   :  { %1776 = vsyncpa [#allocation3], 1 }

// kernel: tpu_custom_call.1
= control target key start
LH: loop header
LB: loop body
LE: loop exit
PB: predicated region body
PF: predicated region fallthrough
CT: control target
= control target key end

     0   :  { %vm601_vm0 = vcmask 130048   ;;  %s3146_s0 = inlined_call_operand.vmem [shape: f32[128,784], index: 0, kind: input, shape index: {}]   ;;  %s3147_s1 = inlined_call_operand.vmem [shape: bf16[784,64], index: 1, kind: input, shape index: {}]   ;;  %s3148_s2 = inlined_call_operand.vmem [shape: f32[1,64], index: 2, kind: input, shape index: {}]   ;;  %s3149_s3 = inlined_call_operand.vmem [shape: bf16[64,64], index: 3, kind: input, shape index: {}]   ;;  %s3150_s4 = inlined_call_operand.vmem [shape: f32[1,64], index: 4, kind: input, shape index: {}]   ;;  %s3151_s5 = inlined_call_operand.vmem [shape: bf16[64,64], index: 5, kind: input, shape index: {}]   ;;  %s3152_s6 = inlined_call_operand.vmem [shape: f32[1,64], index: 6, kind: input, shape index: {}]   ;;  %s3153_s7 = inlined_call_operand.vmem [shape: bf16[64,128], index: 7, kind: input, shape index: {}]   ;;  %s3154_s8 = inlined_call_operand.vmem [shape: f32[1,128], index: 8, kind: input, shape index: {}]   ;;  %s3155_s9 = inlined_call_operand.hbm [shape: f32[16,128], index: 9, kind: output, shape index: {}]  }
   0x1   :  { %v2204_v0 = vld [vmem:[%s3147_s1 + $0x40] sm:$0xff]   ;;  %v2208_v4 = vld [vmem:[%s3147_s1 + $0x48] sm:$0xff]   ;;  %v2212_v8 = vld [vmem:[%s3147_s1 + $0x50] sm:$0xff]  }
   0x2   :  { %v2205_v1 = vld [vmem:[%s3147_s1] sm:$0xff]   ;;  %1874 = vmatprep.subr.bf16.mxu0 %v2204_v0  ;;  %v2209_v5 = vld [vmem:[%s3147_s1 + $0x8] sm:$0xff]   ;;  %v2213_v9 = vld [vmem:[%s3147_s1 + $0x10] sm:$0xff]  }
   0x3   :  { %v2206_v2 = vld [vmem:[%s3147_s1 + $0xc0] sm:$0xff]   ;;  %1875 = vmatpush3.bf16.msra.mxu0 %v2205_v1  ;;  %v2210_v6 = vld [vmem:[%s3147_s1 + $0xc8] sm:$0xff]   ;;  %v2214_v10 = vld [vmem:[%s3147_s1 + $0xd0] sm:$0xff]  }
   0x4   :  { %v2207_v3 = vld [vmem:[%s3147_s1 + $0x80] sm:$0xff]   ;;  %1938 = vmatprep.subr.bf16.mxu1 %v2206_v2  ;;  %1876 = vmatprep.subr.bf16.mxu0 %v2208_v4  ;;  %v2211_v7 = vld [vmem:[%s3147_s1 + $0x88] sm:$0xff]   ;;  %v2215_v11 = vld [vmem:[%s3147_s1 + $0x90] sm:$0xff]  }
   0x5   :  { %1939 = vmatpush3.bf16.msra.mxu1 %v2207_v3  ;;  %v2216_v12 = vld [vmem:[%s3147_s1 + $0x58] sm:$0xff]   ;;  %v2220_v16 = vld [vmem:[%s3147_s1 + $0x60] sm:$0xff]   ;;  %v2224_v20 = vld [vmem:[%s3147_s1 + $0x68] sm:$0xff]  }
   0x6   :  { %1940 = vmatprep.subr.bf16.mxu1 %v2210_v6  ;;  %v2217_v13 = vld [vmem:[%s3147_s1 + $0x18] sm:$0xff]   ;;  %v2221_v17 = vld [vmem:[%s3147_s1 + $0x20] sm:$0xff]   ;;  %v2225_v21 = vld [vmem:[%s3147_s1 + $0x28] sm:$0xff]  }
   0x7   :  { %1877 = vmatpush3.bf16.msra.mxu0 %v2209_v5  ;;  %v2218_v14 = vld [vmem:[%s3147_s1 + $0xd8] sm:$0xff]   ;;  %v2222_v18 = vld [vmem:[%s3147_s1 + $0xe0] sm:$0xff]   ;;  %v2226_v22 = vld [vmem:[%s3147_s1 + $0xe8] sm:$0xff]  }
   0x8   :  { %1878 = vmatprep.subr.bf16.mxu0 %v2212_v8  ;;  %v2219_v15 = vld [vmem:[%s3147_s1 + $0x98] sm:$0xff]   ;;  %v2223_v19 = vld [vmem:[%s3147_s1 + $0xa0] sm:$0xff]   ;;  %v2227_v23 = vld [vmem:[%s3147_s1 + $0xa8] sm:$0xff]  }
   0x9   :  { %1941 = vmatpush3.bf16.msra.mxu1 %v2211_v7  ;;  %v2228_v24 = vld [vmem:[%s3147_s1 + $0x70] sm:$0xff]   ;;  %v2232_v28 = vld [vmem:[%s3147_s1 + $0x78] sm:$0xff]   ;;  %v35_v31 = vld [vmem:[%s3146_s0 + $0x8] sm:$0xff] }
   0xa   :  { %1942 = vmatprep.subr.bf16.mxu1 %v2214_v10  ;;  %v2229_v25 = vld [vmem:[%s3147_s1 + $0x30] sm:$0xff]   ;;  %v2233_v29 = vld [vmem:[%s3147_s1 + $0x38] sm:$0xff]   ;;  %v42_v32 = vld [vmem:[%s3146_s0 + $0x40] sm:$0xff] }
   0xb   :  { %1879 = vmatpush3.bf16.msra.mxu0 %v2213_v9  ;;  %v2230_v26 = vld [vmem:[%s3147_s1 + $0xf0] sm:$0xff]   ;;  %v2234_v30 = vld [vmem:[%s3147_s1 + $0xf8] sm:$0xff]   ;;  %v147_v33 = vpack.c.bf16 %v42_v32, %v35_v31  ;;  %v34_v35 = vld [vmem:[%s3146_s0] sm:$0xff] }
   0xc   :  { %1880 = vmatprep.subr.bf16.mxu0 %v2216_v12  ;;  %v2231_v27 = vld [vmem:[%s3147_s1 + $0xb0] sm:$0xff]   ;;  %v2235_v34 = vld [vmem:[%s3147_s1 + $0xb8] sm:$0xff]   ;;  %v2236_v38 = vld [vmem:[%s3147_s1 + $0x140] sm:$0xff]  }
   0xd   :  { %1943 = vmatpush3.bf16.msra.mxu1 %v2215_v11  ;;  %v41_v36 = vld [vmem:[%s3146_s0 + $0x38] sm:$0xff]  ;;  %658 = vmatprep.mubr.bf16.mxu0 %v147_v33  ;;  %v44_v40 = vld [vmem:[%s3146_s0 + $0x50] sm:$0xff]  ;;  %v2237_v42 = vld [vmem:[%s3147_s1 + $0x100] sm:$0xff]  }
   0xe   :  { %1944 = vmatprep.subr.bf16.mxu1 %v2218_v14  ;;  %v146_v37 = vpack.c.bf16 %v41_v36, %v34_v35  ;;  %v37_v39 = vld [vmem:[%s3146_s0 + $0x18] sm:$0xff]  ;;  %v36_v43 = vld [vmem:[%s3146_s0 + $0x10] sm:$0xff]  ;;  %v43_v44 = vld [vmem:[%s3146_s0 + $0x48] sm:$0xff] }
   0xf   :  { %1881 = vmatpush3.bf16.msra.mxu0 %v2217_v13  ;;  %v149_v41 = vpack.c.bf16 %v44_v40, %v37_v39  ;;  %v49_v45 = vld [vmem:[%s3146_s0 + $0x78] sm:$0xff]  ;;  %v148_v46 = vpack.c.bf16 %v43_v44, %v36_v43  ;;  %v56_v47 = vld [vmem:[%s3146_s0 + $0xb0] sm:$0xff]  ;;  %v55_v49 = vld [vmem:[%s3146_s0 + $0xa8] sm:$0xff] }
  0x10   :  { %1882 = vmatprep.subr.bf16.mxu0 %v2220_v16  ;;  %v48_v48 = vld [vmem:[%s3146_s0 + $0x70] sm:$0xff]  ;;  %v154_v50 = vpack.c.bf16 %v56_v47, %v49_v45  ;;  %v2238_v51 = vld [vmem:[%s3147_s1 + $0x148] sm:$0xff]   ;;  %v58_v53 = vld [vmem:[%s3146_s0 + $0xc0] sm:$0xff] }
  0x11   :  { %1945 = vmatpush3.bf16.msra.mxu1 %v2219_v15  ;;  %755 = vmatprep.mubr.bf16.mxu1 %v149_v41  ;;  %v51_v52 = vld [vmem:[%s3146_s0 + $0x88] sm:$0xff]  ;;  %v153_v54 = vpack.c.bf16 %v55_v49, %v48_v48  ;;  %v50_v57 = vld [vmem:[%s3146_s0 + $0x80] sm:$0xff]  ;;  %v57_v58 = vld [vmem:[%s3146_s0 + $0xb8] sm:$0xff] }
  0x12   :  { %1946 = vmatprep.subr.bf16.mxu1 %v2222_v18  ;;  %v156_v55 = vpack.c.bf16 %v58_v53, %v51_v52  ;;  %v2239_v56 = vld [vmem:[%s3147_s1 + $0x108] sm:$0xff]   ;;  %v70_v60 = vld [vmem:[%s3146_s0 + $0x120] sm:$0xff]  ;;  %v155_v62 = vpack.c.bf16 %v57_v58, %v50_v57  ;;  %v69_v0 = vld [vmem:[%s3146_s0 + $0x118] sm:$0xff] }
  0x13   :  { %1883 = vmatpush3.bf16.msra.mxu0 %v2221_v17  ;;  %v63_v59 = vld [vmem:[%s3146_s0 + $0xe8] sm:$0xff]  ;;  %v62_v63 = vld [vmem:[%s3146_s0 + $0xe0] sm:$0xff]  ;;  %v2240_v1 = vld [vmem:[%s3147_s1 + $0x150] sm:$0xff]  }
  0x14   :  { %1884 = vmatprep.subr.bf16.mxu0 %v2224_v20  ;;  %v161_v61 = vpack.c.bf16 %v70_v60, %v63_v59  ;;  %v2241_v2 = vld [vmem:[%s3147_s1 + $0x180] sm:$0xff]   ;;  %v65_v3 = vld [vmem:[%s3146_s0 + $0xf8] sm:$0xff]  ;;  %v72_v4 = vld [vmem:[%s3146_s0 + $0x130] sm:$0xff]  ;;  %v160_v10 = vpack.c.bf16 %v69_v0, %v62_v63 }
  0x15   :  { %1947 = vmatpush3.bf16.msra.mxu1 %v2223_v19  ;;  %v163_v5 = vpack.c.bf16 %v72_v4, %v65_v3  ;;  %v2242_v6 = vld [vmem:[%s3147_s1 + $0x110] sm:$0xff]   ;;  %v77_v8 = vld [vmem:[%s3146_s0 + $0x158] sm:$0xff]  ;;  %v71_v11 = vld [vmem:[%s3146_s0 + $0x128] sm:$0xff] }
  0x16   :  { %1948 = vmatprep.subr.bf16.mxu1 %v2226_v22  ;;  %v64_v7 = vld [vmem:[%s3146_s0 + $0xf0] sm:$0xff]  ;;  %v2243_v13 = vld [vmem:[%s3147_s1 + $0x158] sm:$0xff]   ;;  %v79_v14 = vld [vmem:[%s3146_s0 + $0x168] sm:$0xff] }
  0x17   :  { %1885 = vmatpush3.bf16.msra.mxu0 %v2225_v21  ;;  %v84_v9 = vld [vmem:[%s3146_s0 + $0x190] sm:$0xff]  ;;  %v86_v15 = vld [vmem:[%s3146_s0 + $0x1a0] sm:$0xff]  ;;  %v2244_v16 = vld [vmem:[%s3147_s1 + $0x118] sm:$0xff]   ;;  %v162_v17 = vpack.c.bf16 %v71_v11, %v64_v7 }
  0x18   :  { %1886 = vmatprep.subr.bf16.mxu0 %v2228_v24  ;;  %v168_v12 = vpack.c.bf16 %v84_v9, %v77_v8  ;;  %v76_v18 = vld [vmem:[%s3146_s0 + $0x150] sm:$0xff]  ;;  %v83_v19 = vld [vmem:[%s3146_s0 + $0x188] sm:$0xff]  ;;  %v170_v20 = vpack.c.bf16 %v86_v15, %v79_v14  ;;  %v2245_v21 = vld [vmem:[%s3147_s1 + $0x160] sm:$0xff]  }
  0x19   :  { %1949 = vmatpush3.bf16.msra.mxu1 %v2227_v23  ;;  %v91_v22 = vld [vmem:[%s3146_s0 + $0x1c8] sm:$0xff]  ;;  %v98_v23 = vld [vmem:[%s3146_s0 + $0x200] sm:$0xff]  ;;  %v97_v36 = vld [vmem:[%s3146_s0 + $0x1f8] sm:$0xff] }
  0x1a   :  { %1950 = vmatprep.subr.bf16.mxu1 %v2230_v26  ;;  %v2246_v24 = vld [vmem:[%s3147_s1 + $0x120] sm:$0xff]   ;;  %v2247_v31 = vld [vmem:[%s3147_s1 + $0x168] sm:$0xff]   ;;  %v92_v39 = vld [vmem:[%s3146_s0 + $0x1d0] sm:$0xff] }
  0x1b   :  { %1887 = vmatpush3.bf16.msra.mxu0 %v2229_v25  ;;  %v167_v25 = vpack.c.bf16 %v83_v19, %v76_v18  ;;  %v78_v26 = vld [vmem:[%s3146_s0 + $0x160] sm:$0xff]  ;;  %v99_v40 = vld [vmem:[%s3146_s0 + $0x208] sm:$0xff]  ;;  %v2249_v41 = vld [vmem:[%s3147_s1 + $0x170] sm:$0xff]  }
  0x1c   :  { %1888 = vmatprep.subr.bf16.mxu0 %v2232_v28  ;;  %v175_v28 = vpack.c.bf16 %v98_v23, %v91_v22  ;;  %v90_v35 = vld [vmem:[%s3146_s0 + $0x1c0] sm:$0xff]  ;;  %v2250_v43 = vld [vmem:[%s3147_s1 + $0x130] sm:$0xff]   ;;  %v107_v45 = vld [vmem:[%s3146_s0 + $0x248] sm:$0xff]  ;;  %v176_v47 = vpack.c.bf16 %v99_v40, %v92_v39 }
  0x1d   :  { %1951 = vmatpush3.bf16.msra.mxu1 %v2231_v27  ;;  %v85_v27 = vld [vmem:[%s3146_s0 + $0x198] sm:$0xff]  ;;  %v104_v49 = vld [vmem:[%s3146_s0 + $0x230] sm:$0xff]  ;;  %v119_v53 = vld [vmem:[%s3146_s0 + $0x2a8] sm:$0xff] }
  0x1e   :  { %1952 = vmatprep.subr.bf16.mxu1 %v2234_v30  ;;  %v100_v30 = vld [vmem:[%s3146_s0 + $0x210] sm:$0xff]  ;;  %v169_v32 = vpack.c.bf16 %v85_v27, %v78_v26  ;;  %v2251_v48 = vld [vmem:[%s3147_s1 + $0x178] sm:$0xff]   ;;  %v118_v63 = vld [vmem:[%s3146_s0 + $0x2a0] sm:$0xff] }
  0x1f   :  { %1889 = vmatpush3.bf16.msra.mxu0 %v2233_v29  ;;  %v93_v29 = vld [vmem:[%s3146_s0 + $0x1d8] sm:$0xff]  ;;  %v128_v60 = vld [vmem:[%s3146_s0 + $0x2f0] sm:$0xff]  ;;  %v135_v7 = vld [vmem:[%s3146_s0 + $0x328] sm:$0xff] }
  0x20   :  { %2002 = vmatprep.subr.bf16.mxu0 %v2236_v38  ;;  %v177_v33 = vpack.c.bf16 %v100_v30, %v93_v29  ;;  %v112_v38 = vld [vmem:[%s3146_s0 + $0x270] sm:$0xff]  ;;  %v2252_v52 = vld [vmem:[%s3147_s1 + $0x138] sm:$0xff]   ;;  %v142_v8 = vld [vmem:[%s3146_s0 + $0x360] sm:$0xff] }
  0x21   :  { %1953 = vmatpush3.bf16.msra.mxu1 %v2235_v34  ;;  %v2248_v34 = vld [vmem:[%s3147_s1 + $0x128] sm:$0xff]   ;;  %v113_v57 = vld [vmem:[%s3146_s0 + $0x278] sm:$0xff]  ;;  %v120_v4 = vld [vmem:[%s3146_s0 + $0x2b0] sm:$0xff] }
  0x22   :  { %659 = vmatmul.mubr.bf16.vlgmr.msra.gmra.mrb[0].mxu0 %v146_v37  ;;  %2111 = vmatprep.subr.bf16.mxu1 %v2241_v2  ;;  %v105_v37 = vld [vmem:[%s3146_s0 + $0x238] sm:$0xff]  ;;  %v132_v11 = vld [vmem:[%s3146_s0 + $0x310] sm:$0xff]  ;;  %v134_v14 = vld [vmem:[%s3146_s0 + $0x320] sm:$0xff] }
  0x23   :  { %2003 = vmatpush3.bf16.msra.mxu0 %v2237_v42  ;;  %666 = vmatprep.mubr.bf16.mxu0 %v154_v50  ;;  %v174_v42 = vpack.c.bf16 %v97_v36, %v90_v35  ;;  %v182_v44 = vpack.c.bf16 %v112_v38, %v105_v37  ;;  %v121_v59 = vld [vmem:[%s3146_s0 + $0x2b8] sm:$0xff]  ;;  %v47_v18 = vld [vmem:[%s3146_s0 + $0x68] sm:$0xff]  ;;  %v38_v22 = vld [vmem:[%s3146_s0 + $0x20] sm:$0xff] }
  0x24   :  { %756 = vmatmul.mubr.bf16.vlgmr.msra.gmra.mrb[0].mxu1 %v148_v46  ;;  %2004 = vmatprep.subr.bf16.mxu0 %v2238_v51  ;;  %v114_v46 = vld [vmem:[%s3146_s0 + $0x280] sm:$0xff]  ;;  %v111_v51 = vld [vmem:[%s3146_s0 + $0x268] sm:$0xff]  ;;  %v125_v0 = vld [vmem:[%s3146_s0 + $0x2d8] sm:$0xff] }
  0x25   :  { %763 = vmatprep.mubr.bf16.mxu1 %v156_v55  ;;  %2112 = vmatpush3.bf16.msra.mxu1 %v2241_v2  ;;  %v184_v50 = vpack.c.bf16 %v114_v46, %v107_v45  ;;  %v181_v55 = vpack.c.bf16 %v111_v51, %v104_v49  ;;  %v140_v2 = vld [vmem:[%s3146_s0 + $0x350] sm:$0xff]  ;;  %v188_v3 = vpack.c.bf16 %v125_v0, %v118_v63  ;;  %v141_v15 = vld [vmem:[%s3146_s0 + $0x358] sm:$0xff] }
  0x26   :  { %v45_v23 = vld [vmem:[%s3146_s0 + $0x58] sm:$0xff]  ;;  %v60_v26 = vld [vmem:[%s3146_s0 + $0xd0] sm:$0xff] }
  0x27   :  { %2005 = vmatpush3.bf16.msra.mxu0 %v2239_v56  ;;  %v106_v56 = vld [vmem:[%s3146_s0 + $0x240] sm:$0xff] }
  0x28   :  { %2006 = vmatprep.subr.bf16.mxu0 %v2240_v1  ;;  %v133_v1 = vld [vmem:[%s3146_s0 + $0x318] sm:$0xff] }
  0x2a   :  { %667 = vmatmul.mubr.bf16.gmra.mrb[4].mxu0 %v153_v54  ;;  %v126_v54 = vld [vmem:[%s3146_s0 + $0x2e0] sm:$0xff] }
  0x2b   :  { %674 = vmatprep.mubr.bf16.mxu0 %v161_v61  ;;  %2007 = vmatpush3.bf16.msra.mxu0 %v2242_v6  ;;  %v189_v58 = vpack.c.bf16 %v126_v54, %v119_v53  ;;  %v183_v61 = vpack.c.bf16 %v113_v57, %v106_v56  ;;  %v196_v6 = vpack.c.bf16 %v140_v2, %v133_v1 }
  0x2c   :  { %764 = vmatmul.mubr.bf16.gmra.mrb[4].mxu1 %v155_v62  ;;  %2008 = vmatprep.subr.bf16.mxu0 %v2243_v13  ;;  %v191_v62 = vpack.c.bf16 %v128_v60, %v121_v59  ;;  %v39_v13 = vld [vmem:[%s3146_s0 + $0x28] sm:$0xff] }
  0x2d   :  { %771 = vmatprep.mubr.bf16.mxu1 %v163_v5  ;;  %v127_v5 = vld [vmem:[%s3146_s0 + $0x2e8] sm:$0xff] }
  0x2e   :  { %v190_v9 = vpack.c.bf16 %v127_v5, %v120_v4 }
  0x2f   :  { %2009 = vmatpush3.bf16.msra.mxu0 %v2244_v16  ;;  %v46_v16 = vld [vmem:[%s3146_s0 + $0x60] sm:$0xff] }
  0x30   :  { %2010 = vmatprep.subr.bf16.mxu0 %v2245_v21  ;;  %v197_v21 = vpack.c.bf16 %v141_v15, %v134_v14 }
  0x32   :  { %675 = vmatmul.mubr.bf16.gmra.mrb[8].mxu0 %v160_v10  ;;  %v198_v10 = vpack.c.bf16 %v142_v8, %v135_v7 }
  0x33   :  { %682 = vmatprep.mubr.bf16.mxu0 %v168_v12  ;;  %2011 = vmatpush3.bf16.msra.mxu0 %v2246_v24  ;;  %v139_v12 = vld [vmem:[%s3146_s0 + $0x348] sm:$0xff] }
  0x34   :  { %772 = vmatmul.mubr.bf16.gmra.mrb[8].mxu1 %v162_v17  ;;  %2012 = vmatprep.subr.bf16.mxu0 %v2247_v31  ;;  %v40_v17 = vld [vmem:[%s3146_s0 + $0x30] sm:$0xff]  ;;  %v195_v19 = vpack.c.bf16 %v139_v12, %v132_v11 }
  0x35   :  { %779 = vmatprep.mubr.bf16.mxu1 %v170_v20  ;;  %v151_v20 = vpack.c.bf16 %v46_v16, %v39_v13  ;;  %v152_v24 = vpack.c.bf16 %v47_v18, %v40_v17 }
  0x37   :  { %2013 = vmatpush3.bf16.msra.mxu0 %v2248_v34 }
  0x38   :  { %2014 = vmatprep.subr.bf16.mxu0 %v2249_v41 }
  0x3a   :  { %683 = vmatmul.mubr.bf16.gmra.mrb[12].mxu0 %v167_v25  ;;  %v53_v25 = vld [vmem:[%s3146_s0 + $0x98] sm:$0xff] }
  0x3b   :  { %690 = vmatprep.mubr.bf16.mxu0 %v175_v28  ;;  %2015 = vmatpush3.bf16.msra.mxu0 %v2250_v43 }
  0x3c   :  { %780 = vmatmul.mubr.bf16.gmra.mrb[12].mxu1 %v169_v32  ;;  %2016 = vmatprep.subr.bf16.mxu0 %v2251_v48 }
  0x3d   :  { %787 = vmatprep.mubr.bf16.mxu1 %v177_v33 }
  0x3f   :  { %2017 = vmatpush3.bf16.msra.mxu0 %v2252_v52 }
  0x42   :  { %691 = vmatmul.mubr.bf16.gmra.mrb[16].mxu0 %v174_v42 }
  0x43   :  { %698 = vmatprep.mubr.bf16.mxu0 %v182_v44 }
  0x44   :  { %788 = vmatmul.mubr.bf16.gmra.mrb[16].mxu1 %v176_v47 }
  0x45   :  { %795 = vmatprep.mubr.bf16.mxu1 %v184_v50 }
  0x4a   :  { %699 = vmatmul.mubr.bf16.gmra.mrb[20].mxu0 %v181_v55 }
  0x4b   :  { %706 = vmatprep.mubr.bf16.mxu0 %v189_v58 }
  0x4c   :  { %796 = vmatmul.mubr.bf16.gmra.mrb[20].mxu1 %v183_v61 }
  0x4d   :  { %803 = vmatprep.mubr.bf16.mxu1 %v191_v62 }
  0x52   :  { %707 = vmatmul.mubr.bf16.gmra.mrb[24].mxu0 %v188_v3 }
  0x53   :  { %714 = vmatprep.mubr.bf16.mxu0 %v196_v6 }
  0x54   :  { %804 = vmatmul.mubr.bf16.gmra.mrb[24].mxu1 %v190_v9 }
  0x55   :  { %811 = vmatprep.mubr.bf16.mxu1 %v198_v10 }
  0x5a   :  { %715 = vmatmul.mubr.bf16.gmra.mrb[28].mxu0 %v195_v19 }
  0x5b   :  { %852 = vmatprep.mubr.bf16.mxu0 %v151_v20 }
  0x5c   :  { %14 = vsyncpa [#allocation3], 0  ;;  %812 = vmatmul.mubr.bf16.gmra.mrb[28].mxu1 %v197_v21  ;;  %v150_v27 = vpack.c.bf16 %v45_v23, %v38_v22  ;;  %v54_v28 = vld [vmem:[%s3146_s0 + $0xa0] sm:$0xff]  ;;  %v61_v29 = vld [vmem:[%s3146_s0 + $0xd8] sm:$0xff]  ;;  %v158_v30 = vpack.c.bf16 %v60_v26, %v53_v25  ;;  %vm1077_vm1 = vcmask 523264  }
  0x5d   :  { %2113 = vmatprep.mubr.msk.bf16.mxu1 %vm601_vm0, %v152_v24  ;;  %v68_v31 = vld [vmem:[%s3146_s0 + $0x110] sm:$0xff]  ;;  %v75_v32 = vld [vmem:[%s3146_s0 + $0x148] sm:$0xff]  ;;  %v159_v33 = vpack.c.bf16 %v61_v29, %v54_v28  ;;  %v74_v38 = vld [vmem:[%s3146_s0 + $0x140] sm:$0xff] }
  0x5e   :  { %v166_v34 = vpack.c.bf16 %v75_v32, %v68_v31  ;;  %v52_v35 = vld [vmem:[%s3146_s0 + $0x90] sm:$0xff]  ;;  %v59_v36 = vld [vmem:[%s3146_s0 + $0xc8] sm:$0xff]  ;;  %v82_v40 = vld [vmem:[%s3146_s0 + $0x180] sm:$0xff] }
  0x5f   :  { %v67_v37 = vld [vmem:[%s3146_s0 + $0x108] sm:$0xff]  ;;  %v157_v39 = vpack.c.bf16 %v59_v36, %v52_v35  ;;  %v89_v41 = vld [vmem:[%s3146_s0 + $0x1b8] sm:$0xff]  ;;  %v96_v43 = vld [vmem:[%s3146_s0 + $0x1f0] sm:$0xff] }
  0x60   :  { %v165_v42 = vpack.c.bf16 %v74_v38, %v67_v37  ;;  %v103_v44 = vld [vmem:[%s3146_s0 + $0x228] sm:$0xff]  ;;  %v173_v45 = vpack.c.bf16 %v89_v41, %v82_v40  ;;  %v66_v47 = vld [vmem:[%s3146_s0 + $0x100] sm:$0xff]  ;;  %v73_v48 = vld [vmem:[%s3146_s0 + $0x138] sm:$0xff] }
  0x61   :  { %v180_v46 = vpack.c.bf16 %v103_v44, %v96_v43  ;;  %v81_v49 = vld [vmem:[%s3146_s0 + $0x178] sm:$0xff]  ;;  %v88_v50 = vld [vmem:[%s3146_s0 + $0x1b0] sm:$0xff]  ;;  %v164_v51 = vpack.c.bf16 %v73_v48, %v66_v47  ;;  %v110_v52 = vld [vmem:[%s3146_s0 + $0x260] sm:$0xff] }
  0x62   :  { %853 = vmatmul.mubr.bf16.vlgmr.msra.gmra.mrb[32].mxu0 %v150_v27  ;;  %v117_v53 = vld [vmem:[%s3146_s0 + $0x298] sm:$0xff]  ;;  %v172_v54 = vpack.c.bf16 %v88_v50, %v81_v49  ;;  %v124_v55 = vld [vmem:[%s3146_s0 + $0x2d0] sm:$0xff]  ;;  %v131_v56 = vld [vmem:[%s3146_s0 + $0x308] sm:$0xff] }
  0x63   :  { %860 = vmatprep.mubr.bf16.mxu0 %v158_v30  ;;  %v187_v57 = vpack.c.bf16 %v117_v53, %v110_v52  ;;  %v194_v58 = vpack.c.bf16 %v131_v56, %v124_v55  ;;  %v80_v59 = vld [vmem:[%s3146_s0 + $0x170] sm:$0xff]  ;;  %v87_v60 = vld [vmem:[%s3146_s0 + $0x1a8] sm:$0xff]  ;;  %v102_v62 = vld [vmem:[%s3146_s0 + $0x220] sm:$0xff] }
  0x64   :  { %2114 = vmatmul.mubr.msk.bf16.vlgmr.msra.gmra.mrb[32].mxu1 %vm601_vm0, %v159_v33  ;;  %v95_v61 = vld [vmem:[%s3146_s0 + $0x1e8] sm:$0xff]  ;;  %v171_v63 = vpack.c.bf16 %v87_v60, %v80_v59  ;;  %v138_v0 = vld [vmem:[%s3146_s0 + $0x340] sm:$0xff]  ;;  %v145_v1 = vld [vmem:[%s3146_s0 + $0x378] sm:$0xff] }
  0x65   :  { %2117 = vmatprep.mubr.msk.bf16.mxu1 %vm601_vm0, %v166_v34  ;;  %v179_v2 = vpack.c.bf16 %v102_v62, %v95_v61  ;;  %v201_v3 = vpack.c.bf16 %v145_v1, %v138_v0  ;;  %v94_v4 = vld [vmem:[%s3146_s0 + $0x1e0] sm:$0xff]  ;;  %v101_v5 = vld [vmem:[%s3146_s0 + $0x218] sm:$0xff]  ;;  %v116_v7 = vld [vmem:[%s3146_s0 + $0x290] sm:$0xff] }
  0x66   :  { %v109_v6 = vld [vmem:[%s3146_s0 + $0x258] sm:$0xff]  ;;  %v178_v8 = vpack.c.bf16 %v101_v5, %v94_v4  ;;  %v108_v10 = vld [vmem:[%s3146_s0 + $0x250] sm:$0xff]  ;;  %v115_v11 = vld [vmem:[%s3146_s0 + $0x288] sm:$0xff] }
  0x67   :  { %v186_v9 = vpack.c.bf16 %v116_v7, %v109_v6  ;;  %v123_v12 = vld [vmem:[%s3146_s0 + $0x2c8] sm:$0xff]  ;;  %v130_v13 = vld [vmem:[%s3146_s0 + $0x300] sm:$0xff]  ;;  %v185_v14 = vpack.c.bf16 %v115_v11, %v108_v10  ;;  %v129_v17 = vld [vmem:[%s3146_s0 + $0x2f8] sm:$0xff] }
  0x68   :  { %v193_v15 = vpack.c.bf16 %v130_v13, %v123_v12  ;;  %v122_v16 = vld [vmem:[%s3146_s0 + $0x2c0] sm:$0xff]  ;;  %v137_v18 = vld [vmem:[%s3146_s0 + $0x338] sm:$0xff]  ;;  %v144_v19 = vld [vmem:[%s3146_s0 + $0x370] sm:$0xff] }
  0x69   :  { %v192_v20 = vpack.c.bf16 %v129_v17, %v122_v16  ;;  %v200_v21 = vpack.c.bf16 %v144_v19, %v137_v18  ;;  %v136_v22 = vld [vmem:[%s3146_s0 + $0x330] sm:$0xff]  ;;  %v143_v23 = vld [vmem:[%s3146_s0 + $0x368] sm:$0xff]  ;;  %v2253_v25 = vld [vmem:[%s3149_s3] sm:$0xff]  }
  0x6a   :  { %861 = vmatmul.mubr.bf16.gmra.mrb[36].mxu0 %v157_v39  ;;  %v199_v24 = vpack.c.bf16 %v143_v23, %v136_v22  ;;  %2129 = vmatprep.subr.bf16.mxu1 %v2253_v25  ;;  %v2254_v26 = vld [vmem:[%s3149_s3 + $0x8] sm:$0xff]   ;;  %v2255_v27 = vld [vmem:[%s3149_s3 + $0x10] sm:$0xff]   ;;  %v2256_v28 = vld [vmem:[%s3149_s3 + $0x18] sm:$0xff]  }
  0x6b   :  { %868 = vmatprep.mubr.bf16.mxu0 %v165_v42  ;;  %2130 = vmatpush3.bf16.msra.mxu1 %v2253_v25  ;;  %v2912_v30 = vld [vmem:[%s3148_s2] ss:$0 sm:$0xff]  ;;  %v2258_v44 = vld [vmem:[%s3151_s5 + $0x8] sm:$0xff]   ;;  %v2259_v52 = vld [vmem:[%s3151_s5 + $0x10] sm:$0xff]  }
  0x6c   :  { %2118 = vmatmul.mubr.msk.bf16.gmra.mrb[36].mxu1 %vm601_vm0, %v173_v45  ;;  %2131 = vmatprep.subr.bf16.mxu1 %v2254_v26  ;;  %v2257_v43 = vld [vmem:[%s3151_s5] sm:$0xff]  }
  0x6d   :  { %2121 = vmatprep.mubr.msk.bf16.mxu1 %vm601_vm0, %v180_v46  ;;  %2153 = vmatprep.subr.bf16.mxu0 %v2257_v43 }
  0x6e   :  { %2154 = vmatpush3.bf16.msra.mxu0 %v2257_v43 }
  0x6f   :  { %2132 = vmatpush3.bf16.msra.mxu1 %v2254_v26  ;;  %2155 = vmatprep.subr.bf16.mxu0 %v2258_v44 }
  0x70   :  { %2133 = vmatprep.subr.bf16.mxu1 %v2255_v27 }
  0x72   :  { %869 = vmatmul.mubr.bf16.gmra.mrb[40].mxu0 %v164_v51 }
  0x73   :  { %876 = vmatprep.mubr.bf16.mxu0 %v172_v54  ;;  %2134 = vmatpush3.bf16.msra.mxu1 %v2255_v27 }
  0x74   :  { %2122 = vmatmul.mubr.msk.bf16.gmra.mrb[40].mxu1 %vm601_vm0, %v187_v57  ;;  %2135 = vmatprep.subr.bf16.mxu1 %v2256_v28 }
  0x75   :  { %2125 = vmatprep.mubr.msk.bf16.mxu1 %vm601_vm0, %v194_v58  ;;  %2156 = vmatpush3.bf16.msra.mxu0 %v2258_v44 }
  0x76   :  { %2157 = vmatprep.subr.bf16.mxu0 %v2259_v52 }
  0x77   :  { %2136 = vmatpush3.bf16.msra.mxu1 %v2256_v28 }
  0x79   :  { %2158 = vmatpush3.bf16.msra.mxu0 %v2259_v52 }
  0x7a   :  { %877 = vmatmul.mubr.bf16.gmra.mrb[44].mxu0 %v171_v63 }
  0x7b   :  { %884 = vmatprep.mubr.bf16.mxu0 %v179_v2 }
  0x7c   :  { %2126 = vmatmul.mubr.msk.bf16.gmra.mrb[44].mxu1 %vm601_vm0, %v201_v3 }
  0x82   :  { %885 = vmatmul.mubr.bf16.gmra.mrb[48].mxu0 %v178_v8 }
  0x83   :  { %892 = vmatprep.mubr.bf16.mxu0 %v186_v9 }
  0x8a   :  { %893 = vmatmul.mubr.bf16.gmra.mrb[52].mxu0 %v185_v14 }
  0x8b   :  { %900 = vmatprep.mubr.bf16.mxu0 %v193_v15 }
  0x92   :  { %901 = vmatmul.mubr.bf16.gmra.mrb[56].mxu0 %v192_v20 }
  0x93   :  { %908 = vmatprep.mubr.bf16.mxu0 %v200_v21 }
  0x9a   :  { %909 = vmatmul.mubr.bf16.gmra.mrb[60].mxu0 %v199_v24 }
  0xf5   :  { %v1890_v29 = vpop.f32.mrb[0].mxu0 }
  0xf6   :  { %v1891_v31 = vpop.f32.mrb[1].mxu0 }
  0xf7   :  { %v1892_v32 = vadd.f32 %v1891_v31, %v1890_v29  ;;  %v1893_v33 = vpop.f32.mrb[2].mxu0  ;;  %v1954_v34 = vpop.f32.mrb[0].mxu1 }
  0xf8   :  { %v1894_v35 = vpop.f32.mrb[3].mxu0  ;;  %v1955_v38 = vpop.f32.mrb[1].mxu1 }
  0xf9   :  { %v661_v36 = vadd.f32 %v1892_v32, %v2912_v30  ;;  %v1895_v37 = vadd.f32 %v1894_v35, %v1893_v33  ;;  %v1956_v39 = vadd.f32 %v1955_v38, %v1954_v34  ;;  %v1957_v40 = vpop.f32.mrb[2].mxu1 }
  0xfa   :  { %v1958_v42 = vpop.f32.mrb[3].mxu1 }
  0xfb   :  { %v664_v41 = vadd.f32 %v1895_v37, %v2912_v30  ;;  %v2922_v45 = vadd.f32 %v1956_v39, %v661_v36  ;;  %v1959_v46 = vadd.f32 %v1958_v42, %v1957_v40 }
  0xfd   :  { %v1896_v47 = vpop.f32.mrb[4].mxu0  ;;  %v2924_v48 = vadd.f32 %v1959_v46, %v664_v41 }
  0xfe   :  { %v1897_v49 = vpop.f32.mrb[5].mxu0 }
  0xff   :  { %v1898_v50 = vadd.f32 %v1897_v49, %v1896_v47  ;;  %v1899_v51 = vpop.f32.mrb[6].mxu0  ;;  %v1960_v53 = vpop.f32.mrb[4].mxu1 }
 0x100   :  { %v1900_v54 = vpop.f32.mrb[7].mxu0  ;;  %v1961_v57 = vpop.f32.mrb[5].mxu1 }
 0x101   :  { %v669_v55 = vadd.f32 %v1898_v50, %v2912_v30  ;;  %v1901_v56 = vadd.f32 %v1900_v54, %v1899_v51  ;;  %v1962_v58 = vadd.f32 %v1961_v57, %v1960_v53  ;;  %v1963_v59 = vpop.f32.mrb[6].mxu1 }
 0x102   :  { %v1964_v61 = vpop.f32.mrb[7].mxu1 }
 0x103   :  { %v672_v60 = vadd.f32 %v1901_v56, %v2912_v30  ;;  %v2931_v62 = vadd.f32 %v1962_v58, %v669_v55  ;;  %v1965_v63 = vadd.f32 %v1964_v61, %v1963_v59 }
 0x105   :  { %v1902_v0 = vpop.f32.mrb[8].mxu0  ;;  %v2933_v1 = vadd.f32 %v1965_v63, %v672_v60 }
 0x106   :  { %v1903_v2 = vpop.f32.mrb[9].mxu0 }
 0x107   :  { %v1904_v3 = vadd.f32 %v1903_v2, %v1902_v0  ;;  %v1905_v4 = vpop.f32.mrb[10].mxu0  ;;  %v1966_v5 = vpop.f32.mrb[8].mxu1 }
 0x108   :  { %v1906_v6 = vpop.f32.mrb[11].mxu0  ;;  %v1967_v9 = vpop.f32.mrb[9].mxu1 }
 0x109   :  { %v677_v7 = vadd.f32 %v1904_v3, %v2912_v30  ;;  %v1907_v8 = vadd.f32 %v1906_v6, %v1905_v4  ;;  %v1968_v10 = vadd.f32 %v1967_v9, %v1966_v5  ;;  %v1969_v11 = vpop.f32.mrb[10].mxu1 }
 0x10a   :  { %v1970_v13 = vpop.f32.mrb[11].mxu1 }
 0x10b   :  { %v680_v12 = vadd.f32 %v1907_v8, %v2912_v30  ;;  %v2937_v14 = vadd.f32 %v1968_v10, %v677_v7  ;;  %v1971_v15 = vadd.f32 %v1970_v13, %v1969_v11 }
 0x10d   :  { %v1908_v16 = vpop.f32.mrb[12].mxu0  ;;  %v2939_v17 = vadd.f32 %v1971_v15, %v680_v12 }
 0x10e   :  { %v1909_v18 = vpop.f32.mrb[13].mxu0 }
 0x10f   :  { %v1910_v19 = vadd.f32 %v1909_v18, %v1908_v16  ;;  %v1911_v20 = vpop.f32.mrb[14].mxu0  ;;  %v1972_v21 = vpop.f32.mrb[12].mxu1 }
 0x110   :  { %v1912_v22 = vpop.f32.mrb[15].mxu0  ;;  %v1973_v25 = vpop.f32.mrb[13].mxu1 }
 0x111   :  { %v685_v23 = vadd.f32 %v1910_v19, %v2912_v30  ;;  %v1913_v24 = vadd.f32 %v1912_v22, %v1911_v20  ;;  %v1974_v26 = vadd.f32 %v1973_v25, %v1972_v21  ;;  %v1975_v27 = vpop.f32.mrb[14].mxu1 }
 0x112   :  { %v1976_v29 = vpop.f32.mrb[15].mxu1 }
 0x113   :  { %v688_v28 = vadd.f32 %v1913_v24, %v2912_v30  ;;  %v2943_v31 = vadd.f32 %v1974_v26, %v685_v23  ;;  %v1977_v32 = vadd.f32 %v1976_v29, %v1975_v27 }
 0x115   :  { %v1914_v33 = vpop.f32.mrb[16].mxu0  ;;  %v2945_v34 = vadd.f32 %v1977_v32, %v688_v28 }
 0x116   :  { %v1915_v35 = vpop.f32.mrb[17].mxu0 }
 0x117   :  { %v1916_v36 = vadd.f32 %v1915_v35, %v1914_v33  ;;  %v1917_v37 = vpop.f32.mrb[18].mxu0  ;;  %v1978_v38 = vpop.f32.mrb[16].mxu1 }
 0x118   :  { %v1918_v39 = vpop.f32.mrb[19].mxu0  ;;  %v1979_v42 = vpop.f32.mrb[17].mxu1 }
 0x119   :  { %v693_v40 = vadd.f32 %v1916_v36, %v2912_v30  ;;  %v1919_v41 = vadd.f32 %v1918_v39, %v1917_v37  ;;  %v1980_v43 = vadd.f32 %v1979_v42, %v1978_v38  ;;  %v1981_v44 = vpop.f32.mrb[18].mxu1 }
 0x11a   :  { %v1982_v47 = vpop.f32.mrb[19].mxu1 }
 0x11b   :  { %v696_v46 = vadd.f32 %v1919_v41, %v2912_v30  ;;  %v2949_v49 = vadd.f32 %v1980_v43, %v693_v40  ;;  %v1983_v50 = vadd.f32 %v1982_v47, %v1981_v44 }
 0x11d   :  { %v1920_v51 = vpop.f32.mrb[20].mxu0  ;;  %v2951_v52 = vadd.f32 %v1983_v50, %v696_v46 }
 0x11e   :  { %v1921_v53 = vpop.f32.mrb[21].mxu0 }
 0x11f   :  { %v1922_v54 = vadd.f32 %v1921_v53, %v1920_v51  ;;  %v1923_v55 = vpop.f32.mrb[22].mxu0  ;;  %v1984_v56 = vpop.f32.mrb[20].mxu1 }
 0x120   :  { %v1924_v57 = vpop.f32.mrb[23].mxu0  ;;  %v1985_v60 = vpop.f32.mrb[21].mxu1 }
 0x121   :  { %v701_v58 = vadd.f32 %v1922_v54, %v2912_v30  ;;  %v1925_v59 = vadd.f32 %v1924_v57, %v1923_v55  ;;  %v1986_v61 = vadd.f32 %v1985_v60, %v1984_v56  ;;  %v1987_v63 = vpop.f32.mrb[22].mxu1 }
 0x122   :  { %v1988_v2 = vpop.f32.mrb[23].mxu1 }
 0x123   :  { %v704_v0 = vadd.f32 %v1925_v59, %v2912_v30  ;;  %v2955_v3 = vadd.f32 %v1986_v61, %v701_v58  ;;  %v1989_v4 = vadd.f32 %v1988_v2, %v1987_v63 }
 0x125   :  { %v1926_v5 = vpop.f32.mrb[24].mxu0  ;;  %v2957_v6 = vadd.f32 %v1989_v4, %v704_v0 }
 0x126   :  { %v1927_v7 = vpop.f32.mrb[25].mxu0 }
 0x127   :  { %v1928_v8 = vadd.f32 %v1927_v7, %v1926_v5  ;;  %v1929_v9 = vpop.f32.mrb[26].mxu0  ;;  %v1990_v10 = vpop.f32.mrb[24].mxu1 }
 0x128   :  { %v1930_v11 = vpop.f32.mrb[27].mxu0  ;;  %v1991_v15 = vpop.f32.mrb[25].mxu1 }
 0x129   :  { %v709_v12 = vadd.f32 %v1928_v8, %v2912_v30  ;;  %v1931_v13 = vadd.f32 %v1930_v11, %v1929_v9  ;;  %v1992_v16 = vadd.f32 %v1991_v15, %v1990_v10  ;;  %v1993_v18 = vpop.f32.mrb[26].mxu1 }
 0x12a   :  { %v1994_v20 = vpop.f32.mrb[27].mxu1 }
 0x12b   :  { %v712_v19 = vadd.f32 %v1931_v13, %v2912_v30  ;;  %v2961_v21 = vadd.f32 %v1992_v16, %v709_v12  ;;  %v1995_v22 = vadd.f32 %v1994_v20, %v1993_v18 }
 0x12d   :  { %v1932_v23 = vpop.f32.mrb[28].mxu0  ;;  %v2963_v24 = vadd.f32 %v1995_v22, %v712_v19 }
 0x12e   :  { %v1933_v25 = vpop.f32.mrb[29].mxu0 }
 0x12f   :  { %v1934_v26 = vadd.f32 %v1933_v25, %v1932_v23  ;;  %v1935_v27 = vpop.f32.mrb[30].mxu0  ;;  %v1996_v28 = vpop.f32.mrb[28].mxu1 }
 0x130   :  { %v1936_v29 = vpop.f32.mrb[31].mxu0  ;;  %v1997_v35 = vpop.f32.mrb[29].mxu1 }
 0x131   :  { %v717_v32 = vadd.f32 %v1934_v26, %v2912_v30  ;;  %v1937_v33 = vadd.f32 %v1936_v29, %v1935_v27  ;;  %v1998_v36 = vadd.f32 %v1997_v35, %v1996_v28  ;;  %v1999_v37 = vpop.f32.mrb[30].mxu1 }
 0x132   :  { %v2000_v39 = vpop.f32.mrb[31].mxu1 }
 0x133   :  { %v720_v38 = vadd.f32 %v1937_v33, %v2912_v30  ;;  %v2967_v40 = vadd.f32 %v1998_v36, %v717_v32  ;;  %v2001_v41 = vadd.f32 %v2000_v39, %v1999_v37 }
 0x135   :  { %v2018_v42 = vpop.f32.mrb[32].mxu0  ;;  %v2969_v43 = vadd.f32 %v2001_v41, %v720_v38 }
 0x136   :  { %v2019_v44 = vpop.f32.mrb[33].mxu0 }
 0x137   :  { %v2020_v46 = vadd.f32 %v2019_v44, %v2018_v42  ;;  %v2021_v47 = vpop.f32.mrb[34].mxu0  ;;  %v2115_v51 = vpop.f32.mrb[32].mxu1 }
 0x138   :  { %v2022_v50 = vpop.f32.mrb[35].mxu0  ;;  %v951_v55 = vpop.f32.mrb[33].mxu1 }
 0x139   :  { %v2023_v53 = vadd.f32 %v2022_v50, %v2021_v47  ;;  %v855_v54 = vadd.f32 %v2020_v46, %v2922_v45  ;;  %v2116_v56 = vpop.f32.mrb[34].mxu1 }
 0x13a   :  { %v954_v58 = vpop.f32.mrb[35].mxu1 }
 0x13b   :  { %v952_v57 = vadd.f32 %v951_v55, %v855_v54  ;;  %v858_v30 = vadd.f32 %v2023_v53, %v2924_v48 }
 0x13d   :  { %v955_v59 = vadd.f32 %v954_v58, %v858_v30  ;;  %v2024_v60 = vpop.f32.mrb[36].mxu0  ;;  %v1014_v63 = vmax.f32 %v952_v57, 0.0 }
 0x13e   :  { %v2025_v61 = vpop.f32.mrb[37].mxu0 }
 0x13f   :  { %v1015_v0 = vmax.f32 %v955_v59, 0.0  ;;  %v2026_v2 = vadd.f32 %v2025_v61, %v2024_v60  ;;  %v2027_v4 = vpop.f32.mrb[38].mxu0  ;;  %v2119_v7 = vpop.f32.mrb[36].mxu1 }
 0x140   :  { %v2028_v5 = vpop.f32.mrb[39].mxu0  ;;  %v967_v10 = vpop.f32.mrb[37].mxu1 }
 0x141   :  { %v1030_v8 = vpack.c.bf16 %v1015_v0, %v1014_v63  ;;  %v863_v9 = vadd.f32 %v2026_v2, %v2931_v62  ;;  %v2029_v45 = vadd.f32 %v2028_v5, %v2027_v4  ;;  %v2120_v11 = vpop.f32.mrb[38].mxu1 }
 0x142   :  { %v970_v13 = vpop.f32.mrb[39].mxu1 }
 0x143   :  { %v960_v12 = vadd.f32 %v2115_v51, %v863_v9  ;;  %v866_v48 = vadd.f32 %v2029_v45, %v2933_v1  ;;  %2137 = vmatprep.mubr.msk.bf16.mxu1 %vm1077_vm1, %v1030_v8 }
 0x145   :  { %v963_v15 = vadd.f32 %v2116_v56, %v866_v48  ;;  %v2030_v16 = vpop.f32.mrb[40].mxu0  ;;  %v1016_v19 = vmax.f32 %v960_v12, 0.0 }
 0x146   :  { %v2031_v18 = vpop.f32.mrb[41].mxu0 }
 0x147   :  { %v1017_v20 = vmax.f32 %v963_v15, 0.0  ;;  %v2032_v22 = vadd.f32 %v2031_v18, %v2030_v16  ;;  %v2033_v23 = vpop.f32.mrb[42].mxu0  ;;  %v2123_v26 = vpop.f32.mrb[40].mxu1 }
 0x148   :  { %v2034_v25 = vpop.f32.mrb[43].mxu0  ;;  %v983_v29 = vpop.f32.mrb[41].mxu1 }
 0x149   :  { %v1031_v27 = vpack.c.bf16 %v1017_v20, %v1016_v19  ;;  %v2035_v62 = vadd.f32 %v2034_v25, %v2033_v23  ;;  %v871_v28 = vadd.f32 %v2032_v22, %v2937_v14  ;;  %v2124_v32 = vpop.f32.mrb[42].mxu1 }
 0x14a   :  { %v986_v35 = vpop.f32.mrb[43].mxu1 }
 0x14b   :  { %v968_v33 = vadd.f32 %v967_v10, %v871_v28  ;;  %2138 = vmatmul.mubr.msk.bf16.vlgmr.msra.gmra.mrb[48].mxu1 %vm1077_vm1, %v1031_v27  ;;  %v874_v1 = vadd.f32 %v2035_v62, %v2939_v17 }
 0x14d   :  { %v971_v36 = vadd.f32 %v970_v13, %v874_v1  ;;  %v2036_v37 = vpop.f32.mrb[44].mxu0  ;;  %v1018_v39 = vmax.f32 %v968_v33, 0.0 }
 0x14e   :  { %v2037_v38 = vpop.f32.mrb[45].mxu0 }
 0x14f   :  { %v1019_v41 = vmax.f32 %v971_v36, 0.0  ;;  %v2038_v42 = vadd.f32 %v2037_v38, %v2036_v37  ;;  %v2039_v44 = vpop.f32.mrb[46].mxu0  ;;  %v2979_v47 = vpop.f32.mrb[44].mxu1 }
 0x150   :  { %v2040_v46 = vpop.f32.mrb[47].mxu0  ;;  %v999_v53 = vpop.f32.mrb[45].mxu1 }
 0x151   :  { %v1032_v50 = vpack.c.bf16 %v1019_v41, %v1018_v39  ;;  %v879_v14 = vadd.f32 %v2038_v42, %v2943_v31  ;;  %v2041_v51 = vadd.f32 %v2040_v46, %v2039_v44  ;;  %v2128_v54 = vpop.f32.mrb[46].mxu1 }
 0x152   :  { %v1002_v56 = vpop.f32.mrb[47].mxu1 }
 0x153   :  { %v976_v55 = vadd.f32 %v2119_v7, %v879_v14  ;;  %v882_v17 = vadd.f32 %v2041_v51, %v2945_v34  ;;  %2141 = vmatprep.mubr.msk.bf16.mxu1 %vm1077_vm1, %v1032_v50 }
 0x155   :  { %v979_v57 = vadd.f32 %v2120_v11, %v882_v17  ;;  %v2042_v30 = vpop.f32.mrb[48].mxu0  ;;  %v1020_v59 = vmax.f32 %v976_v55, 0.0 }
 0x156   :  { %v2043_v58 = vpop.f32.mrb[49].mxu0 }
 0x157   :  { %v1021_v60 = vmax.f32 %v979_v57, 0.0  ;;  %v2044_v61 = vadd.f32 %v2043_v58, %v2042_v30  ;;  %v2045_v63 = vpop.f32.mrb[50].mxu0 }
 0x158   :  { %v2046_v0 = vpop.f32.mrb[51].mxu0 }
 0x159   :  { %v1033_v2 = vpack.c.bf16 %v1021_v60, %v1020_v59  ;;  %v2047_v4 = vadd.f32 %v2046_v0, %v2045_v63  ;;  %v887_v31 = vadd.f32 %v2044_v61, %v2949_v49 }
 0x15b   :  { %v984_v5 = vadd.f32 %v983_v29, %v887_v31  ;;  %2142 = vmatmul.mubr.msk.bf16.gmra.mrb[52].mxu1 %vm1077_vm1, %v1033_v2  ;;  %v890_v34 = vadd.f32 %v2047_v4, %v2951_v52 }
 0x15d   :  { %v987_v7 = vadd.f32 %v986_v35, %v890_v34  ;;  %v2048_v8 = vpop.f32.mrb[52].mxu0  ;;  %v1022_v45 = vmax.f32 %v984_v5, 0.0 }
 0x15e   :  { %v2049_v9 = vpop.f32.mrb[53].mxu0 }
 0x15f   :  { %v1023_v10 = vmax.f32 %v987_v7, 0.0  ;;  %v2050_v11 = vadd.f32 %v2049_v9, %v2048_v8  ;;  %v2051_v12 = vpop.f32.mrb[54].mxu0 }
 0x160   :  { %v2052_v48 = vpop.f32.mrb[55].mxu0 }
 0x161   :  { %v1034_v13 = vpack.c.bf16 %v1023_v10, %v1022_v45  ;;  %v895_v15 = vadd.f32 %v2050_v11, %v2955_v3  ;;  %v2053_v16 = vadd.f32 %v2052_v48, %v2051_v12 }
 0x163   :  { %v992_v18 = vadd.f32 %v2123_v26, %v895_v15  ;;  %v898_v49 = vadd.f32 %v2053_v16, %v2957_v6  ;;  %2145 = vmatprep.mubr.msk.bf16.mxu1 %vm1077_vm1, %v1034_v13 }
 0x165   :  { %v995_v19 = vadd.f32 %v2124_v32, %v898_v49  ;;  %v2054_v20 = vpop.f32.mrb[56].mxu0  ;;  %v1024_v22 = vmax.f32 %v992_v18, 0.0 }
 0x166   :  { %v2055_v52 = vpop.f32.mrb[57].mxu0 }
 0x167   :  { %v1025_v23 = vmax.f32 %v995_v19, 0.0  ;;  %v2056_v25 = vadd.f32 %v2055_v52, %v2054_v20  ;;  %v2057_v27 = vpop.f32.mrb[58].mxu0 }
 0x168   :  { %v2058_v62 = vpop.f32.mrb[59].mxu0 }
 0x169   :  { %v1035_v28 = vpack.c.bf16 %v1025_v23, %v1024_v22  ;;  %v2059_v29 = vadd.f32 %v2058_v62, %v2057_v27  ;;  %v903_v33 = vadd.f32 %v2056_v25, %v2961_v21 }
 0x16b   :  { %v1000_v1 = vadd.f32 %v999_v53, %v903_v33  ;;  %2146 = vmatmul.mubr.msk.bf16.gmra.mrb[56].mxu1 %vm1077_vm1, %v1035_v28  ;;  %v906_v3 = vadd.f32 %v2059_v29, %v2963_v24  ;;  %v2260_v53 = vld [vmem:[%s3151_s5 + $0x18] sm:$0xff]  }
 0x16c   :  { %2159 = vmatprep.subr.bf16.mxu0 %v2260_v53 }
 0x16d   :  { %v1003_v6 = vadd.f32 %v1002_v56, %v906_v3  ;;  %v2060_v26 = vpop.f32.mrb[60].mxu0  ;;  %v1026_v32 = vmax.f32 %v1000_v1, 0.0  ;;  %2160 = vmatpush3.bf16.msra.mxu0 %v2260_v53 }
 0x16e   :  { %v2061_v35 = vpop.f32.mrb[61].mxu0 }
 0x16f   :  { %v1027_v36 = vmax.f32 %v1003_v6, 0.0  ;;  %v2062_v37 = vadd.f32 %v2061_v35, %v2060_v26  ;;  %v2063_v38 = vpop.f32.mrb[62].mxu0 }
 0x170   :  { %v2064_v39 = vpop.f32.mrb[63].mxu0 }
 0x171   :  { %v1036_v41 = vpack.c.bf16 %v1027_v36, %v1026_v32  ;;  %v911_v42 = vadd.f32 %v2062_v37, %v2967_v40  ;;  %v2065_v44 = vadd.f32 %v2064_v39, %v2063_v38  ;;  %v2261_v40 = vld [vmem:[%s3153_s7] sm:$0xff]  }
 0x172   :  { %2177 = vmatprep.subr.bf16.mxu1 %v2261_v40 }
 0x173   :  { %v1008_v46 = vadd.f32 %v2979_v47, %v911_v42  ;;  %v914_v21 = vadd.f32 %v2065_v44, %v2969_v43  ;;  %2149 = vmatprep.mubr.msk.bf16.mxu1 %vm1077_vm1, %v1036_v41  ;;  %v2262_v43 = vld [vmem:[%s3153_s7 + $0x8] sm:$0xff]   ;;  %2178 = vmatpush3.bf16.msra.mxu1 %v2261_v40  ;;  %v1835_v47 = vld [vmem:[%s3150_s4] ss:$0 sm:$0xff] }
 0x174   :  { %2179 = vmatprep.subr.bf16.mxu1 %v2262_v43 }
 0x175   :  { %v1011_v50 = vadd.f32 %v2128_v54, %v914_v21  ;;  %v1028_v24 = vmax.f32 %v1008_v46, 0.0 }
 0x177   :  { %v1029_v14 = vmax.f32 %v1011_v50, 0.0  ;;  %2180 = vmatpush3.bf16.msra.mxu1 %v2262_v43  ;;  %v2263_v50 = vld [vmem:[%s3153_s7 + $0x10] sm:$0xff]  }
 0x178   :  { %2181 = vmatprep.subr.bf16.mxu1 %v2263_v50 }
 0x179   :  { %v1037_v51 = vpack.c.bf16 %v1029_v14, %v1028_v24  ;;  %v2264_v24 = vld [vmem:[%s3153_s7 + $0x18] sm:$0xff]   ;;  %v1848_v14 = vld [vmem:[%s3152_s6] ss:$0 sm:$0xff] }
 0x17b   :  { %2150 = vmatmul.mubr.msk.bf16.gmra.mrb[60].mxu1 %vm1077_vm1, %v1037_v51 }
 0x17c   :  { %2182 = vmatpush3.bf16.msra.mxu1 %v2263_v50 }
 0x17d   :  { %2183 = vmatprep.subr.bf16.mxu1 %v2264_v24 }
 0x180   :  { %2184 = vmatpush3.bf16.msra.mxu1 %v2264_v24 }
 0x21e   :  { %v2139_v54 = vpop.f32.mrb[48].mxu1 }
 0x21f   :  { %v1145_v55 = vadd.f32 %v2139_v54, %v1835_v47  ;;  %v1136_v17 = vpop.f32.mrb[49].mxu1 }
 0x220   :  { %v1137_v56 = vadd.f32 %v1835_v47, %v1136_v17  ;;  %v2140_v57 = vpop.f32.mrb[50].mxu1 }
 0x221   :  { %v1148_v30 = vadd.f32 %v2140_v57, %v1835_v47  ;;  %v1139_v58 = vpop.f32.mrb[51].mxu1  ;;  %v1201_v60 = vmax.f32 %v1145_v55, 0.0 }
 0x222   :  { %v1140_v59 = vadd.f32 %v1835_v47, %v1139_v58  ;;  %v1199_v63 = vmax.f32 %v1137_v56, 0.0 }
 0x223   :  { %v1202_v61 = vmax.f32 %v1148_v30, 0.0 }
 0x224   :  { %v1200_v0 = vmax.f32 %v1140_v59, 0.0 }
 0x225   :  { %v1216_v2 = vpack.c.bf16 %v1202_v61, %v1201_v60 }
 0x226   :  { %v1215_v4 = vpack.c.bf16 %v1200_v0, %v1199_v63 }
 0x228   :  { %2161 = vmatprep.mubr.msk.bf16.mxu0 %vm1077_vm1, %v1215_v4 }
 0x229   :  { %2162 = vmatmul.mubr.msk.bf16.vlgmr.msra.gmra.mrb[64].mxu0 %vm1077_vm1, %v1216_v2 }
 0x22e   :  { %v2143_v31 = vpop.f32.mrb[52].mxu1 }
 0x22f   :  { %v1161_v5 = vadd.f32 %v2143_v31, %v1835_v47  ;;  %v1152_v34 = vpop.f32.mrb[53].mxu1 }
 0x230   :  { %v1153_v7 = vadd.f32 %v1835_v47, %v1152_v34  ;;  %v2144_v8 = vpop.f32.mrb[54].mxu1 }
 0x231   :  { %v1164_v9 = vadd.f32 %v2144_v8, %v1835_v47  ;;  %v1155_v45 = vpop.f32.mrb[55].mxu1  ;;  %v1205_v11 = vmax.f32 %v1161_v5, 0.0 }
 0x232   :  { %v1156_v10 = vadd.f32 %v1835_v47, %v1155_v45  ;;  %v1203_v48 = vmax.f32 %v1153_v7, 0.0 }
 0x233   :  { %v1206_v12 = vmax.f32 %v1164_v9, 0.0 }
 0x234   :  { %v1204_v13 = vmax.f32 %v1156_v10, 0.0 }
 0x235   :  { %v1218_v15 = vpack.c.bf16 %v1206_v12, %v1205_v11 }
 0x236   :  { %v1217_v16 = vpack.c.bf16 %v1204_v13, %v1203_v48 }
 0x238   :  { %2165 = vmatprep.mubr.msk.bf16.mxu0 %vm1077_vm1, %v1217_v16 }
 0x239   :  { %2166 = vmatmul.mubr.msk.bf16.gmra.mrb[68].mxu0 %vm1077_vm1, %v1218_v15 }
 0x23e   :  { %v2147_v18 = vpop.f32.mrb[56].mxu1 }
 0x23f   :  { %v1177_v49 = vadd.f32 %v2147_v18, %v1835_v47  ;;  %v1168_v19 = vpop.f32.mrb[57].mxu1 }
 0x240   :  { %v1169_v20 = vadd.f32 %v1835_v47, %v1168_v19  ;;  %v2148_v52 = vpop.f32.mrb[58].mxu1 }
 0x241   :  { %v1180_v22 = vadd.f32 %v2148_v52, %v1835_v47  ;;  %v1171_v23 = vpop.f32.mrb[59].mxu1  ;;  %v1209_v27 = vmax.f32 %v1177_v49, 0.0 }
 0x242   :  { %v1172_v25 = vadd.f32 %v1835_v47, %v1171_v23  ;;  %v1207_v28 = vmax.f32 %v1169_v20, 0.0 }
 0x243   :  { %v1210_v62 = vmax.f32 %v1180_v22, 0.0 }
 0x244   :  { %v1208_v29 = vmax.f32 %v1172_v25, 0.0 }
 0x245   :  { %v1220_v33 = vpack.c.bf16 %v1210_v62, %v1209_v27 }
 0x246   :  { %v1219_v1 = vpack.c.bf16 %v1208_v29, %v1207_v28 }
 0x248   :  { %2169 = vmatprep.mubr.msk.bf16.mxu0 %vm1077_vm1, %v1219_v1 }
 0x249   :  { %2170 = vmatmul.mubr.msk.bf16.gmra.mrb[72].mxu0 %vm1077_vm1, %v1220_v33 }
 0x24e   :  { %v2151_v3 = vpop.f32.mrb[60].mxu1 }
 0x24f   :  { %v1193_v6 = vadd.f32 %v2151_v3, %v1835_v47  ;;  %v1184_v26 = vpop.f32.mrb[61].mxu1 }
 0x250   :  { %v1185_v35 = vadd.f32 %v1835_v47, %v1184_v26  ;;  %v2152_v32 = vpop.f32.mrb[62].mxu1 }
 0x251   :  { %v1196_v36 = vadd.f32 %v2152_v32, %v1835_v47  ;;  %v1187_v37 = vpop.f32.mrb[63].mxu1  ;;  %v1213_v39 = vmax.f32 %v1193_v6, 0.0 }
 0x252   :  { %v1188_v38 = vadd.f32 %v1835_v47, %v1187_v37  ;;  %v1211_v42 = vmax.f32 %v1185_v35, 0.0 }
 0x253   :  { %v1214_v41 = vmax.f32 %v1196_v36, 0.0 }
 0x254   :  { %v1212_v44 = vmax.f32 %v1188_v38, 0.0 }
 0x255   :  { %v1222_v46 = vpack.c.bf16 %v1214_v41, %v1213_v39  ;;  %v1861_v41 = vld [vmem:[%s3154_s8] ss:$0 sm:$0xff]  ;;  %s2353_s8 = smov [#allocation2]  }
 0x256   :  { %v1221_v21 = vpack.c.bf16 %v1212_v44, %v1211_v42  ;;  %s1766_s13 = sshll.u32 %s2353_s8, 4  ;;  %s1767_s13 = int_to_ptr.vmem [resolvable:$true] %s1766_s13 }
 0x257   :  { %s2329_s14 = scalar_lea.vmem %s1767_s13, 256  ;;  %p2334_p1 = scmp.lt.s32.totalorder %s1767_s13, %s1767_s13 }
 0x258   :  { %2173 = vmatprep.mubr.msk.bf16.mxu0 %vm1077_vm1, %v1221_v21  ;;  %p2330_p0 = scmp.ne.s32.totalorder %s1767_s13, %s2329_s14  ;;  %p2335_p2 = scmp.lt.s32.totalorder %s2329_s14, %s2329_s14 }
 0x259   :  { %2174 = vmatmul.mubr.msk.bf16.gmra.mrb[76].mxu0 %vm1077_vm1, %v1222_v46 }
 0x25a   :  { %p2336_p3 = por %p2335_p2, %p2334_p1 }
 0x25c   :  { %p2337_p4 = pnand %p2336_p3, %p2330_p0 }
 0x2fc   :  { %v2163_v51 = vpop.f32.mrb[64].mxu0 }
 0x2fd   :  { %v1329_v53 = vadd.f32 %v2163_v51, %v1848_v14  ;;  %v1320_v40 = vpop.f32.mrb[65].mxu0 }
 0x2fe   :  { %v1321_v43 = vadd.f32 %v1848_v14, %v1320_v40  ;;  %v2164_v47 = vpop.f32.mrb[66].mxu0 }
 0x2ff   :  { %v1332_v54 = vadd.f32 %v2164_v47, %v1848_v14  ;;  %v1323_v55 = vpop.f32.mrb[67].mxu0  ;;  %v1385_v56 = vmax.f32 %v1329_v53, 0.0 }
 0x300   :  { %v1324_v17 = vadd.f32 %v1848_v14, %v1323_v55  ;;  %v1383_v30 = vmax.f32 %v1321_v43, 0.0 }
 0x301   :  { %v1386_v57 = vmax.f32 %v1332_v54, 0.0 }
 0x302   :  { %v1384_v58 = vmax.f32 %v1324_v17, 0.0 }
 0x303   :  { %v1400_v59 = vpack.c.bf16 %v1386_v57, %v1385_v56 }
 0x304   :  { %v1399_v60 = vpack.c.bf16 %v1384_v58, %v1383_v30 }
 0x306   :  { %2185 = vmatprep.mubr.msk.bf16.mxu1 %vm1077_vm1, %v1399_v60 }
 0x307   :  { %2186 = vmatmul.mubr.msk.bf16.vlgmr.msra.gmra.mrb[64].mxu1 %vm1077_vm1, %v1400_v59 }
 0x30c   :  { %v2167_v61 = vpop.f32.mrb[68].mxu0 }
 0x30d   :  { %v1345_v63 = vadd.f32 %v2167_v61, %v1848_v14  ;;  %v1336_v0 = vpop.f32.mrb[69].mxu0 }
 0x30e   :  { %v1337_v2 = vadd.f32 %v1848_v14, %v1336_v0  ;;  %v2168_v4 = vpop.f32.mrb[70].mxu0 }
 0x30f   :  { %v1348_v31 = vadd.f32 %v2168_v4, %v1848_v14  ;;  %v1339_v5 = vpop.f32.mrb[71].mxu0  ;;  %v1389_v7 = vmax.f32 %v1345_v63, 0.0 }
 0x310   :  { %v1340_v34 = vadd.f32 %v1848_v14, %v1339_v5  ;;  %v1387_v9 = vmax.f32 %v1337_v2, 0.0 }
 0x311   :  { %v1390_v8 = vmax.f32 %v1348_v31, 0.0 }
 0x312   :  { %v1388_v45 = vmax.f32 %v1340_v34, 0.0 }
 0x313   :  { %v1402_v10 = vpack.c.bf16 %v1390_v8, %v1389_v7 }
 0x314   :  { %v1401_v11 = vpack.c.bf16 %v1388_v45, %v1387_v9 }
 0x316   :  { %2189 = vmatprep.mubr.msk.bf16.mxu1 %vm1077_vm1, %v1401_v11 }
 0x317   :  { %2190 = vmatmul.mubr.msk.bf16.gmra.mrb[68].mxu1 %vm1077_vm1, %v1402_v10 }
 0x31c   :  { %v2171_v12 = vpop.f32.mrb[72].mxu0 }
 0x31d   :  { %v1361_v48 = vadd.f32 %v2171_v12, %v1848_v14  ;;  %v1352_v13 = vpop.f32.mrb[73].mxu0 }
 0x31e   :  { %v1353_v15 = vadd.f32 %v1848_v14, %v1352_v13  ;;  %v2172_v16 = vpop.f32.mrb[74].mxu0 }
 0x31f   :  { %v1364_v18 = vadd.f32 %v2172_v16, %v1848_v14  ;;  %v1355_v49 = vpop.f32.mrb[75].mxu0  ;;  %v1393_v20 = vmax.f32 %v1361_v48, 0.0 }
 0x320   :  { %v1356_v19 = vadd.f32 %v1848_v14, %v1355_v49  ;;  %v1391_v22 = vmax.f32 %v1353_v15, 0.0 }
 0x321   :  { %v1394_v52 = vmax.f32 %v1364_v18, 0.0 }
 0x322   :  { %v1392_v23 = vmax.f32 %v1356_v19, 0.0 }
 0x323   :  { %v1404_v25 = vpack.c.bf16 %v1394_v52, %v1393_v20 }
 0x324   :  { %v1403_v27 = vpack.c.bf16 %v1392_v23, %v1391_v22 }
 0x326   :  { %2193 = vmatprep.mubr.msk.bf16.mxu1 %vm1077_vm1, %v1403_v27 }
 0x327   :  { %2194 = vmatmul.mubr.msk.bf16.gmra.mrb[72].mxu1 %vm1077_vm1, %v1404_v25 }
 0x32c   :  { %v2175_v62 = vpop.f32.mrb[76].mxu0 }
 0x32d   :  { %v1377_v28 = vadd.f32 %v2175_v62, %v1848_v14  ;;  %v1368_v29 = vpop.f32.mrb[77].mxu0 }
 0x32e   :  { %v1369_v33 = vadd.f32 %v1848_v14, %v1368_v29  ;;  %v2176_v1 = vpop.f32.mrb[78].mxu0 }
 0x32f   :  { %v1380_v3 = vadd.f32 %v2176_v1, %v1848_v14  ;;  %v1371_v6 = vpop.f32.mrb[79].mxu0  ;;  %v1397_v35 = vmax.f32 %v1377_v28, 0.0 }
 0x330   :  { %v1372_v26 = vadd.f32 %v1848_v14, %v1371_v6  ;;  %v1395_v36 = vmax.f32 %v1369_v33, 0.0 }
 0x331   :  { %v1398_v32 = vmax.f32 %v1380_v3, 0.0 }
 0x332   :  { %v1396_v37 = vmax.f32 %v1372_v26, 0.0 }
 0x333   :  { %v1406_v38 = vpack.c.bf16 %v1398_v32, %v1397_v35 }
 0x334   :  { %v1405_v39 = vpack.c.bf16 %v1396_v37, %v1395_v36 }
 0x336   :  { %2197 = vmatprep.mubr.msk.bf16.mxu1 %vm1077_vm1, %v1405_v39 }
 0x337   :  { %2198 = vmatmul.mubr.msk.bf16.gmra.mrb[76].mxu1 %vm1077_vm1, %v1406_v38 }
 0x3da   :  { %v2187_v42 = vpop.f32.mrb[64].mxu1 }
 0x3db   :  { %v1513_v44 = vadd.f32 %v2187_v42, %v1861_v41  ;;  %v1504_v46 = vpop.f32.mrb[65].mxu1 }
 0x3dc   :  { %v1505_v21 = vadd.f32 %v1861_v41, %v1504_v46  ;;  %v2188_v50 = vpop.f32.mrb[66].mxu1 }
 0x3dd   :  { %1571 = vmax.xlane.f32.xlu1 %v1513_v44  ;;  %v1507_v24 = vpop.f32.mrb[67].mxu1  ;;  %v1516_v14 = vadd.f32 %v2188_v50, %v1861_v41 }
 0x3de   :  { %1567 = vmax.xlane.f32.xlu0 %v1505_v21  ;;  %v1508_v51 = vadd.f32 %v1861_v41, %v1507_v24 }
 0x3e1   :  { %1573 = vmax.xlane.f32.xlu1 %v1516_v14 }
 0x3e2   :  { %1569 = vmax.xlane.f32.xlu0 %v1508_v51 }
 0x3ea   :  { %v2191_v53 = vpop.f32.mrb[68].mxu1 }
 0x3eb   :  { %v1520_v40 = vpop.f32.mrb[69].mxu1  ;;  %v1529_v17 = vadd.f32 %v2191_v53, %v1861_v41 }
 0x3ec   :  { %v1521_v43 = vadd.f32 %v1861_v41, %v1520_v40  ;;  %v2192_v47 = vpop.f32.mrb[70].mxu1 }
 0x3ed   :  { %v1523_v54 = vpop.f32.mrb[71].mxu1  ;;  %v1532_v56 = vadd.f32 %v2192_v47, %v1861_v41 }
 0x3ee   :  { %v1524_v55 = vadd.f32 %v1861_v41, %v1523_v54  ;;  %1575 = vmax.xlane.f32.xlu0 %v1521_v43 }
 0x3f0   :  { %1577 = vmax.xlane.f32.xlu1 %v1524_v55 }
 0x3f2   :  { %1579 = vmax.xlane.f32.xlu0 %v1529_v17 }
 0x3f4   :  { %1581 = vmax.xlane.f32.xlu1 %v1532_v56 }
 0x3fa   :  { %v2195_v57 = vpop.f32.mrb[72].mxu1 }
 0x3fb   :  { %v1536_v30 = vpop.f32.mrb[73].mxu1  ;;  %v3043_v63 = vadd.f32 %v2195_v57, %v1861_v41 }
 0x3fc   :  { %v3038_v58 = vadd.f32 %v1861_v41, %v1536_v30  ;;  %v2196_v59 = vpop.f32.mrb[74].mxu1 }
 0x3fd   :  { %v1539_v60 = vpop.f32.mrb[75].mxu1  ;;  %v3046_v0 = vadd.f32 %v2196_v59, %v1861_v41 }
 0x3fe   :  { %v3040_v61 = vadd.f32 %v1861_v41, %v1539_v60  ;;  %1583 = vmax.xlane.f32.xlu0 %v3038_v58 }
 0x400   :  { %1585 = vmax.xlane.f32.xlu1 %v3040_v61 }
 0x402   :  { %1587 = vmax.xlane.f32.xlu0 %v3043_v63 }
 0x404   :  { %1589 = vmax.xlane.f32.xlu1 %v3046_v0 }
 0x40a   :  { %v2199_v2 = vpop.f32.mrb[76].mxu1 }
 0x40b   :  { %v1552_v4 = vpop.f32.mrb[77].mxu1  ;;  %v3055_v8 = vadd.f32 %v2199_v2, %v1861_v41 }
 0x40c   :  { %v3050_v31 = vadd.f32 %v1861_v41, %v1552_v4  ;;  %v2200_v5 = vpop.f32.mrb[78].mxu1 }
 0x40d   :  { %v1555_v34 = vpop.f32.mrb[79].mxu1  ;;  %v3058_v9 = vadd.f32 %v2200_v5, %v1861_v41 }
 0x40e   :  { %v3052_v7 = vadd.f32 %v1861_v41, %v1555_v34  ;;  %1591 = vmax.xlane.f32.xlu0 %v3050_v31 }
 0x410   :  { %1593 = vmax.xlane.f32.xlu1 %v3052_v7 }
 0x412   :  { %1595 = vmax.xlane.f32.xlu0 %v3055_v8 }
 0x414   :  { %1597 = vmax.xlane.f32.xlu1 %v3058_v9 }
 0x46a   :  { %v1572_v45 = vpop.xlane.xlu1 %1571 }
 0x46b   :  { %v3062_v10 = vsub.f32 %v1513_v44, %v1572_v45  ;;  %v1568_v11 = vpop.xlane.xlu0 %1567 }
 0x46c   :  { %v3064_v12 = vsub.f32 %v1505_v21, %v1568_v11 }
 0x46d   :  { %v1619_v48 = vmul.f32 1.442695, %v3062_v10 }
 0x46e   :  { %v1574_v13 = vpop.xlane.xlu1 %1573  ;;  %v1615_v15 = vmul.f32 1.442695, %v3064_v12 }
 0x46f   :  { %2265 = vpow2.f32 %v1619_v48  ;;  %v1570_v16 = vpop.xlane.xlu0 %1569  ;;  %v3068_v18 = vsub.f32 %v1516_v14, %v1574_v13 }
 0x470   :  { %v3070_v49 = vsub.f32 %v1508_v51, %v1570_v16  ;;  %2267 = vpow2.f32 %v1615_v15 }
 0x471   :  { %v1621_v20 = vmul.f32 1.442695, %v3068_v18 }
 0x472   :  { %v1617_v19 = vmul.f32 1.442695, %v3070_v49 }
 0x474   :  { %2269 = vpow2.f32 %v1617_v19 }
 0x475   :  { %2271 = vpow2.f32 %v1621_v20 }
 0x479   :  { %v2266_v52 = vpop.eup %2265 }
 0x47a   :  { %1651 = vadd.xlane.f32.xlu0 %v2266_v52  ;;  %v2268_v23 = vpop.eup %2267 }
 0x47b   :  { %v1576_v22 = vpop.xlane.xlu0 %1575 }
 0x47c   :  { %v3076_v29 = vsub.f32 %v1521_v43, %v1576_v22 }
 0x47d   :  { %v1578_v25 = vpop.xlane.xlu1 %1577 }
 0x47e   :  { %v2270_v27 = vpop.eup %2269  ;;  %v3074_v62 = vsub.f32 %v1524_v55, %v1578_v25  ;;  %1647 = vadd.xlane.f32.xlu0 %v2268_v23  ;;  %v1623_v32 = vmul.f32 1.442695, %v3076_v29 }
 0x47f   :  { %1649 = vadd.xlane.f32.xlu1 %v2270_v27  ;;  %v1580_v28 = vpop.xlane.xlu0 %1579  ;;  %v2272_v6 = vpop.eup %2271 }
 0x480   :  { %v1625_v33 = vmul.f32 1.442695, %v3074_v62  ;;  %v3079_v1 = vsub.f32 %v1529_v17, %v1580_v28 }
 0x481   :  { %v1582_v3 = vpop.xlane.xlu1 %1581 }
 0x482   :  { %2273 = vpow2.f32 %v1625_v33  ;;  %v1627_v26 = vmul.f32 1.442695, %v3079_v1  ;;  %v3082_v35 = vsub.f32 %v1532_v56, %v1582_v3 }
 0x483   :  { %1653 = vadd.xlane.f32.xlu1 %v2272_v6 }
 0x484   :  { %2275 = vpow2.f32 %v1627_v26  ;;  %v1629_v36 = vmul.f32 1.442695, %v3082_v35 }
 0x486   :  { %2277 = vpow2.f32 %v1629_v36 }
 0x487   :  { %2279 = vpow2.f32 %v1623_v32 }
 0x48b   :  { %v1584_v37 = vpop.xlane.xlu0 %1583 }
 0x48c   :  { %v2274_v38 = vpop.eup %2273  ;;  %v3090_v21 = vsub.f32 %v3038_v58, %v1584_v37 }
 0x48d   :  { %v1586_v39 = vpop.xlane.xlu1 %1585  ;;  %1657 = vadd.xlane.f32.xlu1 %v2274_v38 }
 0x48e   :  { %v2276_v41 = vpop.eup %2275  ;;  %v3087_v42 = vsub.f32 %v3040_v61, %v1586_v39  ;;  %v1631_v43 = vmul.f32 1.442695, %v3090_v21 }
 0x48f   :  { %1659 = vadd.xlane.f32.xlu0 %v2276_v41  ;;  %v1588_v44 = vpop.xlane.xlu0 %1587 }
 0x490   :  { %v2278_v46 = vpop.eup %2277  ;;  %v1633_v50 = vmul.f32 1.442695, %v3087_v42  ;;  %v3094_v24 = vsub.f32 %v3043_v63, %v1588_v44 }
 0x491   :  { %v1590_v14 = vpop.xlane.xlu1 %1589  ;;  %1661 = vadd.xlane.f32.xlu1 %v2278_v46  ;;  %v2280_v51 = vpop.eup %2279 }
 0x492   :  { %2281 = vpow2.f32 %v1633_v50  ;;  %v1635_v53 = vmul.f32 1.442695, %v3094_v24  ;;  %v3098_v40 = vsub.f32 %v3046_v0, %v1590_v14 }
 0x493   :  { %1655 = vadd.xlane.f32.xlu0 %v2280_v51 }
 0x494   :  { %2283 = vpow2.f32 %v1635_v53  ;;  %v1637_v47 = vmul.f32 1.442695, %v3098_v40 }
 0x496   :  { %2285 = vpow2.f32 %v1637_v47 }
 0x497   :  { %2287 = vpow2.f32 %v1631_v43 }
 0x49b   :  { %v1592_v54 = vpop.xlane.xlu0 %1591 }
 0x49c   :  { %v2282_v55 = vpop.eup %2281  ;;  %v3106_v59 = vsub.f32 %v3050_v31, %v1592_v54 }
 0x49d   :  { %v1594_v17 = vpop.xlane.xlu1 %1593  ;;  %1665 = vadd.xlane.f32.xlu1 %v2282_v55 }
 0x49e   :  { %v2284_v56 = vpop.eup %2283  ;;  %v3103_v57 = vsub.f32 %v3052_v7, %v1594_v17  ;;  %v1639_v5 = vmul.f32 1.442695, %v3106_v59 }
 0x49f   :  { %1667 = vadd.xlane.f32.xlu0 %v2284_v56  ;;  %v1596_v30 = vpop.xlane.xlu0 %1595 }
 0x4a0   :  { %v2286_v58 = vpop.eup %2285  ;;  %v1641_v60 = vmul.f32 1.442695, %v3103_v57  ;;  %v3110_v61 = vsub.f32 %v3055_v8, %v1596_v30 }
 0x4a1   :  { %v1598_v63 = vpop.xlane.xlu1 %1597  ;;  %1669 = vadd.xlane.f32.xlu1 %v2286_v58  ;;  %v2288_v0 = vpop.eup %2287 }
 0x4a2   :  { %2289 = vpow2.f32 %v1641_v60  ;;  %v1643_v2 = vmul.f32 1.442695, %v3110_v61  ;;  %v3114_v4 = vsub.f32 %v3058_v9, %v1598_v63 }
 0x4a3   :  { %1663 = vadd.xlane.f32.xlu0 %v2288_v0 }
 0x4a4   :  { %2291 = vpow2.f32 %v1643_v2  ;;  %v1645_v31 = vmul.f32 1.442695, %v3114_v4 }
 0x4a6   :  { %2293 = vpow2.f32 %v1645_v31 }
 0x4a7   :  { %2295 = vpow2.f32 %v1639_v5 }
 0x4ac   :  { %v2290_v34 = vpop.eup %2289 }
 0x4ad   :  { %1673 = vadd.xlane.f32.xlu1 %v2290_v34 }
 0x4ae   :  { %v2292_v7 = vpop.eup %2291 }
 0x4af   :  { %1675 = vadd.xlane.f32.xlu0 %v2292_v7 }
 0x4b0   :  { %v2294_v8 = vpop.eup %2293 }
 0x4b1   :  { %1677 = vadd.xlane.f32.xlu1 %v2294_v8  ;;  %v2296_v45 = vpop.eup %2295 }
 0x4b3   :  { %1671 = vadd.xlane.f32.xlu0 %v2296_v45 }
 0x507   :  { %v1652_v11 = vpop.xlane.xlu0 %1651 }
 0x50b   :  { %v1648_v48 = vpop.xlane.xlu0 %1647 }
 0x50c   :  { %2297 = vlog2.f32 %v1648_v48  ;;  %v1650_v9 = vpop.xlane.xlu1 %1649 }
 0x50d   :  { %2299 = vlog2.f32 %v1650_v9 }
 0x50e   :  { %2301 = vlog2.f32 %v1652_v11 }
 0x510   :  { %v1654_v13 = vpop.xlane.xlu1 %1653 }
 0x511   :  { %2303 = vlog2.f32 %v1654_v13 }
 0x516   :  { %v2298_v15 = vpop.eup %2297 }
 0x517   :  { %v2300_v16 = vpop.eup %2299  ;;  %v1680_v19 = vmul.f32 0.6931472, %v2298_v15 }
 0x518   :  { %v1682_v20 = vmul.f32 0.6931472, %v2300_v16  ;;  %v2302_v22 = vpop.eup %2301 }
 0x519   :  { %v1711_v52 = vsub.f32 %v3064_v12, %v1680_v19  ;;  %v1684_v25 = vmul.f32 0.6931472, %v2302_v22 }
 0x51a   :  { %v1658_v27 = vpop.xlane.xlu1 %1657  ;;  %v1712_v28 = vsub.f32 %v3070_v49, %v1682_v20 }
 0x51b   :  { %1727 = vxpose.xlu0.b32.start [1/16] (narrow) %v1711_v52, 16  ;;  %v2304_v33 = vpop.eup %2303  ;;  %2305 = vlog2.f32 %v1658_v27  ;;  %v1713_v26 = vsub.f32 %v3062_v10, %v1684_v25 }
 0x51c   :  { %v1660_v23 = vpop.xlane.xlu0 %1659  ;;  %v1686_v6 = vmul.f32 0.6931472, %v2304_v33 }
 0x51e   :  { %v1714_v32 = vsub.f32 %v3068_v18, %v1686_v6  ;;  %v1662_v12 = vpop.xlane.xlu1 %1661 }
 0x51f   :  { %1728 = vxpose.xlu0.b32.cont [2/16] (narrow) %v1712_v28, 16 }
 0x520   :  { %v1656_v3 = vpop.xlane.xlu0 %1655 }
 0x521   :  { %2307 = vlog2.f32 %v1656_v3 }
 0x522   :  { %2309 = vlog2.f32 %v1660_v23 }
 0x523   :  { %1729 = vxpose.xlu0.b32.cont [3/16] (narrow) %v1713_v26, 16  ;;  %2311 = vlog2.f32 %v1662_v12 }
 0x525   :  { %v2306_v36 = vpop.eup %2305 }
 0x526   :  { %v1690_v41 = vmul.f32 0.6931472, %v2306_v36 }
 0x527   :  { %1730 = vxpose.xlu0.b32.cont [4/16] (narrow) %v1714_v32, 16 }
 0x528   :  { %v1716_v14 = vsub.f32 %v3074_v62, %v1690_v41 }
 0x52a   :  { %v1666_v49 = vpop.xlane.xlu1 %1665 }
 0x52b   :  { %v2308_v37 = vpop.eup %2307  ;;  %2313 = vlog2.f32 %v1666_v49 }
 0x52c   :  { %v1688_v38 = vmul.f32 0.6931472, %v2308_v37  ;;  %v1668_v39 = vpop.xlane.xlu0 %1667  ;;  %v2310_v46 = vpop.eup %2309 }
 0x52d   :  { %v1692_v10 = vmul.f32 0.6931472, %v2310_v46  ;;  %v2312_v18 = vpop.eup %2311 }
 0x52e   :  { %v1715_v44 = vsub.f32 %v3076_v29, %v1688_v38  ;;  %v1694_v51 = vmul.f32 0.6931472, %v2312_v18  ;;  %v1670_v53 = vpop.xlane.xlu1 %1669 }
 0x52f   :  { %v1717_v43 = vsub.f32 %v3079_v1, %v1692_v10 }
 0x530   :  { %1731 = vxpose.xlu0.b32.cont [5/16] (narrow) %v1715_v44, 16  ;;  %v1664_v50 = vpop.xlane.xlu0 %1663  ;;  %v1718_v29 = vsub.f32 %v3082_v35, %v1694_v51 }
 0x531   :  { %2315 = vlog2.f32 %v1664_v50 }
 0x532   :  { %2317 = vlog2.f32 %v1668_v39 }
 0x533   :  { %2319 = vlog2.f32 %v1670_v53 }
 0x534   :  { %1732 = vxpose.xlu0.b32.cont [6/16] (narrow) %v1716_v14, 16 }
 0x535   :  { %v2314_v47 = vpop.eup %2313 }
 0x536   :  { %v1698_v30 = vmul.f32 0.6931472, %v2314_v47 }
 0x538   :  { %1733 = vxpose.xlu0.b32.cont [7/16] (narrow) %v1717_v43, 16  ;;  %v1720_v1 = vsub.f32 %v3087_v42, %v1698_v30 }
 0x53a   :  { %v1674_v56 = vpop.xlane.xlu1 %1673 }
 0x53b   :  { %v2316_v54 = vpop.eup %2315  ;;  %2321 = vlog2.f32 %v1674_v56 }
 0x53c   :  { %v1696_v55 = vmul.f32 0.6931472, %v2316_v54  ;;  %1734 = vxpose.xlu0.b32.cont [8/16] (narrow) %v1718_v29, 16  ;;  %v1676_v17 = vpop.xlane.xlu0 %1675  ;;  %v2318_v58 = vpop.eup %2317 }
 0x53d   :  { %v1700_v63 = vmul.f32 0.6931472, %v2318_v58  ;;  %v2320_v0 = vpop.eup %2319 }
 0x53e   :  { %v1719_v62 = vsub.f32 %v3090_v21, %v1696_v55  ;;  %v1702_v35 = vmul.f32 0.6931472, %v2320_v0  ;;  %v1678_v2 = vpop.xlane.xlu1 %1677 }
 0x53f   :  { %v1721_v5 = vsub.f32 %v3094_v24, %v1700_v63 }
 0x540   :  { %1735 = vxpose.xlu0.b32.cont [9/16] (narrow) %v1719_v62, 16  ;;  %v1672_v60 = vpop.xlane.xlu0 %1671  ;;  %v1722_v21 = vsub.f32 %v3098_v40, %v1702_v35 }
 0x541   :  { %2323 = vlog2.f32 %v1672_v60 }
 0x542   :  { %2325 = vlog2.f32 %v1676_v17 }
 0x543   :  { %2327 = vlog2.f32 %v1678_v2 }
 0x544   :  { %1736 = vxpose.xlu0.b32.cont [10/16] (narrow) %v1720_v1, 16 }
 0x545   :  { %v2322_v31 = vpop.eup %2321 }
 0x546   :  { %v1706_v8 = vmul.f32 0.6931472, %v2322_v31 }
 0x548   :  { %1737 = vxpose.xlu0.b32.cont [11/16] (narrow) %v1721_v5, 16  ;;  %v1724_v48 = vsub.f32 %v3103_v57, %v1706_v8 }
 0x54b   :  { %v2324_v34 = vpop.eup %2323 }
 0x54c   :  { %v1704_v7 = vmul.f32 0.6931472, %v2324_v34  ;;  %1738 = vxpose.xlu0.b32.cont [12/16] (narrow) %v1722_v21, 16  ;;  %v2326_v11 = vpop.eup %2325 }
 0x54d   :  { %v1708_v42 = vmul.f32 0.6931472, %v2326_v11  ;;  %v2328_v9 = vpop.eup %2327 }
 0x54e   :  { %v1723_v45 = vsub.f32 %v3106_v59, %v1704_v7  ;;  %v1710_v13 = vmul.f32 0.6931472, %v2328_v9 }
 0x54f   :  { %v1725_v24 = vsub.f32 %v3110_v61, %v1708_v42 }
 0x550   :  { %1739 = vxpose.xlu0.b32.cont [13/16] (narrow) %v1723_v45, 16  ;;  %v1726_v15 = vsub.f32 %v3114_v4, %v1710_v13 }
 0x554   :  { %1740 = vxpose.xlu0.b32.cont [14/16] (narrow) %v1724_v48, 16 }
 0x558   :  { %1741 = vxpose.xlu0.b32.cont [15/16] (narrow) %v1725_v24, 16 }
 0x55c   :  { %1742 = vxpose.xlu0.b32.end [16/16] (narrow) %v1726_v15, 16 }
 0x5a0   :  { %v1743_v40 = vpop.trf.xlu0 }
 0x5a1   :  { %1759 = vst [vmem:[#allocation2] sm:$0xff] %v1743_v40 }
 0x5a4   :  { %v1744_v59 = vpop.trf.xlu0 }
 0x5a5   :  { %1760 = vst [vmem:[#allocation2 + $0x8] sm:$0xff] %v1744_v59 }
 0x5a6   :  { %2340 = shalt.err (!%p2337_p4)
}
 0x5a7   :  { %s2341_s16 = scalar_lea.hbm %s3155_s9, 256 }
 0x5a8   :  { %p2342_p5 = scmp.ne.s32.totalorder %s3155_s9, %s2341_s16  ;;  %p2345_p6 = scmp.lt.u32.totalorder %s2341_s16, %s3155_s9 }
 0x5aa   :  { %p2347_p7 = pnand %p2345_p6, %p2342_p5 }
 0x5ac   :  { %2350 = shalt.err (!%p2347_p7)
}
 0x5ad   :  { %s2354_s2 = smov 128   ;;  %s2355_s19 = smov 8  }
 0x5ae   :  { %1772 = dma.vmem_to_hbm [thread:$0]  %s1767_s13, 256, %s3155_s9, [#allocation3], %s2354_s2, %s2354_s2, %s2355_s19  }
 0x5af   :  { %2351 = dma.done.wait [#allocation3], 256  }
 0x5b0   :  { %2352 = vsyncadd [#allocation3], 4294967040 }
 0x5b1   :  { %1776 = vsyncpa [#allocation3], 1 }

</bundles_post_ra>
